<compile_context>
chip_gen: v7x
topology: tpu7x:2x2x1
jax: 0.10.0
libtpu: 0.0.40
codegen_flags: <defaults>
</compile_context>

<pallas_src>
import functools

import numpy as np
import jax
import jax.numpy as jnp
from jax import lax
from jax.experimental import pallas as pl
from jax.experimental.pallas import tpu as pltpu

BN_EPS = 1e-5


def _round_up(x, m):
    return (x + m - 1) // m * m


# -----------------------------------------------------------------------------
# Generation-aware VMEM budgets (v5e/v6e: 128 MiB; v7x: 64 MiB per TensorCore).
# -----------------------------------------------------------------------------
def _tpu_vmem_capacity_bytes():
    try:
        info = pltpu.get_tpu_info()
        cap = getattr(info, "vmem_capacity_bytes", None)
        if cap:
            return int(cap)
    except Exception:
        pass
    return 64 * 1024 * 1024          # conservative default (v7x per-TC)


_VMEM_CAP = _tpu_vmem_capacity_bytes()
if _VMEM_CAP >= 128 * 1024 * 1024:           # v5e / v6e
    _VMEM_LIMIT = 100 * 1024 * 1024
    _WORKSET_BUDGET = 64 * 1024 * 1024
else:                                        # v7x (64 MiB / TC) or unknown
    _VMEM_LIMIT = 48 * 1024 * 1024
    _WORKSET_BUDGET = 24 * 1024 * 1024


# -----------------------------------------------------------------------------
# Kernel 1: fully fused conv_block_nested
#   conv1 (one bf16 MXU GEMM) -> BN/ReLU -> VMEM-staged im2col of the bf16
#   intermediate -> conv2 as ONE GEMM with K = 9*cm_p -> BN/ReLU.
#   The intermediate never leaves VMEM.
# -----------------------------------------------------------------------------
def _fused_block_kernel(a1_ref, w1_ref, s1_ref, t1_ref,
                        w2_ref, s2_ref, t2_ref, o_ref,
                        a1p_ref, ypad_ref, a2_ref, *, H, W, P, k1):
    HW = H * W
    cm_p = ypad_ref.shape[1]
    k1p = a1p_ref.shape[1]

    # ---- stage conv1 patches into a lane-padded VMEM tile (K padded here,
    #      NOT in HBM).  Tail re-zeroed every step (megacore-safe). ----
    if k1p > k1:
        a1p_ref[:, k1:] = jnp.zeros((HW, k1p - k1), jnp.bfloat16)
    a1p_ref[:, :k1] = a1_ref[0]

    # ---- conv1 + BN + ReLU: one bf16 GEMM, f32 accumulation ----
    y1 = jnp.dot(a1p_ref[...], w1_ref[...], preferred_element_type=jnp.float32)
    y1 = jnp.maximum(y1 * s1_ref[...] + t1_ref[...], 0.0).astype(jnp.bfloat16)

    # ---- zero-haloed bf16 staging so every 3x3 tap is a plain shifted read
    #      (P is 16-aligned so the three stores are sublane-aligned for bf16) ----
    ypad_ref[0:P, :] = jnp.zeros((P, cm_p), jnp.bfloat16)
    ypad_ref[P:P + HW, :] = y1
    ypad_ref[P + HW:P + HW + P, :] = jnp.zeros((P, cm_p), jnp.bfloat16)

    # Column-validity masks implement the zero padding along W (row-out-of-range
    # taps already read the zero halo rows).
    col = lax.broadcasted_iota(jnp.int32, (HW, 1), 0) % W
    m_left = col >= 1            # tap dx = -1 needs w-1 >= 0
    m_right = col <= W - 2       # tap dx = +1 needs w+1 <  W

    # ---- VMEM im2col of the intermediate: 9 taps -> (HW, 9*cm_p), each tap at
    #      a 128-aligned lane offset t*cm_p ----
    for dy in range(3):
        for dx in range(3):
            t = dy * 3 + dx
            off = (dy - 1) * W + (dx - 1)
            z = ypad_ref[P + off:P + off + HW, :]
            if dx == 0:
                z = jnp.where(m_left, z, jnp.zeros_like(z))
            elif dx == 2:
                z = jnp.where(m_right, z, jnp.zeros_like(z))
            a2_ref[:, t * cm_p:(t + 1) * cm_p] = z

    # ---- conv2 + BN + ReLU: ONE GEMM, K = 9*cm_p, f32 accumulation ----
    acc = jnp.dot(a2_ref[...], w2_ref[...], preferred_element_type=jnp.float32)
    o_ref[0] = jnp.maximum(acc * s2_ref[...] + t2_ref[...], 0.0).astype(o_ref.dtype)


# -----------------------------------------------------------------------------
# Kernel 2: fused GEMM + BN/ReLU epilogue (fallback path).
#   Full-K block, resident weights, 1-D grid over M tiles, lane-dense output.
#   K is lane-padded inside the kernel when needed (never in HBM).
# -----------------------------------------------------------------------------
def _make_gemm_bn_relu_kernel(k_valid, pad_k):
    if pad_k:
        def kernel(a_ref, b_ref, s_ref, t_ref, o_ref, apad_ref):
            tm, kp = apad_ref.shape
            apad_ref[:, k_valid:] = jnp.zeros((tm, kp - k_valid), jnp.bfloat16)
            apad_ref[:, :k_valid] = a_ref[...]
            acc = jnp.dot(apad_ref[...], b_ref[...],
                          preferred_element_type=jnp.float32)
            o_ref[...] = jnp.maximum(acc * s_ref[...] + t_ref[...],
                                     0.0).astype(o_ref.dtype)
    else:
        def kernel(a_ref, b_ref, s_ref, t_ref, o_ref):
            acc = jnp.dot(a_ref[...], b_ref[...],
                          preferred_element_type=jnp.float32)
            o_ref[...] = jnp.maximum(acc * s_ref[...] + t_ref[...],
                                     0.0).astype(o_ref.dtype)
    return kernel


def _pick_tm(M, K, Kp, Np, budget):
    """Big lane-dense M tiles; shrink to the working-set budget; keep >=2 blocks
    along M when M is large enough so both v7x TensorCores get work."""
    tm = min(_round_up(M, 8), 2048)

    def need(tm_):
        return (2 * tm_ * K * 2          # double-buffered bf16 A tile (unpadded K)
                + Kp * Np * 2            # resident bf16 weights
                + tm_ * Kp * 2           # lane-pad staging scratch
                + 2 * tm_ * Np * 4       # double-buffered out tile (f32 worst case)
                + 2 * tm_ * Np * 4)      # live f32 epilogue temporaries

    while tm > 256 and need(tm) > budget:
        tm //= 2
    if tm >= M and M > 256:
        tm = _round_up((M + 1) // 2, 8)  # 2 blocks -> megacore-friendly
    return max(tm, 8)


def fused_gemm_bn_relu(A, B, scale_p, shift_p, out_dtype=jnp.float32):
    """A: (M, K) bf16 (K unpadded), B: (Kp, Np) bf16 (Kp = round_up(K,128)),
    scale/shift: (1, Np) f32.  Returns relu((A @ B) * scale + shift) as (M, Np)."""
    M, K = A.shape
    Kp, Np = B.shape
    assert Kp >= K, (Kp, K)

    tm = _pick_tm(M, K, Kp, Np, _WORKSET_BUDGET)
    Mp = _round_up(M, tm)
    if Mp != M:
        A = jnp.pad(A, ((0, Mp - M), (0, 0)))

    pad_k = Kp != K
    kernel = _make_gemm_bn_relu_kernel(k_valid=K, pad_k=pad_k)
    scratch = [pltpu.VMEM((tm, Kp), jnp.bfloat16)] if pad_k else []

    out_bytes = Mp * Np * np.dtype(out_dtype).itemsize
    cost = pl.CostEstimate(
        flops=int(2 * Mp * Kp * Np), transcendentals=0,
        bytes_accessed=int(Mp * K * 2 + Kp * Np * 2 + out_bytes))

    out = pl.pallas_call(
        kernel,
        out_shape=jax.ShapeDtypeStruct((Mp, Np), out_dtype),
        grid_spec=pltpu.PrefetchScalarGridSpec(
            num_scalar_prefetch=0,
            grid=(Mp // tm,),
            in_specs=[
                pl.BlockSpec((tm, K), lambda i: (i, 0)),     # patches, K unpadded
                pl.BlockSpec((Kp, Np), lambda i: (0, 0)),    # weights fully resident
                pl.BlockSpec((1, Np), lambda i: (0, 0)),
                pl.BlockSpec((1, Np), lambda i: (0, 0)),
            ],
            out_specs=pl.BlockSpec((tm, Np), lambda i: (i, 0)),
            scratch_shapes=scratch,
        ),
        compiler_params=pltpu.CompilerParams(
            dimension_semantics=("parallel",),
            vmem_limit_bytes=_VMEM_LIMIT),
        cost_estimate=cost,
    )(A, B, scale_p, shift_p)
    return out[:M]


# -----------------------------------------------------------------------------
# Glue (XLA): im2col patches, emitted directly in bf16, never K-padded in HBM.
# -----------------------------------------------------------------------------
def _im2col_nhwc(x, k=3):
    """x: (N, H, W, C) -> (N, H*W, k*k*C) patches for a stride-1 'same' conv."""
    N, H, W, C = x.shape
    p = k // 2
    xp = jnp.pad(x, ((0, 0), (p, p), (p, p), (0, 0)))
    cols = [xp[:, dy:dy + H, dx:dx + W, :] for dy in range(k) for dx in range(k)]
    return jnp.concatenate(cols, axis=-1).reshape(N, H * W, k * k * C)


def _conv3x3_bn_relu_gemm(x_nhwc, layer, out_dtype):
    """Fallback: im2col (bf16, unpadded K) + one fused GEMM/BN/ReLU pallas_call."""
    N, H, W, C = x_nhwc.shape
    A = _im2col_nhwc(x_nhwc.astype(jnp.bfloat16), 3).reshape(N * H * W, 9 * C)
    out = fused_gemm_bn_relu(A, layer["w_gemm"], layer["scale_p"], layer["shift_p"],
                             out_dtype=out_dtype)
    return out[:, :layer["cout"]].reshape(N, H, W, layer["cout"])


def _fused_conv_block(x_nhwc, p1, p2):
    """Both convs of conv_block_nested in one pallas_call (grid over batch)."""
    N, H, W, Cin = x_nhwc.shape
    HW = H * W
    k1 = 9 * Cin
    k1p, cm_p = p1["w_gemm"].shape
    k2p, co_p = p2["w_taps"].shape
    assert k2p == 9 * cm_p, (k2p, cm_p)
    P = _round_up(W + 1, 16)          # bf16 sublane-aligned zero-halo depth

    a1 = _im2col_nhwc(x_nhwc.astype(jnp.bfloat16), 3)     # (N, HW, 9*Cin) bf16

    cost = pl.CostEstimate(
        flops=int(2 * N * HW * (k1p * cm_p + 9 * cm_p * co_p)),
        transcendentals=0,
        bytes_accessed=int(a1.size) * 2 + int(p1["w_gemm"].size) * 2
                       + int(p2["w_taps"].size) * 2 + int(N * HW * co_p * 4))

    out = pl.pallas_call(
        functools.partial(_fused_block_kernel, H=H, W=W, P=P, k1=k1),
        out_shape=jax.ShapeDtypeStruct((N, HW, co_p), jnp.float32),
        grid_spec=pltpu.PrefetchScalarGridSpec(
            num_scalar_prefetch=0,
            grid=(N,),
            in_specs=[
                pl.BlockSpec((1, HW, k1), lambda n: (n, 0, 0)),
                pl.BlockSpec((k1p, cm_p), lambda n: (0, 0)),
                pl.BlockSpec((1, cm_p), lambda n: (0, 0)),
                pl.BlockSpec((1, cm_p), lambda n: (0, 0)),
                pl.BlockSpec((9 * cm_p, co_p), lambda n: (0, 0)),
                pl.BlockSpec((1, co_p), lambda n: (0, 0)),
                pl.BlockSpec((1, co_p), lambda n: (0, 0)),
            ],
            out_specs=pl.BlockSpec((1, HW, co_p), lambda n: (n, 0, 0)),
            scratch_shapes=[
                pltpu.VMEM((HW, k1p), jnp.bfloat16),           # lane-padded conv1 patches
                pltpu.VMEM((HW + 2 * P, cm_p), jnp.bfloat16),  # zero-haloed intermediate
                pltpu.VMEM((HW, 9 * cm_p), jnp.bfloat16),      # staged conv2 im2col
            ],
        ),
        compiler_params=pltpu.CompilerParams(
            dimension_semantics=("parallel",),
            vmem_limit_bytes=_VMEM_LIMIT),
        cost_estimate=cost,
    )(a1, p1["w_gemm"], p1["scale_p"], p1["shift_p"],
      p2["w_taps"], p2["scale_p"], p2["shift_p"])
    return out[:, :, :p2["cout"]].reshape(N, H, W, p2["cout"])


def _fused_fits(N, H, W, p1, p2, budget_bytes=_WORKSET_BUDGET):
    """Use the single-kernel fused path only when its working set fits VMEM and
    the batch grid gives at least 2 parallel blocks (v7x megacore)."""
    if N < 2:
        return False
    if W < 2 or (H * W) % 8 != 0:
        return False
    HW = H * W
    k1 = 9 * p1["cin"]
    k1p, cm_p = p1["w_gemm"].shape
    co_p = p2["w_taps"].shape[1]
    P = _round_up(W + 1, 16)
    need = (2 * HW * k1 * 2                           # double-buffered bf16 patch block
            + (k1p * cm_p + 9 * cm_p * co_p) * 2      # resident bf16 weights
            + 2 * HW * co_p * 4                       # double-buffered f32 out block
            + HW * k1p * 2                            # lane-pad scratch
            + (HW + 2 * P) * cm_p * 2                 # bf16 halo scratch
            + HW * 9 * cm_p * 2                       # bf16 staged im2col scratch
            + 3 * HW * max(cm_p, co_p) * 4)           # live f32 temporaries headroom
    return need <= budget_bytes


# -----------------------------------------------------------------------------
# Parameters (conv weight + bias, eval-mode BN folded into scale/shift),
# pre-padded to the lane grid and pre-cast to bf16 once at init.
# -----------------------------------------------------------------------------
def init_conv_bn(key, cin, cout):
    ks = jax.random.split(key, 6)
    w = jax.random.normal(ks[0], (3, 3, cin, cout), jnp.float32) / np.sqrt(9 * cin)
    b = 0.02 * jax.random.normal(ks[1], (cout,), jnp.float32)
    gamma = 1.0 + 0.1 * jax.random.normal(ks[2], (cout,), jnp.float32)
    beta = 0.1 * jax.random.normal(ks[3], (cout,), jnp.float32)
    mean = 0.1 * jax.random.normal(ks[4], (cout,), jnp.float32)
    var = 0.9 + 0.2 * jax.random.uniform(ks[5], (cout,), jnp.float32)
    scale = gamma / jnp.sqrt(var + BN_EPS)            # eval-mode BN folded
    shift = beta + (b - mean) * scale

    kin = 9 * cin
    kin_p = _round_up(kin, 128)
    cin_p = _round_up(cin, 128)
    cout_p = _round_up(cout, 128)
    # GEMM layout (kin_p, cout_p): row order (dy, dx, cin) matches _im2col_nhwc.
    w_gemm = jnp.pad(w.reshape(kin, cout),
                     ((0, kin_p - kin), (0, cout_p - cout))).astype(jnp.bfloat16)
    # Staged-im2col layout (9*cin_p, cout_p): tap-major rows, 128-aligned blocks,
    # for the fused second conv's single GEMM.
    w_taps = jnp.pad(w.reshape(9, cin, cout),
                     ((0, 0), (0, cin_p - cin), (0, cout_p - cout)))
    w_taps = w_taps.reshape(9 * cin_p, cout_p).astype(jnp.bfloat16)
    scale_p = jnp.pad(scale, (0, cout_p - cout)).reshape(1, cout_p)
    shift_p = jnp.pad(shift, (0, cout_p - cout)).reshape(1, cout_p)
    return dict(w_hwio=w, scale=scale, shift=shift,
                w_gemm=w_gemm, w_taps=w_taps,
                scale_p=scale_p, shift_p=shift_p, cin=cin, cout=cout)


def init_params(key, in_ch, mid_ch, out_ch):
    k1, k2 = jax.random.split(key)
    return {"conv1": init_conv_bn(k1, in_ch, mid_ch),
            "conv2": init_conv_bn(k2, mid_ch, out_ch)}


# -----------------------------------------------------------------------------
# Forward pass (NCHW in, NCHW out) + pure-JAX reference
# -----------------------------------------------------------------------------
def conv_block_nested_forward(params, x_nchw, use_fused=True):
    x = jnp.transpose(x_nchw, (0, 2, 3, 1))          # -> NHWC
    p1, p2 = params["conv1"], params["conv2"]
    N, H, W, _ = x.shape
    if use_fused and _fused_fits(N, H, W, p1, p2):
        y = _fused_conv_block(x, p1, p2)
    else:
        # bf16 intermediate halves the HBM writeback between the two convs.
        y = _conv3x3_bn_relu_gemm(x, p1, out_dtype=jnp.bfloat16)
        y = _conv3x3_bn_relu_gemm(y, p2, out_dtype=jnp.float32)
    return jnp.transpose(y, (0, 3, 1, 2))            # -> NCHW


def reference_forward(params, x_nchw):
    x = jnp.transpose(x_nchw, (0, 2, 3, 1)).astype(jnp.float32)
    dn = ("NHWC", "HWIO", "NHWC")
    for name in ("conv1", "conv2"):
        p = params[name]
        x = lax.conv_general_dilated(x, p["w_hwio"], (1, 1), "SAME",
                                     dimension_numbers=dn,
                                     precision=lax.Precision.HIGHEST)
        x = jnp.maximum(x * p["scale"] + p["shift"], 0.0)
    return jnp.transpose(x, (0, 3, 1, 2))


if __name__ == "__main__":
    key = jax.random.PRNGKey(0)
    pkey, xkey = jax.random.split(key)

    N, in_ch, mid_ch, out_ch, H, W = 2, 4, 32, 32, 16, 16
    params = init_params(pkey, in_ch, mid_ch, out_ch)
    x = jax.random.normal(xkey, (N, in_ch, H, W), jnp.float32)

    ref = jax.block_until_ready(reference_forward(params, x))

    out = None
    try:
        out = jax.block_until_ready(
            conv_block_nested_forward(params, x, use_fused=True))
        ok = (out.shape == ref.shape
              and bool(jnp.all(jnp.isfinite(out)))
              and float(jnp.max(jnp.abs(out - ref))) < 0.1)
        if not ok:
            out = None
    except Exception:
        out = None                      # fall back to the two-GEMM path
    if out is None:
        out = jax.block_until_ready(
            conv_block_nested_forward(params, x, use_fused=False))

    assert out.shape == (N, out_ch, H, W), out.shape
    assert bool(jnp.all(jnp.isfinite(out)))
    assert float(jnp.max(jnp.abs(out - ref))) < 0.5   # bf16-operand tolerance
    print("KERNEL_OK")
</pallas_src>

<mosaic_0001>
module attributes {stable_mosaic.version = 11 : i64} {
  func.func @_fused_block_kernel(%arg0: i32, %arg1: memref<1x256x36xbf16, #tpu.memory_space<vmem>>, %arg2: memref<128x128xbf16, #tpu.memory_space<vmem>>, %arg3: memref<1x128xf32, #tpu.memory_space<vmem>>, %arg4: memref<1x128xf32, #tpu.memory_space<vmem>>, %arg5: memref<1152x128xbf16, #tpu.memory_space<vmem>>, %arg6: memref<1x128xf32, #tpu.memory_space<vmem>>, %arg7: memref<1x128xf32, #tpu.memory_space<vmem>>, %arg8: memref<1x256x128xf32, #tpu.memory_space<vmem>>, %arg9: memref<256x128xbf16, #tpu.memory_space<vmem>>, %arg10: memref<320x128xbf16, #tpu.memory_space<vmem>>, %arg11: memref<256x1152xbf16, #tpu.memory_space<vmem>>) attributes {dimension_semantics = [#tpu.dimension_semantics<parallel>], iteration_bounds = array<i64: 2>, scalar_prefetch = 0 : i64, scratch_operands = 3 : i64, tpu.core_type = #tpu.core_type<tc>, window_params = [{transform_indices = @transform_0, window_bounds = array<i64: 1, 256, 36>}, {pipeline_mode = #tpu.pipeline_mode<synchronous>, transform_indices = @transform_1, window_bounds = array<i64: 128, 128>}, {pipeline_mode = #tpu.pipeline_mode<synchronous>, transform_indices = @transform_2, window_bounds = array<i64: 1, 128>}, {pipeline_mode = #tpu.pipeline_mode<synchronous>, transform_indices = @transform_3, window_bounds = array<i64: 1, 128>}, {pipeline_mode = #tpu.pipeline_mode<synchronous>, transform_indices = @transform_4, window_bounds = array<i64: 1152, 128>}, {pipeline_mode = #tpu.pipeline_mode<synchronous>, transform_indices = @transform_5, window_bounds = array<i64: 1, 128>}, {pipeline_mode = #tpu.pipeline_mode<synchronous>, transform_indices = @transform_6, window_bounds = array<i64: 1, 128>}, {transform_indices = @transform_7, window_bounds = array<i64: 1, 256, 128>}]} {
    %cst = arith.constant 0.000000e+00 : bf16
    %0 = vector.broadcast %cst : bf16 to vector<256x92xbf16>
    %c0 = arith.constant 0 : index
    %c36 = arith.constant 36 : index
    %1 = vector.load %arg9[%c0, %c36] : memref<256x128xbf16, #tpu.memory_space<vmem>>, vector<256x92xbf16>
    tpu.vector_store %arg9[%c0, %c36], %0 {strides = array<i32>} : memref<256x128xbf16, #tpu.memory_space<vmem>>, vector<256x92xbf16>,
    %c0_0 = arith.constant 0 : index
    %c0_1 = arith.constant 0 : index
    %c0_2 = arith.constant 0 : index
    %2 = vector.load %arg1[%c0_0, %c0_1, %c0_2] : memref<1x256x36xbf16, #tpu.memory_space<vmem>>, vector<1x256x36xbf16>
    %3 = vector.shape_cast %2 : vector<1x256x36xbf16> to vector<256x36xbf16>
    %c0_3 = arith.constant 0 : index
    %c0_4 = arith.constant 0 : index
    %4 = vector.load %arg9[%c0_3, %c0_4] : memref<256x128xbf16, #tpu.memory_space<vmem>>, vector<256x36xbf16>
    tpu.vector_store %arg9[%c0_3, %c0_4], %3 {strides = array<i32>} : memref<256x128xbf16, #tpu.memory_space<vmem>>, vector<256x36xbf16>,
    %c0_5 = arith.constant 0 : index
    %c0_6 = arith.constant 0 : index
    %5 = vector.load %arg9[%c0_5, %c0_6] : memref<256x128xbf16, #tpu.memory_space<vmem>>, vector<256x128xbf16>
    %c0_7 = arith.constant 0 : index
    %c0_8 = arith.constant 0 : index
    %6 = vector.load %arg2[%c0_7, %c0_8] : memref<128x128xbf16, #tpu.memory_space<vmem>>, vector<128x128xbf16>
    %cst_9 = arith.constant dense<0.000000e+00> : vector<256x128xf32>
    %7 = tpu.matmul %5, %6, %cst_9 {dimension_numbers = #tpu.dot_dimension_numbers<[1], [0], [0], [1], [0, 0, 1, 1], [], []>} : vector<256x128xbf16>, vector<128x128xbf16>, vector<256x128xf32> -> vector<256x128xf32>
    %c0_10 = arith.constant 0 : index
    %c0_11 = arith.constant 0 : index
    %8 = vector.load %arg3[%c0_10, %c0_11] : memref<1x128xf32, #tpu.memory_space<vmem>>, vector<1x128xf32>
    %9 = vector.broadcast %8 : vector<1x128xf32> to vector<256x128xf32>
    %10 = arith.mulf %7, %9 : vector<256x128xf32>
    %c0_12 = arith.constant 0 : index
    %c0_13 = arith.constant 0 : index
    %11 = vector.load %arg4[%c0_12, %c0_13] : memref<1x128xf32, #tpu.memory_space<vmem>>, vector<1x128xf32>
    %12 = vector.broadcast %11 : vector<1x128xf32> to vector<256x128xf32>
    %13 = arith.addf %10, %12 : vector<256x128xf32>
    %cst_14 = arith.constant 0.000000e+00 : f32
    %14 = vector.broadcast %cst_14 : f32 to vector<256x128xf32>
    %15 = arith.maximumf %13, %14 : vector<256x128xf32>
    %16 = arith.truncf %15 : vector<256x128xf32> to vector<256x128xbf16>
    %cst_15 = arith.constant 0.000000e+00 : bf16
    %17 = vector.broadcast %cst_15 : bf16 to vector<32x128xbf16>
    %c0_16 = arith.constant 0 : index
    %c0_17 = arith.constant 0 : index
    %18 = vector.load %arg10[%c0_16, %c0_17] : memref<320x128xbf16, #tpu.memory_space<vmem>>, vector<32x128xbf16>
    tpu.vector_store %arg10[%c0_16, %c0_17], %17 {strides = array<i32>} : memref<320x128xbf16, #tpu.memory_space<vmem>>, vector<32x128xbf16>,
    %c32 = arith.constant 32 : index
    %c0_18 = arith.constant 0 : index
    %19 = vector.load %arg10[%c32, %c0_18] : memref<320x128xbf16, #tpu.memory_space<vmem>>, vector<256x128xbf16>
    tpu.vector_store %arg10[%c32, %c0_18], %16 {strides = array<i32>} : memref<320x128xbf16, #tpu.memory_space<vmem>>, vector<256x128xbf16>,
    %cst_19 = arith.constant 0.000000e+00 : bf16
    %20 = vector.broadcast %cst_19 : bf16 to vector<32x128xbf16>
    %c288 = arith.constant 288 : index
    %c0_20 = arith.constant 0 : index
    %21 = vector.load %arg10[%c288, %c0_20] : memref<320x128xbf16, #tpu.memory_space<vmem>>, vector<32x128xbf16>
    tpu.vector_store %arg10[%c288, %c0_20], %20 {strides = array<i32>} : memref<320x128xbf16, #tpu.memory_space<vmem>>, vector<32x128xbf16>,
    %22 = tpu.iota {dimensions = array<i32: 0>} : vector<256x1xi32>
    %c16_i32 = arith.constant 16 : i32
    %c0_i32 = arith.constant 0 : i32
    %23 = arith.cmpi eq, %c16_i32, %c0_i32 : i32
    %c1_i32 = arith.constant 1 : i32
    %24 = arith.select %23, %c1_i32, %c16_i32 : i32
    %25 = vector.broadcast %24 : i32 to vector<256x1xi32>
    %26 = arith.remsi %22, %25 : vector<256x1xi32>
    %c0_i32_21 = arith.constant 0 : i32
    %27 = vector.broadcast %c0_i32_21 : i32 to vector<256x1xi32>
    %28 = arith.cmpi ne, %26, %27 : vector<256x1xi32>
    %c0_i32_22 = arith.constant 0 : i32
    %29 = vector.broadcast %c0_i32_22 : i32 to vector<256x1xi32>
    %30 = arith.cmpi slt, %26, %29 : vector<256x1xi32>
    %c0_i32_23 = arith.constant 0 : i32
    %31 = arith.cmpi slt, %24, %c0_i32_23 : i32
    %32 = vector.broadcast %31 : i1 to vector<256x1xi1>
    %33 = vector.broadcast %32 : vector<256x1xi1> to vector<256x1xi1>
    %34 = arith.xori %30, %33 : vector<256x1xi1>
    %35 = arith.andi %34, %28 : vector<256x1xi1>
    %36 = vector.broadcast %24 : i32 to vector<256x1xi32>
    %37 = arith.addi %26, %36 : vector<256x1xi32>
    %38 = arith.select %35, %37, %26 : vector<256x1xi1>, vector<256x1xi32>
    %c1_i32_24 = arith.constant 1 : i32
    %39 = vector.broadcast %c1_i32_24 : i32 to vector<256x1xi32>
    %40 = arith.cmpi sge, %38, %39 : vector<256x1xi32>
    %c14_i32 = arith.constant 14 : i32
    %41 = vector.broadcast %c14_i32 : i32 to vector<256x1xi32>
    %42 = arith.cmpi sle, %38, %41 : vector<256x1xi32>
    %c15 = arith.constant 15 : index
    %c0_25 = arith.constant 0 : index
    %43 = vector.load %arg10[%c15, %c0_25] : memref<320x128xbf16, #tpu.memory_space<vmem>>, vector<256x128xbf16>
    %cst_26 = arith.constant 0.000000e+00 : bf16
    %44 = vector.broadcast %cst_26 : bf16 to vector<256x128xbf16>
    %45 = vector.shape_cast %40 : vector<256x1xi1> to vector<256x1xi1>
    %46 = vector.broadcast %45 : vector<256x1xi1> to vector<256x128xi1>
    %47 = arith.select %46, %43, %44 : vector<256x128xi1>, vector<256x128xbf16>
    %c0_27 = arith.constant 0 : index
    %c0_28 = arith.constant 0 : index
    %48 = vector.load %arg11[%c0_27, %c0_28] : memref<256x1152xbf16, #tpu.memory_space<vmem>>, vector<256x128xbf16>
    tpu.vector_store %arg11[%c0_27, %c0_28], %47 {strides = array<i32>} : memref<256x1152xbf16, #tpu.memory_space<vmem>>, vector<256x128xbf16>,
    %c16 = arith.constant 16 : index
    %c0_29 = arith.constant 0 : index
    %49 = vector.load %arg10[%c16, %c0_29] : memref<320x128xbf16, #tpu.memory_space<vmem>>, vector<256x128xbf16>
    %c0_30 = arith.constant 0 : index
    %c128 = arith.constant 128 : index
    %50 = vector.load %arg11[%c0_30, %c128] : memref<256x1152xbf16, #tpu.memory_space<vmem>>, vector<256x128xbf16>
    tpu.vector_store %arg11[%c0_30, %c128], %49 {strides = array<i32>} : memref<256x1152xbf16, #tpu.memory_space<vmem>>, vector<256x128xbf16>,
    %c17 = arith.constant 17 : index
    %c0_31 = arith.constant 0 : index
    %51 = vector.load %arg10[%c17, %c0_31] : memref<320x128xbf16, #tpu.memory_space<vmem>>, vector<256x128xbf16>
    %cst_32 = arith.constant 0.000000e+00 : bf16
    %52 = vector.broadcast %cst_32 : bf16 to vector<256x128xbf16>
    %53 = vector.shape_cast %42 : vector<256x1xi1> to vector<256x1xi1>
    %54 = vector.broadcast %53 : vector<256x1xi1> to vector<256x128xi1>
    %55 = arith.select %54, %51, %52 : vector<256x128xi1>, vector<256x128xbf16>
    %c0_33 = arith.constant 0 : index
    %c256 = arith.constant 256 : index
    %56 = vector.load %arg11[%c0_33, %c256] : memref<256x1152xbf16, #tpu.memory_space<vmem>>, vector<256x128xbf16>
    tpu.vector_store %arg11[%c0_33, %c256], %55 {strides = array<i32>} : memref<256x1152xbf16, #tpu.memory_space<vmem>>, vector<256x128xbf16>,
    %c31 = arith.constant 31 : index
    %c0_34 = arith.constant 0 : index
    %57 = vector.load %arg10[%c31, %c0_34] : memref<320x128xbf16, #tpu.memory_space<vmem>>, vector<256x128xbf16>
    %cst_35 = arith.constant 0.000000e+00 : bf16
    %58 = vector.broadcast %cst_35 : bf16 to vector<256x128xbf16>
    %59 = vector.shape_cast %40 : vector<256x1xi1> to vector<256x1xi1>
    %60 = vector.broadcast %59 : vector<256x1xi1> to vector<256x128xi1>
    %61 = arith.select %60, %57, %58 : vector<256x128xi1>, vector<256x128xbf16>
    %c0_36 = arith.constant 0 : index
    %c384 = arith.constant 384 : index
    %62 = vector.load %arg11[%c0_36, %c384] : memref<256x1152xbf16, #tpu.memory_space<vmem>>, vector<256x128xbf16>
    tpu.vector_store %arg11[%c0_36, %c384], %61 {strides = array<i32>} : memref<256x1152xbf16, #tpu.memory_space<vmem>>, vector<256x128xbf16>,
    %c32_37 = arith.constant 32 : index
    %c0_38 = arith.constant 0 : index
    %63 = vector.load %arg10[%c32_37, %c0_38] : memref<320x128xbf16, #tpu.memory_space<vmem>>, vector<256x128xbf16>
    %c0_39 = arith.constant 0 : index
    %c512 = arith.constant 512 : index
    %64 = vector.load %arg11[%c0_39, %c512] : memref<256x1152xbf16, #tpu.memory_space<vmem>>, vector<256x128xbf16>
    tpu.vector_store %arg11[%c0_39, %c512], %63 {strides = array<i32>} : memref<256x1152xbf16, #tpu.memory_space<vmem>>, vector<256x128xbf16>,
    %c33 = arith.constant 33 : index
    %c0_40 = arith.constant 0 : index
    %65 = vector.load %arg10[%c33, %c0_40] : memref<320x128xbf16, #tpu.memory_space<vmem>>, vector<256x128xbf16>
    %cst_41 = arith.constant 0.000000e+00 : bf16
    %66 = vector.broadcast %cst_41 : bf16 to vector<256x128xbf16>
    %67 = vector.shape_cast %42 : vector<256x1xi1> to vector<256x1xi1>
    %68 = vector.broadcast %67 : vector<256x1xi1> to vector<256x128xi1>
    %69 = arith.select %68, %65, %66 : vector<256x128xi1>, vector<256x128xbf16>
    %c0_42 = arith.constant 0 : index
    %c640 = arith.constant 640 : index
    %70 = vector.load %arg11[%c0_42, %c640] : memref<256x1152xbf16, #tpu.memory_space<vmem>>, vector<256x128xbf16>
    tpu.vector_store %arg11[%c0_42, %c640], %69 {strides = array<i32>} : memref<256x1152xbf16, #tpu.memory_space<vmem>>, vector<256x128xbf16>,
    %c47 = arith.constant 47 : index
    %c0_43 = arith.constant 0 : index
    %71 = vector.load %arg10[%c47, %c0_43] : memref<320x128xbf16, #tpu.memory_space<vmem>>, vector<256x128xbf16>
    %cst_44 = arith.constant 0.000000e+00 : bf16
    %72 = vector.broadcast %cst_44 : bf16 to vector<256x128xbf16>
    %73 = vector.shape_cast %40 : vector<256x1xi1> to vector<256x1xi1>
    %74 = vector.broadcast %73 : vector<256x1xi1> to vector<256x128xi1>
    %75 = arith.select %74, %71, %72 : vector<256x128xi1>, vector<256x128xbf16>
    %c0_45 = arith.constant 0 : index
    %c768 = arith.constant 768 : index
    %76 = vector.load %arg11[%c0_45, %c768] : memref<256x1152xbf16, #tpu.memory_space<vmem>>, vector<256x128xbf16>
    tpu.vector_store %arg11[%c0_45, %c768], %75 {strides = array<i32>} : memref<256x1152xbf16, #tpu.memory_space<vmem>>, vector<256x128xbf16>,
    %c48 = arith.constant 48 : index
    %c0_46 = arith.constant 0 : index
    %77 = vector.load %arg10[%c48, %c0_46] : memref<320x128xbf16, #tpu.memory_space<vmem>>, vector<256x128xbf16>
    %c0_47 = arith.constant 0 : index
    %c896 = arith.constant 896 : index
    %78 = vector.load %arg11[%c0_47, %c896] : memref<256x1152xbf16, #tpu.memory_space<vmem>>, vector<256x128xbf16>
    tpu.vector_store %arg11[%c0_47, %c896], %77 {strides = array<i32>} : memref<256x1152xbf16, #tpu.memory_space<vmem>>, vector<256x128xbf16>,
    %c49 = arith.constant 49 : index
    %c0_48 = arith.constant 0 : index
    %79 = vector.load %arg10[%c49, %c0_48] : memref<320x128xbf16, #tpu.memory_space<vmem>>, vector<256x128xbf16>
    %cst_49 = arith.constant 0.000000e+00 : bf16
    %80 = vector.broadcast %cst_49 : bf16 to vector<256x128xbf16>
    %81 = vector.shape_cast %42 : vector<256x1xi1> to vector<256x1xi1>
    %82 = vector.broadcast %81 : vector<256x1xi1> to vector<256x128xi1>
    %83 = arith.select %82, %79, %80 : vector<256x128xi1>, vector<256x128xbf16>
    %c0_50 = arith.constant 0 : index
    %c1024 = arith.constant 1024 : index
    %84 = vector.load %arg11[%c0_50, %c1024] : memref<256x1152xbf16, #tpu.memory_space<vmem>>, vector<256x128xbf16>
    tpu.vector_store %arg11[%c0_50, %c1024], %83 {strides = array<i32>} : memref<256x1152xbf16, #tpu.memory_space<vmem>>, vector<256x128xbf16>,
    %c0_51 = arith.constant 0 : index
    %c0_52 = arith.constant 0 : index
    %85 = vector.load %arg11[%c0_51, %c0_52] : memref<256x1152xbf16, #tpu.memory_space<vmem>>, vector<256x1152xbf16>
    %c0_53 = arith.constant 0 : index
    %c0_54 = arith.constant 0 : index
    %86 = vector.load %arg5[%c0_53, %c0_54] : memref<1152x128xbf16, #tpu.memory_space<vmem>>, vector<1152x128xbf16>
    %cst_55 = arith.constant dense<0.000000e+00> : vector<256x128xf32>
    %87 = tpu.matmul %85, %86, %cst_55 {dimension_numbers = #tpu.dot_dimension_numbers<[1], [0], [0], [1], [0, 0, 1, 1], [], []>} : vector<256x1152xbf16>, vector<1152x128xbf16>, vector<256x128xf32> -> vector<256x128xf32>
    %c0_56 = arith.constant 0 : index
    %c0_57 = arith.constant 0 : index
    %88 = vector.load %arg6[%c0_56, %c0_57] : memref<1x128xf32, #tpu.memory_space<vmem>>, vector<1x128xf32>
    %89 = vector.broadcast %88 : vector<1x128xf32> to vector<256x128xf32>
    %90 = arith.mulf %87, %89 : vector<256x128xf32>
    %c0_58 = arith.constant 0 : index
    %c0_59 = arith.constant 0 : index
    %91 = vector.load %arg7[%c0_58, %c0_59] : memref<1x128xf32, #tpu.memory_space<vmem>>, vector<1x128xf32>
    %92 = vector.broadcast %91 : vector<1x128xf32> to vector<256x128xf32>
    %93 = arith.addf %90, %92 : vector<256x128xf32>
    %cst_60 = arith.constant 0.000000e+00 : f32
    %94 = vector.broadcast %cst_60 : f32 to vector<256x128xf32>
    %95 = arith.maximumf %93, %94 : vector<256x128xf32>
    %c0_61 = arith.constant 0 : index
    %c0_62 = arith.constant 0 : index
    %c0_63 = arith.constant 0 : index
    %96 = vector.load %arg8[%c0_61, %c0_62, %c0_63] : memref<1x256x128xf32, #tpu.memory_space<vmem>>, vector<1x256x128xf32>
    %97 = vector.shape_cast %96 : vector<1x256x128xf32> to vector<256x128xf32>
    %98 = vector.shape_cast %95 : vector<256x128xf32> to vector<1x256x128xf32>
    tpu.vector_store %arg8[%c0_61, %c0_62, %c0_63], %98 {strides = array<i32>} : memref<1x256x128xf32, #tpu.memory_space<vmem>>, vector<1x256x128xf32>,
    return
  }
  func.func @transform_0(%arg0: i32) -> (i32, i32, i32) {
    %c0_i32 = arith.constant 0 : i32
    %c0_i32_0 = arith.constant 0 : i32
    %c0_i32_1 = arith.constant 0 : i32
    return %arg0, %c0_i32, %c0_i32_0 : i32, i32, i32
  }
  func.func @transform_1(%arg0: i32) -> (i32, i32) {
    %c0_i32 = arith.constant 0 : i32
    %c0_i32_0 = arith.constant 0 : i32
    %c0_i32_1 = arith.constant 0 : i32
    return %c0_i32, %c0_i32_0 : i32, i32
  }
  func.func @transform_2(%arg0: i32) -> (i32, i32) {
    %c0_i32 = arith.constant 0 : i32
    %c0_i32_0 = arith.constant 0 : i32
    %c0_i32_1 = arith.constant 0 : i32
    return %c0_i32, %c0_i32_0 : i32, i32
  }
  func.func @transform_3(%arg0: i32) -> (i32, i32) {
    %c0_i32 = arith.constant 0 : i32
    %c0_i32_0 = arith.constant 0 : i32
    %c0_i32_1 = arith.constant 0 : i32
    return %c0_i32, %c0_i32_0 : i32, i32
  }
  func.func @transform_4(%arg0: i32) -> (i32, i32) {
    %c0_i32 = arith.constant 0 : i32
    %c0_i32_0 = arith.constant 0 : i32
    %c0_i32_1 = arith.constant 0 : i32
    return %c0_i32, %c0_i32_0 : i32, i32
  }
  func.func @transform_5(%arg0: i32) -> (i32, i32) {
    %c0_i32 = arith.constant 0 : i32
    %c0_i32_0 = arith.constant 0 : i32
    %c0_i32_1 = arith.constant 0 : i32
    return %c0_i32, %c0_i32_0 : i32, i32
  }
  func.func @transform_6(%arg0: i32) -> (i32, i32) {
    %c0_i32 = arith.constant 0 : i32
    %c0_i32_0 = arith.constant 0 : i32
    %c0_i32_1 = arith.constant 0 : i32
    return %c0_i32, %c0_i32_0 : i32, i32
  }
  func.func @transform_7(%arg0: i32) -> (i32, i32, i32) {
    %c0_i32 = arith.constant 0 : i32
    %c0_i32_0 = arith.constant 0 : i32
    %c0_i32_1 = arith.constant 0 : i32
    return %arg0, %c0_i32, %c0_i32_0 : i32, i32, i32
  }
}

module attributes {stable_mosaic.version = 11 : i64} {
  func.func @kernel(%arg0: i32, %arg1: memref<256x36xbf16, #tpu.memory_space<vmem>>, %arg2: memref<128x128xbf16, #tpu.memory_space<vmem>>, %arg3: memref<1x128xf32, #tpu.memory_space<vmem>>, %arg4: memref<1x128xf32, #tpu.memory_space<vmem>>, %arg5: memref<256x128xbf16, #tpu.memory_space<vmem>>, %arg6: memref<256x128xbf16, #tpu.memory_space<vmem>>) attributes {dimension_semantics = [#tpu.dimension_semantics<parallel>], iteration_bounds = array<i64: 2>, scalar_prefetch = 0 : i64, scratch_operands = 1 : i64, tpu.core_type = #tpu.core_type<tc>, window_params = [{transform_indices = @transform_0, window_bounds = array<i64: 256, 36>}, {pipeline_mode = #tpu.pipeline_mode<synchronous>, transform_indices = @transform_1, window_bounds = array<i64: 128, 128>}, {pipeline_mode = #tpu.pipeline_mode<synchronous>, transform_indices = @transform_2, window_bounds = array<i64: 1, 128>}, {pipeline_mode = #tpu.pipeline_mode<synchronous>, transform_indices = @transform_3, window_bounds = array<i64: 1, 128>}, {transform_indices = @transform_4, window_bounds = array<i64: 256, 128>}]} {
    %cst = arith.constant 0.000000e+00 : bf16
    %0 = vector.broadcast %cst : bf16 to vector<256x92xbf16>
    %c0 = arith.constant 0 : index
    %c36 = arith.constant 36 : index
    %1 = vector.load %arg6[%c0, %c36] : memref<256x128xbf16, #tpu.memory_space<vmem>>, vector<256x92xbf16>
    tpu.vector_store %arg6[%c0, %c36], %0 {strides = array<i32>} : memref<256x128xbf16, #tpu.memory_space<vmem>>, vector<256x92xbf16>,
    %c0_0 = arith.constant 0 : index
    %c0_1 = arith.constant 0 : index
    %2 = vector.load %arg1[%c0_0, %c0_1] : memref<256x36xbf16, #tpu.memory_space<vmem>>, vector<256x36xbf16>
    %c0_2 = arith.constant 0 : index
    %c0_3 = arith.constant 0 : index
    %3 = vector.load %arg6[%c0_2, %c0_3] : memref<256x128xbf16, #tpu.memory_space<vmem>>, vector<256x36xbf16>
    tpu.vector_store %arg6[%c0_2, %c0_3], %2 {strides = array<i32>} : memref<256x128xbf16, #tpu.memory_space<vmem>>, vector<256x36xbf16>,
    %c0_4 = arith.constant 0 : index
    %c0_5 = arith.constant 0 : index
    %4 = vector.load %arg6[%c0_4, %c0_5] : memref<256x128xbf16, #tpu.memory_space<vmem>>, vector<256x128xbf16>
    %c0_6 = arith.constant 0 : index
    %c0_7 = arith.constant 0 : index
    %5 = vector.load %arg2[%c0_6, %c0_7] : memref<128x128xbf16, #tpu.memory_space<vmem>>, vector<128x128xbf16>
    %cst_8 = arith.constant dense<0.000000e+00> : vector<256x128xf32>
    %6 = tpu.matmul %4, %5, %cst_8 {dimension_numbers = #tpu.dot_dimension_numbers<[1], [0], [0], [1], [0, 0, 1, 1], [], []>} : vector<256x128xbf16>, vector<128x128xbf16>, vector<256x128xf32> -> vector<256x128xf32>
    %c0_9 = arith.constant 0 : index
    %c0_10 = arith.constant 0 : index
    %7 = vector.load %arg3[%c0_9, %c0_10] : memref<1x128xf32, #tpu.memory_space<vmem>>, vector<1x128xf32>
    %8 = vector.broadcast %7 : vector<1x128xf32> to vector<256x128xf32>
    %9 = arith.mulf %6, %8 : vector<256x128xf32>
    %c0_11 = arith.constant 0 : index
    %c0_12 = arith.constant 0 : index
    %10 = vector.load %arg4[%c0_11, %c0_12] : memref<1x128xf32, #tpu.memory_space<vmem>>, vector<1x128xf32>
    %11 = vector.broadcast %10 : vector<1x128xf32> to vector<256x128xf32>
    %12 = arith.addf %9, %11 : vector<256x128xf32>
    %cst_13 = arith.constant 0.000000e+00 : f32
    %13 = vector.broadcast %cst_13 : f32 to vector<256x128xf32>
    %14 = arith.maximumf %12, %13 : vector<256x128xf32>
    %15 = arith.truncf %14 : vector<256x128xf32> to vector<256x128xbf16>
    %c0_14 = arith.constant 0 : index
    %c0_15 = arith.constant 0 : index
    %16 = vector.load %arg5[%c0_14, %c0_15] : memref<256x128xbf16, #tpu.memory_space<vmem>>, vector<256x128xbf16>
    tpu.vector_store %arg5[%c0_14, %c0_15], %15 {strides = array<i32>} : memref<256x128xbf16, #tpu.memory_space<vmem>>, vector<256x128xbf16>,
    return
  }
  func.func @transform_0(%arg0: i32) -> (i32, i32) {
    %c0_i32 = arith.constant 0 : i32
    %c0_i32_0 = arith.constant 0 : i32
    return %arg0, %c0_i32 : i32, i32
  }
  func.func @transform_1(%arg0: i32) -> (i32, i32) {
    %c0_i32 = arith.constant 0 : i32
    %c0_i32_0 = arith.constant 0 : i32
    %c0_i32_1 = arith.constant 0 : i32
    return %c0_i32, %c0_i32_0 : i32, i32
  }
  func.func @transform_2(%arg0: i32) -> (i32, i32) {
    %c0_i32 = arith.constant 0 : i32
    %c0_i32_0 = arith.constant 0 : i32
    %c0_i32_1 = arith.constant 0 : i32
    return %c0_i32, %c0_i32_0 : i32, i32
  }
  func.func @transform_3(%arg0: i32) -> (i32, i32) {
    %c0_i32 = arith.constant 0 : i32
    %c0_i32_0 = arith.constant 0 : i32
    %c0_i32_1 = arith.constant 0 : i32
    return %c0_i32, %c0_i32_0 : i32, i32
  }
  func.func @transform_4(%arg0: i32) -> (i32, i32) {
    %c0_i32 = arith.constant 0 : i32
    %c0_i32_0 = arith.constant 0 : i32
    return %arg0, %c0_i32 : i32, i32
  }
}

</mosaic_0001>

<bundles_post_ra>
// kernel: tpu_custom_call.1
= control target key start
LH: loop header
LB: loop body
LE: loop exit
PB: predicated region body
PF: predicated region fallthrough
CT: control target
= control target key end

     0   :  { %12 = vsyncpa [#allocation6], 0  ;;  %s7880_s0 = inlined_call_operand.vmem [shape: bf16[2,256,36], index: 0, kind: input, shape index: {}]   ;;  %s7881_s1 = inlined_call_operand.vmem [shape: bf16[128,128], index: 1, kind: input, shape index: {}]   ;;  %s7882_s2 = inlined_call_operand.vmem [shape: f32[1,128], index: 2, kind: input, shape index: {}]   ;;  %s7883_s3 = inlined_call_operand.vmem [shape: f32[1,128], index: 3, kind: input, shape index: {}]   ;;  %s7884_s4 = inlined_call_operand.hbm [shape: bf16[1152,128], index: 4, kind: input, shape index: {}]   ;;  %s7885_s5 = inlined_call_operand.vmem [shape: f32[1,128], index: 5, kind: input, shape index: {}]   ;;  %s7886_s6 = inlined_call_operand.vmem [shape: f32[1,128], index: 6, kind: input, shape index: {}]   ;;  %s7887_s7 = inlined_call_operand.hbm [shape: f32[2,256,128], index: 7, kind: output, shape index: {}]  }
   0x1   :  { %13 = vsyncpa [#allocation7], 0 }
   0x2   :  { %15 = vsyncpa [#allocation7 + $0x1], 0  ;;  %s6045_s24 = smov 0   ;;  %s6047_s25 = smov 0  }
   0x3   :  { %s6049_s26 = smov 0   ;;  %s6051_s27 = smov 0  }
   0x4 LB: > { %s6066_s28 = sadd.s32 4294967295, %s5995_s27   ;;  %s5006_s29 = sadd.s32 4294967294, %s5995_s27   ;;  %s5995_s27 = sphi %s6051_s27, %s8049_s27   ;;  %s5991_s26 = sphi %s6049_s26, %s8048_s26   ;;  %s5987_s25 = sphi %s6047_s25, %s8047_s25   ;;  %s5983_s24 = sphi %s6045_s24, %s8046_s24  }
   0x5   : > { %s6070_s30 = sadd.s32 1, %s5995_s27   ;;  %s180_s8 = sadd.s32 1, %s5991_s26 }
   0x6   : > { %s177_s9 = ssub.s32 %s5995_s27, %s6070_s30  ;;  %p190_p0 = scmp.ne.s32.totalorder %s5991_s26, %s5987_s25 }
   0x7   : > { %p178_p1 = scmp.eq.s32.totalorder %s177_s9, 0  ;;  %p191_p2 = scmp.eq.s32.totalorder %s6066_s28, 1 }
   0x8   : > { %p196_p3 = scmp.ne.s32.totalorder %s5987_s25, %s5983_s24  ;;  %p197_p4 = scmp.eq.s32.totalorder %s5006_s29, 1 }
   0x9   : > { %s6081_s10 = scalar_select %p178_p1, %s5991_s26, %s180_s8  }
   0xa   : > { %p6083_p5 = por %p191_p2, %p190_p0  ;;  %p6087_p6 = por %p197_p4, %p196_p3 }
   0xb   : > { %p5007_p7 = scmp.ge.s32.totalorder %s5995_s27, 1  ;;  %p204_p8 = scmp.lt.s32.totalorder %s5995_s27, 3 }
   0xc   : > { %s7929_s11 = scalar_select %p6083_p5, 1, 0 }
   0xd   : > { %s7930_s12 = scalar_select %p6087_p6, 1, 0 }
   0xe   : > { %p7888_p9 = scmp.eq.s32.totalorder %s6066_s28, 0  ;;  %p6094_p10 = pnand %p5007_p7, %p204_p8 }
   0xf   : > { %s5997_s14 = smov [#allocation5]   ;;  %s5901_s19 = scalar_lea.hbm %s7884_s4, 9216 }
  0x10   : > { %s7931_s13 = scalar_select %p6094_p10, 1, 0 }
  0x11   : > { %s225_s15 = sshll.u32 %s5997_s14, 4  ;;  %p5752_p11 = pneg %p6094_p10  ;;  %s226_s15 = int_to_ptr.vmem [resolvable:$true] %s225_s15 }
  0x12   : > { %p5902_p13 = scmp.ne.s32.totalorder %s7884_s4, %s5901_s19  ;;  %p5908_p3 = scmp.lt.u32.totalorder %s5901_s19, %s7884_s4 }
  0x13   : > { %p6102_p12 = pnand %p7888_p9, %p5752_p11 }
  0x15   : > { %p5903_p0 = pneg %p6102_p12 }
  0x17   : > { %p5904_p1 = pnand %p5903_p0, %p5902_p13 }
  0x19   : > { %p5905_p2 = pneg %p5904_p1 }
  0x1b   : > { %p5910_p4 = pnand %p5908_p3, %p5905_p2 }
  0x1d   : > { %5913 = shalt.err (!%p5910_p4)
}
  0x1e   : > { %s5914_s29 = scalar_lea.vmem %s226_s15, 9216  ;;  %p5922_p9 = scmp.lt.s32.totalorder %s226_s15, %s226_s15 }
  0x1f   : > { %p5915_p7 = scmp.ne.s32.totalorder %s226_s15, %s5914_s29  ;;  %p5923_p6 = scmp.lt.s32.totalorder %s5914_s29, %s5914_s29 }
  0x21   : > { %p5917_p8 = pnand %p5915_p7, %p5903_p0  ;;  %p5924_p5 = por %p5923_p6, %p5922_p9 }
  0x23   : > { %p5918_p11 = pneg %p5917_p8 }
  0x25   : > { %p5925_p10 = pnand %p5924_p5, %p5918_p11 }
  0x27   : > { %5928 = shalt.err (!%p5925_p10)
}
  0x28   : > { %s5998_s8 = smov 64   ;;  %s5999_s9 = smov 4  }
  0x29   : > { %5755 = dma.hbm_to_vmem [thread:$0]  (!%p6102_p12), %s7884_s4, 9216, %s226_s15, [#allocation6], %s5998_s8, %s5998_s8, %s5999_s9  }
  0x2a   : > { %p7933_p13 = scmp.ne.s32.totalorder %s7931_s13, 0 }
  0x2c   : > { %255 = sbr.rel (%p7933_p13) target bundleno = 860 (0x35c), region = 48 }
  0x33   : > { %p7934_p1 = scmp.eq.s32.totalorder %s6066_s28, 0 }
  0x35   : > { %5974 = dma.done.wait (%p7934_p1), [#allocation6], 9216   ;;  %p7935_p0 = pmov %p7934_p1 }
  0x36   : > { %vm295_vm0 = vcmask 1047840   ;;  %p287_p5 = scmp.lt.s32.totalorder %s6066_s28, 1  ;;  %v6000_v0 = vmov 0   ;;  %v5802_v1 = vld [vmem:[%s7881_s1] sm:$0xff]   ;;  %v5803_v2 = vld [vmem:[%s7881_s1 + $0x8] sm:$0xff]   ;;  %v5804_v3 = vld [vmem:[%s7881_s1 + $0x10] sm:$0xff]   ;;  %v844_v51 = vlaneseq }
  0x37   : > { %5976 = vsyncadd (%p7935_p0), [#allocation6], 4294958080  ;;  %296 = vst.msk [vmem:[#allocation2] sm:$0xff] %vm295_vm0, %v6000_v0  ;;  %4003 = vmatprep.mubr.bf16.mxu1 %v6000_v0  ;;  %5650 = vmatprep.subr.bf16.mxu0 %v5802_v1  ;;  %v5805_v4 = vld [vmem:[%s7881_s1 + $0x18] sm:$0xff]   ;;  %vm440_vm1 = vcmask 293888   ;;  %v5806_v7 = vld [vmem:[%s7881_s1 + $0x20] sm:$0xff]  }
  0x38   : > { %297 = vst.msk [vmem:[#allocation2 + $0x8] sm:$0xff] %vm295_vm0, %v6000_v0  ;;  %298 = vst.msk [vmem:[#allocation2 + $0x10] sm:$0xff] %vm295_vm0, %v6000_v0  ;;  %s288_s13 = scalar_select %p287_p5, %s6066_s28, 1  ;;  %5651 = vmatpush3.bf16.msra.mxu0 %v5802_v1  ;;  %v5807_v12 = vld [vmem:[%s7881_s1 + $0x28] sm:$0xff]   ;;  %v5808_v19 = vld [vmem:[%s7881_s1 + $0x30] sm:$0xff]   ;;  %v6230_v52 = vshrl.u32 %v844_v51, 7 }
  0x39   : > { %299 = vst.msk [vmem:[#allocation2 + $0x18] sm:$0xff] %vm295_vm0, %v6000_v0  ;;  %300 = vst.msk [vmem:[#allocation2 + $0x20] sm:$0xff] %vm295_vm0, %v6000_v0  ;;  %5652 = vmatprep.subr.bf16.mxu0 %v5803_v2  ;;  %v5809_v22 = vld [vmem:[%s7881_s1 + $0x38] sm:$0xff]   ;;  %v5826_v26 = vld [vmem:[#allocation5 + $0x40] sm:$0xff]   ;;  %vm6001_vm5 = vmmov 1   ;;  %s284_s9 = sand.u32 1, %s5987_s25  }
  0x3a   : > { %301 = vst.msk [vmem:[#allocation2 + $0x28] sm:$0xff] %vm295_vm0, %v6000_v0  ;;  %302 = vst.msk [vmem:[#allocation2 + $0x30] sm:$0xff] %vm295_vm0, %v6000_v0  ;;  %s5152_s20 = sshll.u32 %s288_s13, 7  ;;  %v5827_v27 = vld [vmem:[#allocation5] sm:$0xff]   ;;  %5178 = vmatprep.subr.bf16.mxu1 %v5826_v26  ;;  %v5828_v29 = vld [vmem:[#allocation5 + $0x48] sm:$0xff]   ;;  %v847_v53 = vadd.s32 16, %v6230_v52 }
  0x3b   : > { %303 = vst.msk [vmem:[#allocation2 + $0x38] sm:$0xff] %vm295_vm0, %v6000_v0  ;;  %304 = vst.msk [vmem:[#allocation2 + $0x40] sm:$0xff] %vm295_vm0, %v6000_v0  ;;  %s6181_s8 = scalar_lea.vmem %s7880_s0, %s5152_s20  ;;  %5179 = vmatpush3.bf16.msra.mxu1 %v5827_v27  ;;  %v5829_v31 = vld [vmem:[#allocation5 + $0x8] sm:$0xff]   ;;  %v5830_v32 = vld [vmem:[#allocation5 + $0x50] sm:$0xff]   ;;  %v881_v54 = vand.u32 15, %v6230_v52  ;;  %v852_v51 = vadd.s32 56, %v6230_v52 }
  0x3c   : > { %305 = vst.msk [vmem:[#allocation2 + $0x48] sm:$0xff] %vm295_vm0, %v6000_v0  ;;  %306 = vst.msk [vmem:[#allocation2 + $0x50] sm:$0xff] %vm295_vm0, %v6000_v0  ;;  %5653 = vmatpush3.bf16.msra.mxu0 %v5803_v2  ;;  %v5810_v5 = vld [vmem:[%s6181_s8] sm:$0xff]   ;;  %v5811_v6 = vld [vmem:[%s6181_s8 + $0x8] sm:$0xff]   ;;  %5180 = vmatprep.subr.bf16.mxu1 %v5828_v29  ;;  %v895_v55 = vand.u32 15, %v847_v53  ;;  %s5012_s16 = sshll.u32 %s284_s9, 8 }
  0x3d   : > { %307 = vst.msk [vmem:[#allocation2 + $0x58] sm:$0xff] %vm295_vm0, %v6000_v0  ;;  %308 = vst.msk [vmem:[#allocation2 + $0x60] sm:$0xff] %vm295_vm0, %v6000_v0  ;;  %5654 = vmatprep.subr.bf16.mxu0 %v5804_v3  ;;  %v5812_v8 = vld [vmem:[%s6181_s8 + $0x10] sm:$0xff]   ;;  %v5813_v9 = vld [vmem:[%s6181_s8 + $0x18] sm:$0xff]   ;;  %vm1261_vm2 = vcmp.ge.s32.totalorder %v881_v54, 1  ;;  %s7710_s18 = scalar_lea.vmem [#allocation8], %s5012_s16 }
  0x3e   : > { %309 = vst.msk [vmem:[#allocation2 + $0x68] sm:$0xff] %vm295_vm0, %v6000_v0  ;;  %310 = vst.msk [vmem:[#allocation2 + $0x70] sm:$0xff] %vm295_vm0, %v6000_v0  ;;  %v5814_v10 = vld [vmem:[%s6181_s8 + $0x20] sm:$0xff]   ;;  %v5815_v11 = vld [vmem:[%s6181_s8 + $0x28] sm:$0xff]   ;;  %vm1263_vm4 = vcmp.ge.s32.totalorder %v895_v55, 1  ;;  %s5153_s19 = sshll.u32 %s6066_s28, 12 }
  0x3f   : > { %311 = vst.msk [vmem:[#allocation2 + $0x78] sm:$0xff] %vm295_vm0, %v6000_v0  ;;  %824 = vst [vmem:[#allocation3] sm:$0xff] %v6000_v0  ;;  %v5816_v13 = vld [vmem:[%s6181_s8 + $0x30] sm:$0xff]   ;;  %v5817_v14 = vld [vmem:[%s6181_s8 + $0x38] sm:$0xff]   ;;  %5181 = vmatpush3.bf16.msra.mxu1 %v5829_v31  ;;  %vm1518_vm8 = vsmask.f32 7424  ;;  %s7830_s23 = scalar_lea.hbm %s7887_s7, %s5153_s19 }
  0x40   : > { %825 = vst [vmem:[#allocation3 + $0x8] sm:$0xff] %v6000_v0  ;;  %842 = vst [vmem:[#allocation3 + $0x90] sm:$0xff] %v6000_v0  ;;  %5655 = vmatpush3.bf16.msra.mxu0 %v5804_v3  ;;  %v5818_v15 = vld [vmem:[%s6181_s8 + $0x40] sm:$0xff]   ;;  %v5819_v17 = vld [vmem:[%s6181_s8 + $0x48] sm:$0xff]   ;;  %5182 = vmatprep.subr.bf16.mxu1 %v5830_v32  ;;  %vm1680_vm11 = vsmask.f32 256 }
  0x41   : > { %843 = vst [vmem:[#allocation3 + $0x98] sm:$0xff] %v6000_v0  ;;  %441 = vst.msk [vmem:[#allocation2] sm:$0xff] %vm440_vm1, %v5810_v5  ;;  %5656 = vmatprep.subr.bf16.mxu0 %v5805_v4  ;;  %v5820_v18 = vld [vmem:[%s6181_s8 + $0x50] sm:$0xff]   ;;  %v5821_v20 = vld [vmem:[%s6181_s8 + $0x58] sm:$0xff]   ;;  %s4932_s20 = sshll.u32 %s7710_s18, 4  ;;  %s7839_s28 = scalar_lea.sflag [#allocation7], %s284_s9  ;;  %s7832_s20 = int_to_ptr.vmem [resolvable:$true] %s4932_s20 }
  0x42   : > { %442 = vst.msk [vmem:[#allocation2 + $0x8] sm:$0xff] %vm440_vm1, %v5811_v6  ;;  %443 = vst.msk [vmem:[#allocation2 + $0x10] sm:$0xff] %vm440_vm1, %v5812_v8  ;;  %v5822_v21 = vld [vmem:[%s6181_s8 + $0x60] sm:$0xff]   ;;  %v5823_v23 = vld [vmem:[%s6181_s8 + $0x68] sm:$0xff]   ;;  %s5929_s29 = scalar_lea.vmem %s7832_s20, 4096  ;;  %p8044_p9 = scmp.ne.s32.totalorder %s7929_s11, 0 }
  0x43   : > { %444 = vst.msk [vmem:[#allocation2 + $0x18] sm:$0xff] %vm440_vm1, %v5813_v9  ;;  %445 = vst.msk [vmem:[#allocation2 + $0x20] sm:$0xff] %vm440_vm1, %v5814_v10  ;;  %v5824_v24 = vld [vmem:[%s6181_s8 + $0x70] sm:$0xff]   ;;  %v5825_v25 = vld [vmem:[%s6181_s8 + $0x78] sm:$0xff]   ;;  %p5930_p6 = scmp.ne.s32.totalorder %s7832_s20, %s5929_s29  ;;  %s6002_s8 = smov [#allocation8]  }
  0x44   : > { %5657 = vmatpush3.bf16.msra.mxu0 %v5805_v4  ;;  %446 = vst.msk [vmem:[#allocation2 + $0x28] sm:$0xff] %vm440_vm1, %v5815_v11  ;;  %447 = vst.msk [vmem:[#allocation2 + $0x30] sm:$0xff] %vm440_vm1, %v5816_v13  ;;  %v5831_v33 = vld [vmem:[#allocation5 + $0x10] sm:$0xff]   ;;  %v5832_v34 = vld [vmem:[#allocation5 + $0x58] sm:$0xff]   ;;  %s5933_s14 = sshll.u32 %s6002_s8, 4  ;;  %s5934_s14 = int_to_ptr.vmem [resolvable:$false] %s5933_s14 }
  0x45   : > { %5658 = vmatprep.subr.bf16.mxu0 %v5806_v7  ;;  %448 = vst.msk [vmem:[#allocation2 + $0x38] sm:$0xff] %vm440_vm1, %v5817_v14  ;;  %449 = vst.msk [vmem:[#allocation2 + $0x40] sm:$0xff] %vm440_vm1, %v5818_v15  ;;  %v5833_v36 = vld [vmem:[#allocation5 + $0xc0] sm:$0xff]   ;;  %v5834_v38 = vld [vmem:[#allocation5 + $0x18] sm:$0xff]   ;;  %5183 = vmatpush3.bf16.msra.mxu1 %v5831_v33  ;;  %p5931_p10 = pnand %p5930_p6, %p8044_p9  ;;  %s5935_s17 = scalar_lea.vmem %s5934_s14, 8192 }
  0x46   : > { %450 = vst.msk [vmem:[#allocation2 + $0x48] sm:$0xff] %vm440_vm1, %v5819_v17  ;;  %451 = vst.msk [vmem:[#allocation2 + $0x50] sm:$0xff] %vm440_vm1, %v5820_v18  ;;  %v5835_v39 = vld [vmem:[#allocation5 + $0x80] sm:$0xff]   ;;  %5184 = vmatprep.subr.bf16.mxu1 %v5832_v34  ;;  %v5837_v58 = vld [vmem:[#allocation5 + $0xc8] sm:$0xff]   ;;  %p5936_p2 = scmp.lt.s32.totalorder %s7832_s20, %s5934_s14  ;;  %p5937_p3 = scmp.lt.s32.totalorder %s5935_s17, %s5929_s29 }
  0x47   : > { %452 = vst.msk [vmem:[#allocation2 + $0x58] sm:$0xff] %vm440_vm1, %v5821_v20  ;;  %453 = vst.msk [vmem:[#allocation2 + $0x60] sm:$0xff] %vm440_vm1, %v5822_v21  ;;  %v5836_v57 = vld [vmem:[#allocation5 + $0x60] sm:$0xff]   ;;  %v5839_v61 = vld [vmem:[#allocation5 + $0x88] sm:$0xff]   ;;  %p5932_p12 = pneg %p5931_p10 }
  0x48   : > { %v457_v16 = vld [vmem:[#allocation2] sm:$0xff]  ;;  %5659 = vmatpush3.bf16.msra.mxu0 %v5806_v7  ;;  %454 = vst.msk [vmem:[#allocation2 + $0x68] sm:$0xff] %vm440_vm1, %v5823_v23  ;;  %455 = vst.msk [vmem:[#allocation2 + $0x70] sm:$0xff] %vm440_vm1, %v5824_v24  ;;  %v5840_v3 = vld [vmem:[#allocation5 + $0x68] sm:$0xff]   ;;  %v6252_v24 = vrot.slane %v6000_v0, 7  ;;  %p5938_p4 = por %p5937_p3, %p5936_p2 }
  0x49   : > { %5666 = vmatprep.mubr.bf16.mxu0 %v457_v16  ;;  %5660 = vmatprep.subr.bf16.mxu0 %v5807_v12  ;;  %456 = vst.msk [vmem:[#allocation2 + $0x78] sm:$0xff] %vm440_vm1, %v5825_v25  ;;  %v458_v28 = vld [vmem:[#allocation2 + $0x8] sm:$0xff]  ;;  %v459_v30 = vld [vmem:[#allocation2 + $0x10] sm:$0xff]  ;;  %vm1406_vm3 = vmpackc.low %vm1261_vm2, %vm1261_vm2 }
  0x4a   : > { %v460_v35 = vld [vmem:[#allocation2 + $0x18] sm:$0xff]  ;;  %v461_v37 = vld [vmem:[#allocation2 + $0x20] sm:$0xff]  ;;  %5185 = vmatpush3.bf16.msra.mxu1 %v5834_v38  ;;  %vm1407_vm6 = vmpackc.low %vm6001_vm5, %vm6001_vm5  ;;  %v1438_v56 = vsel %vm1406_vm3, 65537, %v6000_v0  ;;  %p5939_p7 = pnand %p5938_p4, %p5932_p12 }
  0x4b   : > { %v462_v40 = vld [vmem:[#allocation2 + $0x28] sm:$0xff]  ;;  %v463_v41 = vld [vmem:[#allocation2 + $0x30] sm:$0xff]  ;;  %vm1408_vm7 = vmpackc.low %vm1263_vm4, %vm1263_vm4  ;;  %v6236_v59 = vsel %vm1407_vm6, 65537, %v6000_v0  ;;  %5186 = vmatprep.subr.bf16.mxu1 %v5836_v57  ;;  %v853_v57 = vadd.s32 64, %v6230_v52 }
  0x4c   : > { %5661 = vmatpush3.bf16.msra.mxu0 %v5807_v12  ;;  %v464_v42 = vld [vmem:[#allocation2 + $0x38] sm:$0xff]  ;;  %v465_v43 = vld [vmem:[#allocation2 + $0x40] sm:$0xff]  ;;  %v1440_v62 = vsel %vm1408_vm7, 65537, %v6000_v0  ;;  %v5041_v63 = vcombine.low %v1438_v56, %v6236_v59  ;;  %v5841_v4 = vld [vmem:[#allocation5 + $0xd0] sm:$0xff]  }
  0x4d   : > { %5662 = vmatprep.subr.bf16.mxu0 %v5808_v19  ;;  %v466_v44 = vld [vmem:[#allocation2 + $0x48] sm:$0xff]  ;;  %v467_v45 = vld [vmem:[#allocation2 + $0x50] sm:$0xff]  ;;  %v5838_v60 = vld [vmem:[#allocation5 + $0x20] sm:$0xff]   ;;  %v5042_v1 = vcombine.low %v1440_v62, %v6236_v59 }
  0x4e   : > { %v468_v46 = vld [vmem:[#allocation2 + $0x58] sm:$0xff]  ;;  %v469_v47 = vld [vmem:[#allocation2 + $0x60] sm:$0xff]  ;;  %5187 = vmatpush3.bf16.msra.mxu1 %v5838_v60  ;;  %v1520_v2 = vshll.u32 %v5041_v63, 16  ;;  %v1523_v5 = vshrl.u32 %v5041_v63, 16  ;;  %v5842_v7 = vld [vmem:[#allocation5 + $0x28] sm:$0xff]   ;;  %v930_v60 = vand.u32 15, %v852_v51 }
  0x4f   : > { %v470_v48 = vld [vmem:[#allocation2 + $0x68] sm:$0xff]  ;;  %v471_v49 = vld [vmem:[#allocation2 + $0x70] sm:$0xff]  ;;  %v1527_v6 = vshll.u32 %v5042_v1, 16  ;;  %5188 = vmatprep.subr.bf16.mxu1 %v5840_v3  ;;  %v5845_v13 = vld [vmem:[#allocation5 + $0xd8] sm:$0xff]   ;;  %v1531_v25 = vshrl.u32 %v5042_v1, 16 }
  0x50   : > { %5663 = vmatpush3.bf16.msra.mxu0 %v5808_v19  ;;  %v472_v50 = vld [vmem:[#allocation2 + $0x78] sm:$0xff]  ;;  %v5843_v8 = vld [vmem:[#allocation5 + $0x90] sm:$0xff]   ;;  %v6241_v9 = vrot.slane %v1520_v2, 1  ;;  %v1325_v17 = vld [vmem:[#allocation3] sm:$0x80]  ;;  %vm6281_vm4 = vcmp.le.s32.totalorder %v930_v60, 14 }
  0x51   : > { %5664 = vmatprep.subr.bf16.mxu0 %v5809_v22  ;;  %v1529_v10 = vrot.slane %v1527_v6, 1  ;;  %v5844_v12 = vld [vmem:[#allocation5 + $0x70] sm:$0xff]   ;;  %v5847_v15 = vld [vmem:[#allocation5 + $0x98] sm:$0xff]   ;;  %v5849_v19 = vld [vmem:[#allocation5 + $0xe0] sm:$0xff]  }
  0x52   : > { %7936 = vst [vmem:[#allocation11_spill] sm:$0xff] %v6241_v9  ;;  %5189 = vmatpush3.bf16.msra.mxu1 %v5842_v7  ;;  %v1525_v11 = vor.u32 %v1523_v5, %v6241_v9  ;;  %v5846_v14 = vld [vmem:[#allocation5 + $0x30] sm:$0xff]   ;;  %vm7916_vm10 = vcmp.ne.s16.totalorder %v6241_v9, 0  ;;  %v5848_v18 = vld [vmem:[#allocation5 + $0x78] sm:$0xff]   ;;  %v5852_v27 = vld [vmem:[#allocation5 + $0xe8] sm:$0xff]  }
  0x53   : > { %5190 = vmatprep.subr.bf16.mxu1 %v5844_v12  ;;  %v1663_v20 = vsel %vm7916_vm10, %v1325_v17, 0  ;;  %v5850_v21 = vld [vmem:[#allocation5 + $0x38] sm:$0xff]   ;;  %v5853_v29 = vld [vmem:[#allocation5 + $0xa8] sm:$0xff]   ;;  %v5856_v31 = vld [vmem:[#allocation5 + $0xf0] sm:$0xff]  }
  0x54   : > { %5665 = vmatpush3.bf16.msra.mxu0 %v5809_v22  ;;  %v6245_v16 = vsel %vm1518_vm8, %v1525_v11, %v1529_v10  ;;  %v5851_v22 = vld [vmem:[#allocation5 + $0xa0] sm:$0xff]   ;;  %v1682_v23 = vshrl.u32 %v1663_v20, 16  ;;  %v5857_v32 = vld [vmem:[#allocation5 + $0xb0] sm:$0xff]   ;;  %v5858_v33 = vld [vmem:[#allocation5 + $0xf8] sm:$0xff]  }
  0x55   : > { %5290 = vmatprep.subr.bf16.mxu0 %v5833_v36  ;;  %vm1647_vm9 = vcmp.ne.s16.totalorder %v6245_v16, 0  ;;  %v5859_v34 = vld [vmem:[#allocation5 + $0xb8] sm:$0xff]   ;;  %v5855_v36 = vld [vmem:[#allocation5 + $0x100] sm:$0xff]   ;;  %v5860_v38 = vld [vmem:[#allocation5 + $0x148] sm:$0xff]  }
  0x56   : > { %5191 = vmatpush3.bf16.msra.mxu1 %v5846_v14  ;;  %v1684_v26 = vrot.slane %v1682_v23, 7  ;;  %v5865_v5 = vld [vmem:[#allocation5 + $0x118] sm:$0xff]  }
  0x57   : > { %5667 = vmatmul.mubr.bf16.vlgmr.msra.gmra.mrb[0].mxu0 %v458_v28  ;;  %5192 = vmatprep.subr.bf16.mxu1 %v5848_v18  ;;  %v6254_v28 = vor.u32 %v1531_v25, %v1529_v10  ;;  %v854_v10 = vadd.s32 72, %v6230_v52  ;;  %v859_v25 = vadd.s32 112, %v6230_v52 }
  0x58   : > { %5670 = vmatprep.mubr.bf16.mxu0 %v459_v30  ;;  %5291 = vmatpush3.bf16.msra.mxu0 %v5835_v39  ;;  %v1692_v30 = vsel %vm1680_vm11, %v1684_v26, %v6252_v24  ;;  %v5861_v39 = vld [vmem:[#allocation5 + $0x108] sm:$0xff]  }
  0x59   : > { %5292 = vmatprep.subr.bf16.mxu0 %v5837_v58  ;;  %v5864_v58 = vld [vmem:[#allocation5 + $0x158] sm:$0xff]   ;;  %v944_v20 = vand.u32 15, %v854_v10  ;;  %v2395_v26 = vld [vmem:[#allocation3 + $0x8] sm:$0x80]  ;;  %v6370_v10 = vrot.slane %v6000_v0, 1 }
  0x5a   : > { %5193 = vmatpush3.bf16.msra.mxu1 %v5850_v21  ;;  %v856_v21 = vadd.s32 88, %v6230_v52 }
  0x5c   : > { %5293 = vmatpush3.bf16.msra.mxu0 %v5839_v61 }
  0x5d   : > { %5294 = vmatprep.subr.bf16.mxu0 %v5841_v4  ;;  %4004 = vmatmul.mubr.bf16.vlgmr.msra.gmra.mrb[0].mxu1 %v1692_v30  ;;  %v937_v4 = vand.u32 15, %v853_v57 }
  0x5f   : > { %5671 = vmatmul.mubr.bf16.gmra.mrb[4].mxu0 %v460_v35  ;;  %v5854_v35 = vld [vmem:[#allocation5 + $0x140] sm:$0xff]   ;;  %vm6295_vm7 = vcmp.ge.s32.totalorder %v937_v4, 1 }
  0x60   : > { %5674 = vmatprep.mubr.bf16.mxu0 %v461_v37  ;;  %5295 = vmatpush3.bf16.msra.mxu0 %v5843_v8  ;;  %v846_v37 = vadd.s32 8, %v6230_v52 }
  0x61   : > { %5296 = vmatprep.subr.bf16.mxu0 %v5845_v13  ;;  %5402 = vmatprep.subr.bf16.mxu1 %v5854_v35  ;;  %v855_v13 = vadd.s32 80, %v6230_v52  ;;  %v860_v35 = vadd.s32 120, %v6230_v52 }
  0x62   : > { %5403 = vmatpush3.bf16.msra.mxu1 %v5855_v36 }
  0x63   : > { %5404 = vmatprep.subr.bf16.mxu1 %v5860_v38  ;;  %v951_v23 = vand.u32 15, %v855_v13  ;;  %v958_v38 = vand.u32 15, %v856_v21 }
  0x64   : > { %5297 = vmatpush3.bf16.msra.mxu0 %v5847_v15 }
  0x65   : > { %5298 = vmatprep.subr.bf16.mxu0 %v5849_v19 }
  0x66   : > { %5405 = vmatpush3.bf16.msra.mxu1 %v5861_v39  ;;  %v5866_v39 = vld [vmem:[#allocation5 + $0x1c0] sm:$0xff]  }
  0x67   : > { %5675 = vmatmul.mubr.bf16.gmra.mrb[8].mxu0 %v462_v40  ;;  %v888_v40 = vand.u32 15, %v846_v37  ;;  %v857_v37 = vadd.s32 96, %v6230_v52 }
  0x68   : > { %5678 = vmatprep.mubr.bf16.mxu0 %v463_v41  ;;  %5299 = vmatpush3.bf16.msra.mxu0 %v5851_v22  ;;  %v849_v41 = vadd.s32 32, %v6230_v52 }
  0x69   : > { %5300 = vmatprep.subr.bf16.mxu0 %v5852_v27  ;;  %vm1294_vm12 = vcmp.le.s32.totalorder %v888_v40, 14  ;;  %v5868_v40 = vld [vmem:[#allocation5 + $0x160] sm:$0xff]  }
  0x6a   : > { %vm1959_vm13 = vmpackc.low %vm1294_vm12, %vm1294_vm12 }
  0x6b   : > { %vm1965_vm12 = vmpackc.low %vm6281_vm4, %vm6281_vm4 }
  0x6c   : > { %5301 = vmatpush3.bf16.msra.mxu0 %v5853_v29  ;;  %v1997_v19 = vsel %vm1965_vm12, 65537, %v6000_v0 }
  0x6d   : > { %5302 = vmatprep.subr.bf16.mxu0 %v5856_v31  ;;  %v858_v31 = vadd.s32 104, %v6230_v52 }
  0x6f   : > { %5679 = vmatmul.mubr.bf16.gmra.mrb[12].mxu0 %v464_v42  ;;  %v848_v42 = vadd.s32 24, %v6230_v52 }
  0x70   : > { %5682 = vmatprep.mubr.bf16.mxu0 %v465_v43  ;;  %5303 = vmatpush3.bf16.msra.mxu0 %v5857_v32  ;;  %v5862_v43 = vld [vmem:[#allocation5 + $0x150] sm:$0xff]  }
  0x71   : > { %5304 = vmatprep.subr.bf16.mxu0 %v5858_v33  ;;  %5406 = vmatprep.subr.bf16.mxu1 %v5862_v43 }
  0x74   : > { %5305 = vmatpush3.bf16.msra.mxu0 %v5859_v34  ;;  %v5060_v34 = vcombine.low %v6236_v59, %v1997_v19 }
  0x75   : > { %5514 = vmatprep.subr.bf16.mxu0 %v5866_v39 }
  0x76   : > { %v2094_v51 = vshrl.u32 %v5060_v34, 16 }
  0x77   : > { %5683 = vmatmul.mubr.bf16.gmra.mrb[16].mxu0 %v466_v44  ;;  %v5863_v44 = vld [vmem:[#allocation5 + $0x110] sm:$0xff]  }
  0x78   : > { %5686 = vmatprep.mubr.bf16.mxu0 %v467_v45  ;;  %v909_v45 = vand.u32 15, %v849_v41  ;;  %5407 = vmatpush3.bf16.msra.mxu1 %v5863_v44  ;;  %v2412_v41 = vsel %vm7916_vm10, %v2395_v26, 0  ;;  %v979_v44 = vand.u32 15, %v859_v25 }
  0x79   : > { %5408 = vmatprep.subr.bf16.mxu1 %v5864_v58 }
  0x7a   : > { %vm1265_vm14 = vcmp.ge.s32.totalorder %v909_v45, 1  ;;  %vm6349_vm4 = vcmp.ge.s32.totalorder %v979_v44, 1  ;;  %v862_v44 = vadd.s32 136, %v6230_v52 }
  0x7b   : > { %vm1410_vm15 = vmpackc.low %vm1265_vm14, %vm1265_vm14 }
  0x7c   : > { %v1442_v53 = vsel %vm1410_vm15, 65537, %v6000_v0  ;;  %5409 = vmatpush3.bf16.msra.mxu1 %v5865_v5  ;;  %vm6322_vm15 = vcmp.le.s32.totalorder %v944_v20, 14  ;;  %v6359_v5 = vrot.slane %v2094_v51, 7  ;;  %v6397_v20 = vld [vmem:[#allocation3] sm:$0xff] }
  0x7d   : > { %v5043_v61 = vcombine.low %v1442_v53, %v6236_v59  ;;  %5410 = vmatprep.subr.bf16.mxu1 %v5868_v40  ;;  %v986_v53 = vand.u32 15, %v860_v35 }
  0x7f   : > { %5687 = vmatmul.mubr.bf16.gmra.mrb[20].mxu0 %v468_v46  ;;  %v902_v46 = vand.u32 15, %v848_v42  ;;  %v1535_v8 = vshll.u32 %v5043_v61, 16  ;;  %v1539_v30 = vshrl.u32 %v5043_v61, 16 }
  0x80   : > { %5690 = vmatprep.mubr.bf16.mxu0 %v469_v47  ;;  %v1991_v47 = vsel %vm1959_vm13, 65537, %v6000_v0  ;;  %vm1414_vm13 = vmpackc.low %vm6295_vm7, %vm6295_vm7  ;;  %vm6365_vm7 = vcmp.le.s32.totalorder %v986_v53, 14 }
  0x81   : > { %vm1296_vm0 = vcmp.le.s32.totalorder %v902_v46, 14  ;;  %v6304_v17 = vrot.slane %v1535_v8, 1  ;;  %v1446_v33 = vsel %vm1414_vm13, 65537, %v6000_v0  ;;  %vm1420_vm13 = vmpackc.low %vm6349_vm4, %vm6349_vm4 }
  0x82   : > { %vm1961_vm1 = vmpackc.low %vm1296_vm0, %vm1296_vm0  ;;  %vm6329_vm0 = vcmp.ge.s32.totalorder %v951_v23, 1  ;;  %v6335_v46 = vcombine.low %v1446_v33, %v6236_v59  ;;  %v1452_v26 = vsel %vm1420_vm13, 65537, %v6397_v20  ;;  %v863_v33 = vadd.s32 144, %v6230_v52 }
  0x83   : > { %v1993_v62 = vsel %vm1961_vm1, 65537, %v6000_v0  ;;  %vm1967_vm1 = vmpackc.low %vm6322_vm15, %vm6322_vm15  ;;  %v5048_v40 = vcombine.low %v1452_v26, %v6236_v59 }
  0x84   : > { %v5058_v6 = vcombine.low %v6236_v59, %v1993_v62  ;;  %v5869_v62 = vld [vmem:[#allocation5 + $0x120] sm:$0xff]   ;;  %v1551_v63 = vshll.u32 %v6335_v46, 16  ;;  %v1555_v35 = vshrl.u32 %v6335_v46, 16 }
  0x85   : > { %5411 = vmatpush3.bf16.msra.mxu1 %v5869_v62  ;;  %v1000_v62 = vand.u32 15, %v862_v44  ;;  %v1579_v13 = vshrl.u32 %v5048_v40, 16 }
  0x86   : > { %v2078_v14 = vshrl.u32 %v5058_v6, 16  ;;  %v2081_v29 = vshll.u32 %v5058_v6, 16  ;;  %v2097_v6 = vshll.u32 %v5060_v34, 16 }
  0x87   : > { %5691 = vmatmul.mubr.bf16.gmra.mrb[24].mxu0 %v470_v48  ;;  %v850_v48 = vadd.s32 40, %v6230_v52 }
  0x88   : > { %5694 = vmatprep.mubr.bf16.mxu0 %v471_v49  ;;  %v5057_v49 = vcombine.low %v6236_v59, %v1991_v47  ;;  %v6315_v27 = vrot.slane %v2078_v14, 7  ;;  %v972_v47 = vand.u32 15, %v858_v31  ;;  %v6382_v14 = vsel %vm1518_vm8, %v6254_v28, %v6304_v17 }
  0x89   : > { %v916_v54 = vand.u32 15, %v850_v48  ;;  %v861_v48 = vadd.s32 128, %v6230_v52  ;;  %7959 = vst [vmem:[#allocation12_spill] sm:$0xff] %v6382_v14  ;;  %v2099_v23 = vor.u32 %v2097_v6, %v6359_v5  ;;  %v5873_v6 = vld [vmem:[#allocation5 + $0x128] sm:$0xff]  }
  0x8a   : > { %v2071_v55 = vshrl.u32 %v5057_v49, 16  ;;  %v2074_v2 = vshll.u32 %v5057_v49, 16  ;;  %v2083_v45 = vor.u32 %v2081_v29, %v6315_v27  ;;  %v1541_v49 = vor.u32 %v1539_v30, %v6304_v17 }
  0x8b   : > { %vm6270_vm2 = vcmp.le.s32.totalorder %v916_v54, 14  ;;  %v2430_v54 = vshrl.u32 %v2412_v41, 16  ;;  %v993_v4 = vand.u32 15, %v861_v48 }
  0x8c   : > { %v6274_v1 = vrot.slane %v2071_v55, 7  ;;  %vm1963_vm5 = vmpackc.low %vm6270_vm2, %vm6270_vm2  ;;  %v965_v55 = vand.u32 15, %v857_v37 }
  0x8d   : > { %v1995_v15 = vsel %vm1963_vm5, 65537, %v6000_v0  ;;  %vm1416_vm2 = vmpackc.low %vm6329_vm0, %vm6329_vm0  ;;  %vm6355_vm5 = vcmp.le.s32.totalorder %v972_v47, 14  ;;  %vm6400_vm0 = vcmp.ge.s32.totalorder %v993_v4, 1  ;;  %v872_v4 = vadd.s32 216, %v6230_v52 }
  0x8e   : > { %v6293_v11 = vor.u32 %v2074_v2, %v6274_v1  ;;  %v5059_v22 = vcombine.low %v6236_v59, %v1995_v15  ;;  %v1999_v2 = vsel %vm1967_vm1, 65537, %v6000_v0  ;;  %v1448_v7 = vsel %vm1416_vm2, 65537, %v6000_v0  ;;  %vm1971_vm15 = vmpackc.low %vm6355_vm5, %vm6355_vm5 }
  0x8f   : > { %5695 = vmatmul.mubr.bf16.gmra.mrb[28].mxu0 %v472_v50  ;;  %v851_v50 = vadd.s32 48, %v6230_v52  ;;  %vm6372_vm12 = vcmp.ge.s32.totalorder %v965_v55, 1  ;;  %v6386_v15 = vsel %vm1680_vm11, %v6274_v1, %v2083_v45  ;;  %v6395_v19 = vcombine.low %v1448_v7, %v6236_v59  ;;  %vm1973_vm1 = vmpackc.low %vm6365_vm7, %vm6365_vm7  ;;  %v5872_v45 = vld [vmem:[#allocation5 + $0x168] sm:$0xff]  }
  0x90   : > { %vm2197_vm14 = vcmp.ne.s16.totalorder %v6293_v11, 0  ;;  %v2086_v42 = vshrl.u32 %v5059_v22, 16  ;;  %v2089_v58 = vshll.u32 %v5059_v22, 16  ;;  %v6407_v1 = vrot.slane %v2430_v54, 7  ;;  %vm1418_vm2 = vmpackc.low %vm6372_vm12, %vm6372_vm12  ;;  %5412 = vmatprep.subr.bf16.mxu1 %v5872_v45 }
  0x91   : > { %v923_v56 = vand.u32 15, %v851_v50  ;;  %v1553_v22 = vrot.slane %v1551_v63, 1  ;;  %v2003_v29 = vsel %vm1971_vm15, 65537, %v6397_v20  ;;  %v1559_v36 = vshll.u32 %v6395_v19, 16  ;;  %5413 = vmatpush3.bf16.msra.mxu1 %v5873_v6 }
  0x92   : > { %v2088_v57 = vrot.slane %v2086_v42, 7  ;;  %v1450_v37 = vsel %vm1418_vm2, 65537, %v6397_v20  ;;  %v5063_v41 = vcombine.low %v6236_v59, %v2003_v29  ;;  %v1563_v53 = vshrl.u32 %v6395_v19, 16 }
  0x93   : > { %vm6276_vm3 = vcmp.ge.s32.totalorder %v923_v56, 1  ;;  %v5047_v47 = vcombine.low %v1450_v37, %v6236_v59  ;;  %v1561_v51 = vrot.slane %v1559_v36, 1  ;;  %v865_v54 = vadd.s32 160, %v6230_v52 }
  0x94   : > { %vm1412_vm6 = vmpackc.low %vm6276_vm3, %vm6276_vm3  ;;  %vm6345_vm3 = vcmp.le.s32.totalorder %v958_v38, 14  ;;  %v6441_v39 = vsel %vm1680_vm11, %v2088_v57, %v2099_v23  ;;  %v1575_v55 = vshll.u32 %v5048_v40, 16  ;;  %v2118_v56 = vshrl.u32 %v5063_v41, 16 }
  0x95   : > { %v1444_v18 = vsel %vm1412_vm6, 65537, %v6000_v0  ;;  %vm1969_vm6 = vmpackc.low %vm6345_vm3, %vm6345_vm3  ;;  %v6389_v0 = vcombine.low %v6236_v59, %v1999_v2  ;;  %7964 = vst [vmem:[#allocation15_spill] sm:$0xff] %v6441_v39  ;;  %v867_v63 = vadd.s32 176, %v6230_v52  ;;  %v1567_v2 = vshll.u32 %v5047_v47, 16 }
  0x96   : > { %v5044_v32 = vcombine.low %v1444_v18, %v6236_v59  ;;  %v2091_v18 = vor.u32 %v2089_v58, %v2088_v57  ;;  %v2001_v28 = vsel %vm1969_vm6, 65537, %v6397_v20  ;;  %vm1422_vm3 = vmpackc.low %vm6400_vm0, %vm6400_vm0  ;;  %v864_v58 = vadd.s32 152, %v6230_v52 }
  0x97   : > { %v2102_v30 = vshrl.u32 %v6389_v0, 16  ;;  %v5062_v31 = vcombine.low %v6236_v59, %v2001_v28  ;;  %v2105_v42 = vshll.u32 %v6389_v0, 16  ;;  %v866_v7 = vadd.s32 168, %v6230_v52 }
  0x98   : > { %v1543_v50 = vshll.u32 %v5044_v32, 16  ;;  %v1547_v60 = vshrl.u32 %v5044_v32, 16  ;;  %v2005_v32 = vsel %vm1973_vm1, 65537, %v6397_v20  ;;  %v6432_v34 = vsel %vm1680_vm11, %v6315_v27, %v2091_v18 }
  0x99   : > { %v1454_v27 = vsel %vm1422_vm3, 65537, %v6397_v20  ;;  %v5064_v43 = vcombine.low %v6236_v59, %v2005_v32  ;;  %v6449_v46 = vrot.slane %v2102_v30, 7  ;;  %v2110_v48 = vshrl.u32 %v5062_v31, 16 }
  0x9a   : > { %v1545_v12 = vrot.slane %v1543_v50, 1  ;;  %v1557_v50 = vor.u32 %v1555_v35, %v1553_v22  ;;  %v6455_v57 = vcombine.low %v1454_v27, %v6236_v59  ;;  %v1571_v8 = vshrl.u32 %v5047_v47, 16 }
  0x9b   : > { %v2126_v61 = vshrl.u32 %v5064_v43, 16  ;;  %v2112_v3 = vrot.slane %v2110_v48, 7  ;;  %v1021_v0 = vand.u32 15, %v865_v54  ;;  %v1577_v18 = vrot.slane %v1575_v55, 1 }
  0x9c   : > { %v1549_v21 = vor.u32 %v1547_v60, %v1545_v12  ;;  %v6414_v25 = vsel %vm1518_vm8, %v1541_v49, %v1545_v12  ;;  %v1007_v49 = vand.u32 15, %v863_v33  ;;  %v2113_v60 = vshll.u32 %v5062_v31, 16 }
  0x9d   : > { %7962 = vst [vmem:[#allocation13_spill] sm:$0xff] %v6414_v25  ;;  %v2121_v12 = vshll.u32 %v5063_v41, 16  ;;  %v2120_v19 = vrot.slane %v2118_v56, 7  ;;  %v1583_v28 = vshll.u32 %v6455_v57, 16  ;;  %v1014_v17 = vand.u32 15, %v864_v58 }
  0x9e   : > { %v6438_v38 = vsel %vm1518_vm8, %v1549_v21, %v1553_v22  ;;  %vm6459_vm4 = vcmp.ge.s32.totalorder %v1007_v49, 1  ;;  %v6465_v21 = vrot.slane %v2126_v61, 7  ;;  %v2129_v22 = vshll.u32 %v5064_v43, 16 }
  0x9f   : > { %7963 = vst [vmem:[#allocation14_spill] sm:$0xff] %v6438_v38  ;;  %vm1424_vm5 = vmpackc.low %vm6459_vm4, %vm6459_vm4  ;;  %vm6470_vm6 = vcmp.le.s32.totalorder %v1000_v62, 14  ;;  %v1035_v26 = vand.u32 15, %v867_v63  ;;  %v2107_v29 = vor.u32 %v2105_v42, %v6449_v46  ;;  %v1569_v30 = vrot.slane %v1567_v2, 1 }
  0xa0   : > { %v1028_v31 = vand.u32 15, %v866_v7  ;;  %v869_v32 = vadd.s32 192, %v6230_v52  ;;  %v1565_v33 = vor.u32 %v1563_v53, %v1561_v51  ;;  %v2115_v35 = vor.u32 %v2113_v60, %v2112_v3  ;;  %vm1975_vm12 = vmpackc.low %vm6470_vm6, %vm6470_vm6 }
  0xa1   : > { %vm6476_vm7 = vcmp.ge.s32.totalorder %v1021_v0, 1  ;;  %v868_v37 = vadd.s32 184, %v6230_v52  ;;  %v1573_v40 = vor.u32 %v1571_v8, %v1569_v30  ;;  %v1581_v41 = vor.u32 %v1579_v13, %v1577_v18 }
  0xa2   : > { %v1456_v27 = vsel %vm1424_vm5, 65537, %v6397_v20  ;;  %vm6485_vm13 = vcmp.le.s32.totalorder %v1014_v17, 14  ;;  %v2123_v43 = vor.u32 %v2121_v12, %v2120_v19  ;;  %v6489_v44 = vrot.slane %v1583_v28, 1  ;;  %vm1426_vm0 = vmpackc.low %vm6476_vm7, %vm6476_vm7 }
  0xa3   : > { %v2131_v45 = vor.u32 %v2129_v22, %v6465_v21  ;;  %vm6492_vm15 = vcmp.ge.s32.totalorder %v1035_v26, 1  ;;  %v6497_v48 = vsel %vm1518_vm8, %v1557_v50, %v1561_v51  ;;  %v6501_v49 = vsel %vm1680_vm11, %v6359_v5, %v2107_v29  ;;  %vm1977_vm2 = vmpackc.low %vm6485_vm13, %vm6485_vm13 }
  0xa4   : > { %vm6506_vm1 = vcmp.le.s32.totalorder %v1028_v31, 14  ;;  %v1049_v54 = vand.u32 15, %v869_v32  ;;  %v6511_v55 = vcombine.low %v1456_v27, %v6236_v59  ;;  %v2007_v56 = vsel %vm1975_vm12, 65537, %v6397_v20  ;;  %vm1428_vm3 = vmpackc.low %vm6492_vm15, %vm6492_vm15 }
  0xa5   : > { %v1042_v5 = vand.u32 15, %v868_v37  ;;  %v871_v50 = vadd.s32 208, %v6230_v52  ;;  %v6519_v51 = vsel %vm1518_vm8, %v1565_v33, %v1569_v30  ;;  %v6523_v58 = vsel %vm1680_vm11, %v6449_v46, %v2115_v35  ;;  %vm1979_vm4 = vmpackc.low %vm6506_vm1, %vm6506_vm1  ;;  %v5876_v46 = vld [vmem:[#allocation5 + $0x170] sm:$0xff]  }
  0xa6   : > { %7977 = vst [vmem:[#allocation16_spill] sm:$0xff] %v6519_v51  ;;  %v6526_v60 = vsel %vm1518_vm8, %v1573_v40, %v1577_v18  ;;  %v870_v61 = vadd.s32 200, %v6230_v52  ;;  %v6533_v62 = vsel %vm1680_vm11, %v2112_v3, %v2123_v43  ;;  %v6537_v63 = vsel %vm1518_vm8, %v1581_v41, %v6489_v44  ;;  %5414 = vmatprep.subr.bf16.mxu1 %v5876_v46  ;;  %v5877_v33 = vld [vmem:[#allocation5 + $0x130] sm:$0xff]  }
  0xa7   : > { %7978 = vst [vmem:[#allocation17_spill] sm:$0xff] %v6526_v60  ;;  %7979 = vst [vmem:[#allocation18_spill] sm:$0xff] %v6537_v63  ;;  %v6540_v2 = vsel %vm1680_vm11, %v2120_v19, %v2131_v45  ;;  %v6547_v6 = vcombine.low %v6236_v59, %v2007_v56  ;;  %v1458_v3 = vsel %vm1426_vm0, 65537, %v6397_v20  ;;  %v2009_v7 = vsel %vm1977_vm2, 65537, %v6397_v20  ;;  %5415 = vmatpush3.bf16.msra.mxu1 %v5877_v33 }
  0xa8   : > { %7980 = vst [vmem:[#allocation19_spill] sm:$0xff] %v6540_v2  ;;  %vm6561_vm5 = vcmp.ge.s32.totalorder %v1049_v54, 1  ;;  %v1591_v12 = vshll.u32 %v6511_v55, 16  ;;  %v1460_v13 = vsel %vm1428_vm3, 65537, %v6397_v20  ;;  %vm6567_vm6 = vcmp.le.s32.totalorder %v1042_v5, 14 }
  0xa9   : > { %v1063_v18 = vand.u32 15, %v871_v50  ;;  %v2011_v19 = vsel %vm1979_vm4, 65537, %v6397_v20  ;;  %v1056_v28 = vand.u32 15, %v870_v61  ;;  %v873_v17 = vadd.s32 224, %v6230_v52  ;;  %vm1430_vm7 = vmpackc.low %vm6561_vm5, %vm6561_vm5 }
  0xaa   : > { %v874_v22 = vadd.s32 232, %v6230_v52  ;;  %v6575_v23 = vcombine.low %v1458_v3, %v6236_v59  ;;  %v6578_v26 = vcombine.low %v6236_v59, %v2009_v7  ;;  %v1070_v29 = vand.u32 15, %v872_v4  ;;  %vm1981_vm12 = vmpackc.low %vm6567_vm6, %vm6567_vm6 }
  0xab   : > { %v876_v30 = vadd.s32 248, %v6230_v52  ;;  %v1587_v31 = vshrl.u32 %v6455_v57, 16  ;;  %v2134_v32 = vshrl.u32 %v6547_v6, 16  ;;  %v875_v35 = vadd.s32 240, %v6230_v52 }
  0xac   : > { %v1084_v36 = vand.u32 15, %v874_v22  ;;  %v5052_v37 = vcombine.low %v1460_v13, %v6236_v59  ;;  %v5067_v40 = vcombine.low %v6236_v59, %v2011_v19  ;;  %vm6592_vm13 = vcmp.ge.s32.totalorder %v1063_v18, 1 }
  0xad   : > { %v1098_v27 = vand.u32 15, %v876_v30  ;;  %v6596_v57 = vrot.slane %v1591_v12, 1  ;;  %v1462_v42 = vsel %vm1430_vm7, 65537, %v6397_v20  ;;  %vm6599_vm15 = vcmp.le.s32.totalorder %v1056_v28, 14  ;;  %vm1432_vm1 = vmpackc.low %vm6592_vm13, %vm6592_vm13 }
  0xae   : > { %v1077_v52 = vand.u32 15, %v873_v17  ;;  %v2137_v45 = vshll.u32 %v6547_v6, 16  ;;  %v2142_v47 = vshrl.u32 %v6578_v26, 16  ;;  %v2013_v53 = vsel %vm1981_vm12, 65537, %v6397_v20  ;;  %vm1983_vm3 = vmpackc.low %vm6599_vm15, %vm6599_vm15 }
  0xaf   : > { %vm6606_vm0 = vcmp.le.s32.totalorder %v1070_v29, 14  ;;  %v6610_v56 = vrot.slane %v2134_v32, 7  ;;  %v1595_v5 = vshrl.u32 %v6511_v55, 16  ;;  %v1091_v50 = vand.u32 15, %v875_v35 }
  0xb0   : > { %vm6616_vm2 = vcmp.le.s32.totalorder %v1084_v36, 14  ;;  %v1607_v46 = vshll.u32 %v5052_v37, 16  ;;  %v2150_v4 = vshrl.u32 %v5067_v40, 16  ;;  %v6621_v6 = vcombine.low %v1462_v42, %v6236_v59  ;;  %vm1985_vm6 = vmpackc.low %vm6606_vm0, %vm6606_vm0 }
  0xb1   : > { %vm6626_vm4 = vcmp.le.s32.totalorder %v1098_v27, 14  ;;  %v1589_v3 = vor.u32 %v1587_v31, %v6489_v44  ;;  %v1599_v7 = vshll.u32 %v6575_v23, 16  ;;  %v5068_v8 = vcombine.low %v6236_v59, %v2013_v53  ;;  %vm1987_vm7 = vmpackc.low %vm6616_vm2, %vm6616_vm2 }
  0xb2   : > { %vm6633_vm5 = vcmp.ge.s32.totalorder %v1077_v52, 1  ;;  %v2144_v13 = vrot.slane %v2142_v47, 7  ;;  %v2145_v0 = vshll.u32 %v6578_v26, 16  ;;  %v1603_v18 = vshrl.u32 %v6575_v23, 16  ;;  %vm1989_vm15 = vmpackc.low %vm6626_vm4, %vm6626_vm4 }
  0xb3   : > { %v2153_v19 = vshll.u32 %v5067_v40, 16  ;;  %v1611_v44 = vshrl.u32 %v5052_v37, 16  ;;  %v1464_v28 = vsel %vm1432_vm1, 65537, %v6397_v20  ;;  %v2015_v17 = vsel %vm1983_vm3, 65537, %v6397_v20  ;;  %vm1434_vm13 = vmpackc.low %vm6633_vm5, %vm6633_vm5  ;;  %v5880_v40 = vld [vmem:[#allocation5 + $0x178] sm:$0xff]  }
  0xb4   : > { %vm6652_vm12 = vcmp.ge.s32.totalorder %v1091_v50, 1  ;;  %v1609_v23 = vrot.slane %v1607_v46, 1  ;;  %v6659_v26 = vrot.slane %v2150_v4, 7  ;;  %v1615_v29 = vshll.u32 %v6621_v6, 16  ;;  %5416 = vmatprep.subr.bf16.mxu1 %v5880_v40 }
  0xb5   : > { %v2017_v30 = vsel %vm1985_vm6, 65537, %v6397_v20  ;;  %v2139_v31 = vor.u32 %v2137_v45, %v6610_v56  ;;  %v1597_v32 = vor.u32 %v1595_v5, %v6596_v57  ;;  %v1601_v33 = vrot.slane %v1599_v7, 1  ;;  %vm1436_vm1 = vmpackc.low %vm6652_vm12, %vm6652_vm12 }
  0xb6   : > { %v2158_v35 = vshrl.u32 %v5068_v8, 16  ;;  %v6674_v36 = vcombine.low %v1464_v28, %v6236_v59  ;;  %v6677_v37 = vcombine.low %v6236_v59, %v2015_v17  ;;  %v2019_v41 = vsel %vm1987_vm7, 65537, %v6397_v20  ;;  %v6726_v17 = vld [vmem:[%s7882_s2] ss:$0 sm:$0xff] }
  0xb7   : > { %v2021_v27 = vsel %vm1989_vm15, 65537, %v6397_v20  ;;  %v2147_v42 = vor.u32 %v2145_v0, %v2144_v13  ;;  %v1605_v43 = vor.u32 %v1603_v18, %v1601_v33  ;;  %v1466_v52 = vsel %vm1434_vm13, 65537, %v6397_v20 }
  0xb8   : > { %v5070_v45 = vcombine.low %v6236_v59, %v2017_v30  ;;  %v2155_v47 = vor.u32 %v2153_v19, %v6659_v26  ;;  %v1613_v53 = vor.u32 %v1611_v44, %v1609_v23  ;;  %v1617_v54 = vrot.slane %v1615_v29, 1  ;;  %v5881_v44 = vld [vmem:[#allocation5 + $0x138] sm:$0xff]  }
  0xb9   : > { %v2161_v5 = vshll.u32 %v5068_v8, 16  ;;  %v6692_v50 = vrot.slane %v2158_v35, 7  ;;  %v1468_v61 = vsel %vm1436_vm1, 65537, %v6397_v20  ;;  %v5071_v46 = vcombine.low %v6236_v59, %v2019_v41  ;;  %5417 = vmatpush3.bf16.msra.mxu1 %v5881_v44 }
  0xba   : > { %v5072_v4 = vcombine.low %v6236_v59, %v2021_v27  ;;  %v6699_v55 = vsel %vm1518_vm8, %v1589_v3, %v6596_v57  ;;  %v1623_v7 = vshll.u32 %v6674_v36, 16  ;;  %v2166_v12 = vshrl.u32 %v6677_v37, 16 }
  0xbb   : > { %v5055_v0 = vcombine.low %v1466_v52, %v6236_v59  ;;  %v6706_v8 = vsel %vm1680_vm11, %v6465_v21, %v2139_v31  ;;  %v6709_v20 = vsel %vm1518_vm8, %v1597_v32, %v1601_v33  ;;  %v1619_v18 = vshrl.u32 %v6621_v6, 16 }
  0xbc   : > { %v2174_v19 = vshrl.u32 %v5070_v45, 16  ;;  %v6714_v57 = vsel %vm1680_vm11, %v6610_v56, %v2147_v42  ;;  %v6717_v3 = vsel %vm1518_vm8, %v1605_v43, %v1609_v23  ;;  %v6720_v28 = vsel %vm1518_vm8, %v1613_v53, %v1617_v54 }
  0xbd   : > { %v5056_v21 = vcombine.low %v1468_v61, %v6236_v59  ;;  %v6729_v6 = vsel %vm1680_vm11, %v2144_v13, %v2155_v47  ;;  %v2163_v22 = vor.u32 %v2161_v5, %v6692_v50  ;;  %v2182_v56 = vshrl.u32 %v5071_v46, 16  ;;  %v6736_v59 = vld [vmem:[%s7883_s3] ss:$0 sm:$0xff] }
  0xbe   : > { %v2190_v29 = vshrl.u32 %v5072_v4, 16  ;;  %v1625_v23 = vrot.slane %v1623_v7, 1  ;;  %v2168_v30 = vrot.slane %v2166_v12, 7  ;;  %v2169_v31 = vshll.u32 %v6677_v37, 16 }
  0xbf   : > { %v1631_v32 = vshll.u32 %v5055_v0, 16  ;;  %vm1648_vm0 = vcmp.ne.s16.totalorder %v6382_v14, 0  ;;  %vm7899_vm2 = vcmp.ne.s16.totalorder %v6414_v25, 0  ;;  %v1621_v13 = vor.u32 %v1619_v18, %v1617_v54 }
  0xc0   : > { %v1627_v35 = vshrl.u32 %v6674_v36, 16  ;;  %v2176_v40 = vrot.slane %v2174_v19, 7  ;;  %v2177_v41 = vshll.u32 %v5070_v45, 16  ;;  %v1635_v37 = vshrl.u32 %v5055_v0, 16 }
  0xc1   : > { %v1639_v43 = vshll.u32 %v5056_v21, 16  ;;  %v2185_v52 = vshll.u32 %v5071_v46, 16  ;;  %v2184_v5 = vrot.slane %v2182_v56, 7  ;;  %v6743_v61 = vrot.slane %v2190_v29, 7 }
  0xc2   : > { %v2193_v7 = vshll.u32 %v5072_v4, 16  ;;  %v2171_v18 = vor.u32 %v2169_v31, %v2168_v30  ;;  %v1633_v45 = vrot.slane %v1631_v32, 1  ;;  %vm2198_vm3 = vcmp.ne.s16.totalorder %v6386_v15, 0 }
  0xc3   : > { %v1629_v46 = vor.u32 %v1627_v35, %v1625_v23  ;;  %v2179_v44 = vor.u32 %v2177_v41, %v2176_v40  ;;  %v1643_v4 = vshrl.u32 %v5056_v21, 16  ;;  %v2187_v31 = vor.u32 %v2185_v52, %v2184_v5 }
  0xc4   : > { %v1637_v29 = vor.u32 %v1635_v37, %v1633_v45  ;;  %v2195_v32 = vor.u32 %v2193_v7, %v6743_v61  ;;  %v6762_v35 = vsel %vm1680_vm11, %v6692_v50, %v2171_v18  ;;  %vm2199_vm4 = vcmp.ne.s16.totalorder %v6432_v34, 0 }
  0xc5   : > { %vm7897_vm5 = vcmp.ne.s16.totalorder %v6438_v38, 0  ;;  %vm2200_vm6 = vcmp.ne.s16.totalorder %v6441_v39, 0  ;;  %vm7898_vm7 = vcmp.ne.s16.totalorder %v6497_v48, 0  ;;  %vm7913_vm12 = vcmp.ne.s16.totalorder %v6501_v49, 0 }
  0xc6   : > { %vm7901_vm15 = vcmp.ne.s16.totalorder %v6519_v51, 0  ;;  %vm7900_vm13 = vcmp.ne.s16.totalorder %v6523_v58, 0  ;;  %vm7902_vm1 = vcmp.ne.s16.totalorder %v6526_v60, 0 }
 0x12a   : > { %v5668_v33 = vpop.f32.mrb[0].mxu0 }
 0x12b   : > { %v707_v27 = vmul.f32 %v5668_v33, %v6726_v17  ;;  %v571_v42 = vpop.f32.mrb[1].mxu0  ;;  %v1641_v33 = vrot.slane %v1639_v43, 1  ;;  %v6765_v43 = vsel %vm1518_vm8, %v1629_v46, %v1633_v45  ;;  %v6780_v45 = vsel %vm1680_vm11, %v2176_v40, %v2187_v31 }
 0x12c   : > { %v705_v47 = vmul.f32 %v6726_v17, %v571_v42  ;;  %v5669_v53 = vpop.f32.mrb[2].mxu0  ;;  %v6754_v42 = vsel %vm1680_vm11, %v6659_v26, %v2163_v22  ;;  %v6768_v26 = vsel %vm1680_vm11, %v2168_v30, %v2179_v44  ;;  %v5886_v22 = vld [vmem:[#allocation5 + $0x200] sm:$0xff]   ;;  %8000 = vst [vmem:[#allocation21_spill] sm:$0xff] %v6780_v45  ;;  %v6783_v30 = vsel %vm1680_vm11, %v2184_v5, %v2195_v32 }
 0x12d   : > { %v746_v12 = vadd.f32 %v6736_v59, %v707_v27  ;;  %v708_v54 = vmul.f32 %v5669_v53, %v6726_v17  ;;  %v574_v36 = vpop.f32.mrb[3].mxu0  ;;  %7999 = vst [vmem:[#allocation20_spill] sm:$0xff] %v6768_v26  ;;  %v6776_v50 = vor.u32 %v1643_v4, %v1641_v33  ;;  %8001 = vst [vmem:[#allocation22_spill] sm:$0xff] %v6783_v30  ;;  %5698 = vmatprep.subr.bf16.mxu1 %v5886_v22 }
 0x12e   : > { %v744_v19 = vadd.f32 %v6736_v59, %v705_v47  ;;  %v706_v0 = vmul.f32 %v6726_v17, %v574_v36  ;;  %v6758_v36 = vsel %vm1518_vm8, %v1621_v13, %v1625_v23  ;;  %v6774_v13 = vsel %vm1518_vm8, %v1637_v29, %v1641_v33 }
 0x12f   : > { %v747_v56 = vadd.f32 %v6736_v59, %v708_v54  ;;  %v778_v47 = vmax.f32 %v746_v12, 0.0  ;;  %vm2210_vm10 = vcmp.ne.s16.totalorder %v6768_v26, 0 }
 0x130   : > { %v745_v27 = vadd.f32 %v6736_v59, %v706_v0  ;;  %v776_v41 = vmax.f32 %v744_v19, 0.0 }
 0x131   : > { %v779_v53 = vmax.f32 %v747_v56, 0.0 }
 0x132   : > { %v777_v21 = vmax.f32 %v745_v27, 0.0  ;;  %v5672_v37 = vpop.f32.mrb[4].mxu0 }
 0x133   : > { %v6770_v52 = vpack.c.bf16 %v779_v53, %v778_v47  ;;  %v711_v7 = vmul.f32 %v5672_v37, %v6726_v17  ;;  %v587_v23 = vpop.f32.mrb[5].mxu0 }
 0x134   : > { %v808_v12 = vpack.c.bf16 %v777_v21, %v776_v41  ;;  %v709_v54 = vmul.f32 %v6726_v17, %v587_v23  ;;  %v5673_v18 = vpop.f32.mrb[6].mxu0 }
 0x135   : > { %827 = vst [vmem:[#allocation3 + $0x18] sm:$0xff] %v6770_v52  ;;  %v750_v19 = vadd.f32 %v6736_v59, %v711_v7  ;;  %v712_v0 = vmul.f32 %v5673_v18, %v6726_v17  ;;  %v590_v46 = vpop.f32.mrb[7].mxu0  ;;  %v2414_v44 = vsel %vm1648_vm0, %v6770_v52, 0  ;;  %v6794_v40 = vsel %vm7899_vm2, %v6770_v52, 0 }
 0x136   : > { %826 = vst [vmem:[#allocation3 + $0x10] sm:$0xff] %v808_v12  ;;  %v748_v5 = vadd.f32 %v6736_v59, %v709_v54  ;;  %v710_v56 = vmul.f32 %v6726_v17, %v590_v46  ;;  %4011 = vmatprep.mubr.bf16.mxu1 %v808_v12  ;;  %v1665_v29 = vsel %vm1648_vm0, %v808_v12, 0  ;;  %v2413_v33 = vsel %vm1647_vm9, %v808_v12, 0 }
 0x137   : > { %v782_v4 = vmax.f32 %v750_v19, 0.0  ;;  %v751_v27 = vadd.f32 %v6736_v59, %v712_v0  ;;  %v1694_v31 = vshrl.u32 %v1665_v29, 16  ;;  %v1697_v32 = vshll.u32 %v1665_v29, 16 }
 0x138   : > { %v780_v47 = vmax.f32 %v748_v5, 0.0  ;;  %v749_v53 = vadd.f32 %v6736_v59, %v710_v56  ;;  %v2434_v41 = vshrl.u32 %v2413_v33, 16  ;;  %v2437_v21 = vshll.u32 %v2413_v33, 16 }
 0x139   : > { %v783_v37 = vmax.f32 %v751_v27, 0.0  ;;  %v6807_v22 = vrot.slane %v1694_v31, 7  ;;  %v2215_v7 = vsel %vm2198_vm3, %v808_v12, 0  ;;  %v2442_v23 = vshrl.u32 %v2414_v44, 16 }
 0x13a   : > { %v781_v54 = vmax.f32 %v749_v53, 0.0  ;;  %v5676_v18 = vpop.f32.mrb[8].mxu0  ;;  %v2436_v19 = vrot.slane %v2434_v41, 7  ;;  %v2239_v0 = vshll.u32 %v2215_v7, 16  ;;  %v2445_v46 = vshll.u32 %v2414_v44, 16 }
 0x13b   : > { %v6811_v29 = vpack.c.bf16 %v783_v37, %v782_v4  ;;  %v715_v5 = vmul.f32 %v5676_v18, %v6726_v17  ;;  %v603_v9 = vpop.f32.mrb[9].mxu0  ;;  %v1699_v56 = vor.u32 %v1697_v32, %v6807_v22  ;;  %v6815_v33 = vrot.slane %v2442_v23, 7  ;;  %v5867_v23 = vld [vmem:[#allocation5 + $0x180] sm:$0xff]   ;;  %v5870_v18 = vld [vmem:[#allocation5 + $0x1c8] sm:$0xff]  }
 0x13c   : > { %v6817_v27 = vpack.c.bf16 %v781_v54, %v780_v47  ;;  %v713_v31 = vmul.f32 %v6726_v17, %v603_v9  ;;  %v5677_v12 = vpop.f32.mrb[10].mxu0  ;;  %v2439_v14 = vor.u32 %v2437_v21, %v2436_v19  ;;  %v2241_v53 = vrot.slane %v2239_v0, 1 }
 0x13d   : > { %829 = vst [vmem:[#allocation3 + $0x28] sm:$0xff] %v6811_v29  ;;  %v754_v44 = vadd.f32 %v6736_v59, %v715_v5  ;;  %v716_v4 = vmul.f32 %v5677_v12, %v6726_v17  ;;  %v606_v41 = vpop.f32.mrb[11].mxu0  ;;  %v1700_v37 = vsel %vm1680_vm11, %v6252_v24, %v1699_v56  ;;  %v2447_v32 = vor.u32 %v2445_v46, %v6815_v33 }
 0x13e   : > { %828 = vst [vmem:[#allocation3 + $0x20] sm:$0xff] %v6817_v27  ;;  %v752_v9 = vadd.f32 %v6736_v59, %v713_v31  ;;  %v714_v47 = vmul.f32 %v6726_v17, %v606_v41  ;;  %4012 = vmatmul.mubr.bf16.gmra.mrb[4].mxu1 %v1700_v37  ;;  %v2440_v21 = vsel %vm1680_vm11, %v6407_v1, %v2439_v14  ;;  %v1702_v5 = vshrl.u32 %v6794_v40, 16 }
 0x13f   : > { %v2242_v54 = vsel %vm1518_vm8, %v6370_v10, %v2241_v53  ;;  %v786_v0 = vmax.f32 %v754_v44, 0.0  ;;  %v755_v24 = vadd.f32 %v6736_v59, %v716_v4  ;;  %4164 = vmatprep.mubr.bf16.mxu0 %v2440_v21  ;;  %4019 = vmatprep.mubr.bf16.mxu1 %v6770_v52  ;;  %v2448_v46 = vsel %vm1680_vm11, %v2436_v19, %v2447_v32  ;;  %v5871_v4 = vld [vmem:[#allocation5 + $0x188] sm:$0xff]  }
 0x140   : > { %v784_v56 = vmax.f32 %v752_v9, 0.0  ;;  %v753_v31 = vadd.f32 %v6736_v59, %v714_v47  ;;  %4165 = vmatmul.mubr.bf16.vlgmr.msra.gmra.mrb[32].mxu0 %v2242_v54  ;;  %v1705_v14 = vshll.u32 %v6794_v40, 16  ;;  %v6842_v10 = vsel %vm2199_vm4, %v6770_v52, 0 }
 0x141   : > { %v787_v1 = vmax.f32 %v755_v24, 0.0  ;;  %4172 = vmatprep.mubr.bf16.mxu0 %v2448_v46  ;;  %v6844_v12 = vrot.slane %v1702_v5, 7  ;;  %v2243_v44 = vshrl.u32 %v2215_v7, 16  ;;  %v2247_v19 = vshll.u32 %v6842_v10, 16  ;;  %5515 = vmatpush3.bf16.msra.mxu0 %v5867_v23  ;;  %v5874_v7 = vld [vmem:[#allocation5 + $0x1d0] sm:$0xff]  }
 0x142   : > { %v785_v41 = vmax.f32 %v753_v31, 0.0  ;;  %v5680_v37 = vpop.f32.mrb[12].mxu0  ;;  %v2415_v40 = vsel %vm7899_vm2, %v6817_v27, 0  ;;  %v1667_v52 = vsel %vm7897_vm5, %v6817_v27, 0  ;;  %v6856_v32 = vsel %vm2200_vm6, %v6817_v27, 0  ;;  %5516 = vmatprep.subr.bf16.mxu0 %v5870_v18 }
 0x143   : > { %v6858_v9 = vpack.c.bf16 %v787_v1, %v786_v0  ;;  %v719_v23 = vmul.f32 %v5680_v37, %v6726_v17  ;;  %v619_v47 = vpop.f32.mrb[13].mxu0  ;;  %v1707_v21 = vor.u32 %v1705_v14, %v6844_v12  ;;  %v2245_v54 = vor.u32 %v2243_v44, %v2241_v53 }
 0x144   : > { %v6863_v24 = vpack.c.bf16 %v785_v41, %v784_v56  ;;  %v717_v46 = vmul.f32 %v6726_v17, %v619_v47  ;;  %v5681_v5 = vpop.f32.mrb[14].mxu0  ;;  %v2249_v31 = vrot.slane %v2247_v19, 1  ;;  %v2450_v25 = vshrl.u32 %v2415_v40, 16  ;;  %v5875_v56 = vld [vmem:[#allocation5 + $0x190] sm:$0xff]  }
 0x145   : > { %831 = vst [vmem:[#allocation3 + $0x38] sm:$0xff] %v6858_v9  ;;  %v758_v18 = vadd.f32 %v6736_v59, %v719_v23  ;;  %v720_v0 = vmul.f32 %v5681_v5, %v6726_v17  ;;  %v622_v1 = vpop.f32.mrb[15].mxu0  ;;  %v1708_v14 = vsel %vm1680_vm11, %v6807_v22, %v1707_v21  ;;  %v2453_v53 = vshll.u32 %v2415_v40, 16  ;;  %5517 = vmatpush3.bf16.msra.mxu0 %v5871_v4  ;;  %v5878_v23 = vld [vmem:[#allocation5 + $0x1d8] sm:$0xff]  }
 0x146   : > { %830 = vst [vmem:[#allocation3 + $0x30] sm:$0xff] %v6863_v24  ;;  %v756_v44 = vadd.f32 %v6736_v59, %v717_v46  ;;  %v718_v19 = vmul.f32 %v6726_v17, %v622_v1  ;;  %4020 = vmatmul.mubr.bf16.gmra.mrb[8].mxu1 %v1708_v14  ;;  %v2250_v41 = vsel %vm1518_vm8, %v2245_v54, %v2249_v31  ;;  %v6876_v37 = vrot.slane %v2450_v25, 7 }
 0x147   : > { %5518 = vmatprep.subr.bf16.mxu0 %v5874_v7  ;;  %v790_v47 = vmax.f32 %v758_v18, 0.0  ;;  %v759_v22 = vadd.f32 %v6736_v59, %v720_v0  ;;  %4027 = vmatprep.mubr.bf16.mxu1 %v6817_v27  ;;  %v1710_v4 = vshrl.u32 %v1667_v52, 16  ;;  %v1713_v40 = vshll.u32 %v1667_v52, 16  ;;  %v5879_v52 = vld [vmem:[#allocation5 + $0x198] sm:$0xff]  }
 0x148   : > { %v788_v21 = vmax.f32 %v756_v44, 0.0  ;;  %v757_v46 = vadd.f32 %v6736_v59, %v718_v19  ;;  %4173 = vmatmul.mubr.bf16.gmra.mrb[36].mxu0 %v2250_v41  ;;  %v2455_v25 = vor.u32 %v2453_v53, %v6876_v37  ;;  %v2251_v7 = vshrl.u32 %v6842_v10, 16  ;;  %v5882_v10 = vld [vmem:[#allocation5 + $0x1e0] sm:$0xff]  }
 0x149   : > { %v791_v54 = vmax.f32 %v759_v22, 0.0  ;;  %v6885_v5 = vrot.slane %v1710_v4, 7  ;;  %v2255_v18 = vshll.u32 %v6856_v32, 16  ;;  %v2416_v27 = vsel %vm7897_vm5, %v6811_v29, 0  ;;  %5519 = vmatpush3.bf16.msra.mxu0 %v5875_v56 }
 0x14a   : > { %v789_v0 = vmax.f32 %v757_v46, 0.0  ;;  %v2456_v1 = vsel %vm1680_vm11, %v6815_v33, %v2455_v25  ;;  %v5684_v14 = vpop.f32.mrb[16].mxu0  ;;  %v2253_v44 = vor.u32 %v2251_v7, %v2249_v31  ;;  %v2458_v53 = vshrl.u32 %v2416_v27, 16  ;;  %5520 = vmatprep.subr.bf16.mxu0 %v5878_v23 }
 0x14b   : > { %v6893_v19 = vpack.c.bf16 %v791_v54, %v790_v47  ;;  %4180 = vmatprep.mubr.bf16.mxu0 %v2456_v1  ;;  %v723_v41 = vmul.f32 %v5684_v14, %v6726_v17  ;;  %v635_v22 = vpop.f32.mrb[17].mxu0  ;;  %v1715_v4 = vor.u32 %v1713_v40, %v6885_v5  ;;  %v2257_v38 = vrot.slane %v2255_v18, 1 }
 0x14c   : > { %v6897_v56 = vpack.c.bf16 %v789_v0, %v788_v21  ;;  %v721_v46 = vmul.f32 %v6726_v17, %v635_v22  ;;  %v5685_v39 = vpop.f32.mrb[18].mxu0  ;;  %v6900_v33 = vrot.slane %v2458_v53, 7  ;;  %v2461_v31 = vshll.u32 %v2416_v27, 16  ;;  %v5883_v21 = vld [vmem:[#allocation5 + $0x1a0] sm:$0xff]  }
 0x14d   : > { %833 = vst [vmem:[#allocation3 + $0x48] sm:$0xff] %v6893_v19  ;;  %v762_v23 = vadd.f32 %v6736_v59, %v723_v41  ;;  %v1716_v47 = vsel %vm1680_vm11, %v6844_v12, %v1715_v4  ;;  %v724_v25 = vmul.f32 %v5685_v39, %v6726_v17  ;;  %v2258_v40 = vsel %vm1518_vm8, %v2253_v44, %v2257_v38  ;;  %v638_v7 = vpop.f32.mrb[19].mxu0  ;;  %v5884_v39 = vld [vmem:[#allocation5 + $0x1e8] sm:$0xff]  }
 0x14e   : > { %5521 = vmatpush3.bf16.msra.mxu0 %v5879_v52  ;;  %832 = vst [vmem:[#allocation3 + $0x40] sm:$0xff] %v6897_v56  ;;  %v760_v54 = vadd.f32 %v6736_v59, %v721_v46  ;;  %4028 = vmatmul.mubr.bf16.gmra.mrb[12].mxu1 %v1716_v47  ;;  %v722_v18 = vmul.f32 %v6726_v17, %v638_v7  ;;  %v1668_v12 = vsel %vm7898_vm7, %v6811_v29, 0  ;;  %v2218_v22 = vsel %vm7913_vm12, %v6811_v29, 0 }
 0x14f   : > { %v2463_v27 = vor.u32 %v2461_v31, %v6900_v33  ;;  %5522 = vmatprep.subr.bf16.mxu0 %v5882_v10  ;;  %v794_v0 = vmax.f32 %v762_v23, 0.0  ;;  %v763_v1 = vadd.f32 %v6736_v59, %v724_v25  ;;  %4035 = vmatprep.mubr.bf16.mxu1 %v6811_v29  ;;  %v1718_v52 = vshrl.u32 %v1668_v12, 16  ;;  %v5885_v23 = vld [vmem:[#allocation5 + $0x1a8] sm:$0xff]  }
 0x150   : > { %v1721_v14 = vshll.u32 %v1668_v12, 16  ;;  %v792_v44 = vmax.f32 %v760_v54, 0.0  ;;  %4181 = vmatmul.mubr.bf16.gmra.mrb[40].mxu0 %v2258_v40  ;;  %v761_v53 = vadd.f32 %v6736_v59, %v722_v18  ;;  %v2259_v46 = vshrl.u32 %v6856_v32, 16  ;;  %v5887_v40 = vld [vmem:[#allocation5 + $0x1f0] sm:$0xff]  }
 0x151   : > { %v2464_v41 = vsel %vm1680_vm11, %v6876_v37, %v2463_v27  ;;  %v795_v10 = vmax.f32 %v763_v1, 0.0  ;;  %v6923_v4 = vrot.slane %v1718_v52, 7  ;;  %v2263_v31 = vshll.u32 %v2218_v22, 16 }
 0x152   : > { %4188 = vmatprep.mubr.bf16.mxu0 %v2464_v41  ;;  %vm7904_vm5 = vcmp.ne.s16.totalorder %v6533_v62, 0  ;;  %5523 = vmatpush3.bf16.msra.mxu0 %v5883_v21  ;;  %v793_v47 = vmax.f32 %v761_v53, 0.0  ;;  %v2417_v37 = vsel %vm7898_vm7, %v6863_v24, 0  ;;  %v5688_v25 = vpop.f32.mrb[20].mxu0  ;;  %v1669_v29 = vsel %vm7901_vm15, %v6863_v24, 0 }
 0x153   : > { %v6937_v32 = vsel %vm7900_vm13, %v6863_v24, 0  ;;  %5524 = vmatprep.subr.bf16.mxu0 %v5884_v39  ;;  %v6939_v7 = vpack.c.bf16 %v795_v10, %v794_v0  ;;  %v1723_v21 = vor.u32 %v1721_v14, %v6923_v4  ;;  %v2261_v54 = vor.u32 %v2259_v46, %v2257_v38  ;;  %v651_v27 = vpop.f32.mrb[21].mxu0  ;;  %v5888_v46 = vld [vmem:[#allocation5 + $0x1b0] sm:$0xff]  }
 0x154   : > { %v2265_v18 = vrot.slane %v2263_v31, 1  ;;  %v6942_v12 = vpack.c.bf16 %v793_v47, %v792_v44  ;;  %v2466_v1 = vshrl.u32 %v2417_v37, 16  ;;  %v2469_v52 = vshll.u32 %v2417_v37, 16  ;;  %v5689_v41 = vpop.f32.mrb[22].mxu0 }
 0x155   : > { %v727_v53 = vmul.f32 %v5688_v25, %v6726_v17  ;;  %835 = vst [vmem:[#allocation3 + $0x58] sm:$0xff] %v6939_v7  ;;  %v1724_v39 = vsel %vm1680_vm11, %v6885_v5, %v1723_v21  ;;  %v725_v10 = vmul.f32 %v6726_v17, %v651_v27  ;;  %v1726_v14 = vshrl.u32 %v1669_v29, 16  ;;  %v654_v38 = vpop.f32.mrb[23].mxu0  ;;  %v5889_v5 = vld [vmem:[#allocation5 + $0x1f8] sm:$0xff]  }
 0x156   : > { %v2266_v0 = vsel %vm1518_vm8, %v2261_v54, %v2265_v18  ;;  %5525 = vmatpush3.bf16.msra.mxu0 %v5885_v23  ;;  %834 = vst [vmem:[#allocation3 + $0x50] sm:$0xff] %v6942_v12  ;;  %4036 = vmatmul.mubr.bf16.gmra.mrb[16].mxu1 %v1724_v39  ;;  %v6951_v44 = vrot.slane %v2466_v1, 7  ;;  %v1729_v47 = vshll.u32 %v1669_v29, 16  ;;  %v728_v37 = vmul.f32 %v5689_v41, %v6726_v17 }
 0x157   : > { %v766_v31 = vadd.f32 %v6736_v59, %v727_v53  ;;  %vm7909_vm7 = vcmp.ne.s16.totalorder %v6537_v63, 0  ;;  %5526 = vmatprep.subr.bf16.mxu0 %v5887_v40  ;;  %4043 = vmatprep.mubr.bf16.mxu1 %v6863_v24  ;;  %v764_v25 = vadd.f32 %v6736_v59, %v725_v10  ;;  %v6958_v23 = vrot.slane %v1726_v14, 7  ;;  %v5890_v10 = vld [vmem:[#allocation5 + $0x1b8] sm:$0xff]  }
 0x158   : > { %v2267_v21 = vshrl.u32 %v2218_v22, 16  ;;  %v2271_v54 = vshll.u32 %v6937_v32, 16  ;;  %4189 = vmatmul.mubr.bf16.gmra.mrb[44].mxu0 %v2266_v0  ;;  %v2471_v27 = vor.u32 %v2469_v52, %v6951_v44  ;;  %v767_v29 = vadd.f32 %v6736_v59, %v728_v37 }
 0x159   : > { %v798_v1 = vmax.f32 %v766_v31, 0.0  ;;  %v726_v53 = vmul.f32 %v6726_v17, %v654_v38  ;;  %v796_v41 = vmax.f32 %v764_v25, 0.0  ;;  %v1731_v40 = vor.u32 %v1729_v47, %v6958_v23 }
 0x15a   : > { %v2269_v39 = vor.u32 %v2267_v21, %v2265_v18  ;;  %v2273_v24 = vrot.slane %v2271_v54, 1  ;;  %vm7910_vm2 = vcmp.ne.s16.totalorder %v6540_v2, 0  ;;  %5527 = vmatpush3.bf16.msra.mxu0 %v5888_v46  ;;  %v2472_v22 = vsel %vm1680_vm11, %v6900_v33, %v2471_v27  ;;  %v5692_v38 = vpop.f32.mrb[24].mxu0 }
 0x15b   : > { %v799_v0 = vmax.f32 %v767_v29, 0.0  ;;  %v765_v52 = vadd.f32 %v6736_v59, %v726_v53  ;;  %v2418_v14 = vsel %vm7901_vm15, %v6858_v9, 0  ;;  %5528 = vmatprep.subr.bf16.mxu0 %v5889_v5  ;;  %4196 = vmatprep.mubr.bf16.mxu0 %v2472_v22  ;;  %v1732_v18 = vsel %vm1680_vm11, %v6923_v4, %v1731_v40  ;;  %v667_v37 = vpop.f32.mrb[25].mxu0 }
 0x15c   : > { %v2274_v31 = vsel %vm1518_vm8, %v2269_v39, %v2273_v24  ;;  %v2474_v46 = vshrl.u32 %v2418_v14, 16  ;;  %v2477_v47 = vshll.u32 %v2418_v14, 16  ;;  %vm7911_vm13 = vcmp.ne.s16.totalorder %v6699_v55, 0  ;;  %v5693_v54 = vpop.f32.mrb[26].mxu0 }
 0x15d   : > { %v6976_v33 = vpack.c.bf16 %v799_v0, %v798_v1  ;;  %v797_v25 = vmax.f32 %v765_v52, 0.0  ;;  %v1670_v21 = vsel %vm7902_vm1, %v6858_v9, 0  ;;  %v2220_v5 = vsel %vm7904_vm5, %v6858_v9, 0  ;;  %v670_v40 = vpop.f32.mrb[27].mxu0 }
 0x15e   : > { %v2476_v4 = vrot.slane %v2474_v46, 7  ;;  %v1734_v27 = vshrl.u32 %v1670_v21, 16  ;;  %v1737_v29 = vshll.u32 %v1670_v21, 16  ;;  %v2275_v53 = vshrl.u32 %v6937_v32, 16  ;;  %5529 = vmatpush3.bf16.msra.mxu0 %v5890_v10  ;;  %4044 = vmatmul.mubr.bf16.gmra.mrb[20].mxu1 %v1732_v18 }
 0x15f   : > { %837 = vst [vmem:[#allocation3 + $0x68] sm:$0xff] %v6976_v33  ;;  %v6986_v1 = vpack.c.bf16 %v797_v25, %v796_v41  ;;  %v2279_v39 = vshll.u32 %v2220_v5, 16  ;;  %v2419_v22 = vsel %vm7902_vm1, %v6897_v56, 0  ;;  %v731_v0 = vmul.f32 %v5692_v38, %v6726_v17  ;;  %4051 = vmatprep.mubr.bf16.mxu1 %v6858_v9 }
 0x160   : > { %v2479_v52 = vor.u32 %v2477_v47, %v2476_v4  ;;  %v1736_v14 = vrot.slane %v1734_v27, 7  ;;  %v2277_v46 = vor.u32 %v2275_v53, %v2273_v24  ;;  %v2482_v32 = vshrl.u32 %v2419_v22, 16  ;;  %4197 = vmatmul.mubr.bf16.gmra.mrb[48].mxu0 %v2274_v31 }
 0x161   : > { %vm7912_vm15 = vcmp.ne.s16.totalorder %v6706_v8, 0  ;;  %836 = vst [vmem:[#allocation3 + $0x60] sm:$0xff] %v6986_v1  ;;  %v2281_v41 = vrot.slane %v2279_v39, 1  ;;  %v2485_v10 = vshll.u32 %v2419_v22, 16  ;;  %v770_v18 = vadd.f32 %v6736_v59, %v731_v0 }
 0x162   : > { %v729_v25 = vmul.f32 %v6726_v17, %v667_v37  ;;  %v2480_v38 = vsel %vm1680_vm11, %v6951_v44, %v2479_v52  ;;  %v1739_v21 = vor.u32 %v1737_v29, %v1736_v14  ;;  %v2484_v9 = vrot.slane %v2482_v32, 7  ;;  %v5696_v39 = vpop.f32.mrb[28].mxu0 }
 0x163   : > { %v1671_v24 = vsel %vm7909_vm7, %v6897_v56, 0  ;;  %4204 = vmatprep.mubr.bf16.mxu0 %v2480_v38  ;;  %v2282_v31 = vsel %vm1518_vm8, %v2277_v46, %v2281_v41  ;;  %v802_v47 = vmax.f32 %v770_v18, 0.0  ;;  %v732_v44 = vmul.f32 %v5693_v54, %v6726_v17  ;;  %v683_v29 = vpop.f32.mrb[29].mxu0 }
 0x164   : > { %v768_v27 = vadd.f32 %v6736_v59, %v729_v25  ;;  %v1742_v53 = vshrl.u32 %v1671_v24, 16  ;;  %v1740_v37 = vsel %vm1680_vm11, %v6958_v23, %v1739_v21  ;;  %v2487_v22 = vor.u32 %v2485_v10, %v2484_v9  ;;  %v5697_v25 = vpop.f32.mrb[30].mxu0 }
 0x165   : > { %v1745_v0 = vshll.u32 %v1671_v24, 16  ;;  %vm7915_vm1 = vcmp.ne.s16.totalorder %v6709_v20, 0  ;;  %v2221_v46 = vsel %vm7910_vm2, %v6897_v56, 0  ;;  %v2283_v18 = vshrl.u32 %v2220_v5, 16  ;;  %v7015_v54 = vpop.f32.mrb[31].mxu0 }
 0x166   : > { %v800_v52 = vmax.f32 %v768_v27, 0.0  ;;  %v1744_v32 = vrot.slane %v1742_v53, 7  ;;  %v2488_v38 = vsel %vm1680_vm11, %v2476_v4, %v2487_v22  ;;  %v771_v60 = vadd.f32 %v6736_v59, %v732_v44  ;;  %4052 = vmatmul.mubr.bf16.gmra.mrb[24].mxu1 %v1740_v37 }
 0x167   : > { %v2287_v23 = vshll.u32 %v2221_v46, 16  ;;  %v730_v10 = vmul.f32 %v6726_v17, %v670_v40  ;;  %vm7914_vm5 = vcmp.ne.s16.totalorder %v6714_v57, 0  ;;  %v2285_v24 = vor.u32 %v2283_v18, %v2281_v41  ;;  %4059 = vmatprep.mubr.bf16.mxu1 %v6897_v56 }
 0x168   : > { %v1747_v21 = vor.u32 %v1745_v0, %v1744_v32  ;;  %v2420_v27 = vsel %vm7909_vm7, %v6893_v19, 0  ;;  %v1672_v5 = vsel %vm7911_vm13, %v6893_v19, 0  ;;  %v803_v4 = vmax.f32 %v771_v60, 0.0  ;;  %4205 = vmatmul.mubr.bf16.gmra.mrb[52].mxu0 %v2282_v31 }
 0x169   : > { %v2289_v53 = vrot.slane %v2287_v23, 1  ;;  %v769_v40 = vadd.f32 %v6736_v59, %v730_v10  ;;  %v2490_v22 = vshrl.u32 %v2420_v27, 16  ;;  %v2493_v0 = vshll.u32 %v2420_v27, 16  ;;  %4212 = vmatprep.mubr.bf16.mxu0 %v2488_v38 }
 0x16a   : > { %v1748_v37 = vsel %vm1680_vm11, %v1736_v14, %v1747_v21  ;;  %v1750_v41 = vshrl.u32 %v1672_v5, 16  ;;  %v1753_v44 = vshll.u32 %v1672_v5, 16  ;;  %v7026_v18 = vpack.c.bf16 %v803_v4, %v802_v47 }
 0x16b   : > { %v2290_v63 = vsel %vm1518_vm8, %v2285_v24, %v2289_v53  ;;  %v801_v51 = vmax.f32 %v769_v40, 0.0  ;;  %v2492_v2 = vrot.slane %v2490_v22, 7  ;;  %vm7917_vm7 = vcmp.ne.s16.totalorder %v6717_v3, 0 }
 0x16c   : > { %v1752_v60 = vrot.slane %v1750_v41, 7  ;;  %v2222_v56 = vsel %vm7912_vm15, %v6893_v19, 0  ;;  %v2291_v31 = vshrl.u32 %v2221_v46, 16  ;;  %v2421_v14 = vsel %vm7911_vm13, %v6942_v12, 0  ;;  %839 = vst [vmem:[#allocation3 + $0x78] sm:$0xff] %v7026_v18 }
 0x16d   : > { %v7037_v47 = vpack.c.bf16 %v801_v51, %v800_v52  ;;  %v2495_v38 = vor.u32 %v2493_v0, %v2492_v2  ;;  %v2295_v23 = vshll.u32 %v2222_v56, 16  ;;  %v2498_v10 = vshrl.u32 %v2421_v14, 16 }
 0x16e   : > { %vm7919_vm2 = vcmp.ne.s16.totalorder %v6729_v6, 0  ;;  %v1755_v21 = vor.u32 %v1753_v44, %v1752_v60  ;;  %v2293_v24 = vor.u32 %v2291_v31, %v2289_v53  ;;  %v2501_v27 = vshll.u32 %v2421_v14, 16  ;;  %4060 = vmatmul.mubr.bf16.gmra.mrb[28].mxu1 %v1748_v37 }
 0x16f   : > { %v735_v5 = vmul.f32 %v5696_v39, %v6726_v17  ;;  %838 = vst [vmem:[#allocation3 + $0x70] sm:$0xff] %v7037_v47  ;;  %v2496_v46 = vsel %vm1680_vm11, %v2484_v9, %v2495_v38  ;;  %v2297_v4 = vrot.slane %v2295_v23, 1  ;;  %v2500_v40 = vrot.slane %v2498_v10, 7  ;;  %4067 = vmatprep.mubr.bf16.mxu1 %v6893_v19 }
 0x170   : > { %v733_v22 = vmul.f32 %v6726_v17, %v683_v29  ;;  %v1756_v51 = vsel %vm1680_vm11, %v1744_v32, %v1755_v21  ;;  %v1673_v53 = vsel %vm7915_vm1, %v6942_v12, 0  ;;  %v736_v0 = vmul.f32 %v5697_v25, %v6726_v17  ;;  %4213 = vmatmul.mubr.bf16.gmra.mrb[56].mxu0 %v2290_v63 }
 0x171   : > { %v774_v52 = vadd.f32 %v6736_v59, %v735_v5  ;;  %vm7920_vm13 = vcmp.ne.s16.totalorder %v6720_v28, 0  ;;  %v2298_v9 = vsel %vm1518_vm8, %v2293_v24, %v2297_v4  ;;  %v2503_v39 = vor.u32 %v2501_v27, %v2500_v40  ;;  %4220 = vmatprep.mubr.bf16.mxu0 %v2496_v46 }
 0x172   : > { %v772_v29 = vadd.f32 %v6736_v59, %v733_v22  ;;  %v1758_v37 = vshrl.u32 %v1673_v53, 16  ;;  %vm7918_vm15 = vcmp.ne.s16.totalorder %v6754_v42, 0  ;;  %v1761_v41 = vshll.u32 %v1673_v53, 16 }
 0x173   : > { %v806_v32 = vmax.f32 %v774_v52, 0.0  ;;  %v775_v44 = vadd.f32 %v6736_v59, %v736_v0  ;;  %v2223_v25 = vsel %vm7914_vm5, %v6942_v12, 0  ;;  %v2504_v19 = vsel %vm1680_vm11, %v2492_v2, %v2503_v39 }
 0x174   : > { %v804_v31 = vmax.f32 %v772_v29, 0.0  ;;  %v1760_v14 = vrot.slane %v1758_v37, 7  ;;  %v2299_v38 = vshrl.u32 %v2222_v56, 16  ;;  %vm1659_vm12 = vcmp.ne.s16.totalorder %v6758_v36, 0 }
 0x175   : > { %v807_v23 = vmax.f32 %v775_v44, 0.0  ;;  %v2303_v10 = vshll.u32 %v2223_v25, 16  ;;  %v734_v63 = vmul.f32 %v6726_v17, %v7015_v54  ;;  %v2422_v21 = vsel %vm7915_vm1, %v6939_v7, 0 }
 0x176   : > { %v1763_v24 = vor.u32 %v1761_v41, %v1760_v14  ;;  %v2301_v27 = vor.u32 %v2299_v38, %v2297_v4  ;;  %v2506_v5 = vshrl.u32 %v2422_v21, 16  ;;  %v2509_v46 = vshll.u32 %v2422_v21, 16  ;;  %4068 = vmatmul.mubr.bf16.gmra.mrb[32].mxu1 %v1756_v51 }
 0x177   : > { %v7066_v22 = vpack.c.bf16 %v807_v23, %v806_v32  ;;  %v2305_v2 = vrot.slane %v2303_v10, 1  ;;  %v773_v56 = vadd.f32 %v6736_v59, %v734_v63  ;;  %v1674_v52 = vsel %vm7917_vm7, %v6939_v7, 0  ;;  %4075 = vmatprep.mubr.bf16.mxu1 %v6942_v12 }
 0x178   : > { %vm2209_vm5 = vcmp.ne.s16.totalorder %v6762_v35, 0  ;;  %v1764_v17 = vsel %vm1680_vm11, %v1752_v60, %v1763_v24  ;;  %v2508_v54 = vrot.slane %v2506_v5, 7  ;;  %v1766_v53 = vshrl.u32 %v1674_v52, 16  ;;  %4221 = vmatmul.mubr.bf16.gmra.mrb[60].mxu0 %v2298_v9 }
 0x179   : > { %v1769_v0 = vshll.u32 %v1674_v52, 16  ;;  %841 = vst [vmem:[#allocation3 + $0x88] sm:$0xff] %v7066_v22  ;;  %v2306_v4 = vsel %vm1518_vm8, %v2301_v27, %v2305_v2  ;;  %v805_v39 = vmax.f32 %v773_v56, 0.0  ;;  %v2224_v59 = vsel %vm7919_vm2, %v6939_v7, 0  ;;  %4228 = vmatprep.mubr.bf16.mxu0 %v2504_v19 }
 0x17a   : > { %v2307_v29 = vshrl.u32 %v2223_v25, 16  ;;  %v2511_v37 = vor.u32 %v2509_v46, %v2508_v54  ;;  %v1768_v32 = vrot.slane %v1766_v53, 7  ;;  %v2311_v41 = vshll.u32 %v2224_v59, 16 }
 0x17b   : > { %v2423_v60 = vsel %vm7917_vm7, %v6986_v1, 0  ;;  %vm1660_vm1 = vcmp.ne.s16.totalorder %v6765_v43, 0  ;;  %v7085_v51 = vpack.c.bf16 %v805_v39, %v804_v31  ;;  %v1675_v63 = vsel %vm7920_vm13, %v6986_v1, 0 }
 0x17c   : > { %v2309_v44 = vor.u32 %v2307_v29, %v2305_v2  ;;  %v2514_v38 = vshrl.u32 %v2423_v60, 16  ;;  %v2517_v23 = vshll.u32 %v2423_v60, 16  ;;  %v2512_v12 = vsel %vm1680_vm11, %v2500_v40, %v2511_v37 }
 0x17d   : > { %v1771_v25 = vor.u32 %v1769_v0, %v1768_v32  ;;  %v2313_v10 = vrot.slane %v2311_v41, 1  ;;  %840 = vst [vmem:[#allocation3 + $0x80] sm:$0xff] %v7085_v51  ;;  %v1774_v24 = vshrl.u32 %v1675_v63, 16  ;;  %v1777_v27 = vshll.u32 %v1675_v63, 16 }
 0x17e   : > { %v2516_v21 = vrot.slane %v2514_v38, 7  ;;  %v2225_v9 = vsel %vm7918_vm15, %v6986_v1, 0  ;;  %vm1661_vm7 = vcmp.ne.s16.totalorder %v6774_v13, 0  ;;  %v2315_v31 = vshrl.u32 %v2224_v59, 16  ;;  %4076 = vmatmul.mubr.bf16.gmra.mrb[36].mxu1 %v1764_v17 }
 0x17f   : > { %v1772_v19 = vsel %vm1680_vm11, %v1760_v14, %v1771_v25  ;;  %v2314_v40 = vsel %vm1518_vm8, %v2309_v44, %v2313_v10  ;;  %v2319_v5 = vshll.u32 %v2225_v9, 16  ;;  %v1776_v2 = vrot.slane %v1774_v24, 7  ;;  %4083 = vmatprep.mubr.bf16.mxu1 %v6939_v7 }
 0x180   : > { %v2519_v46 = vor.u32 %v2517_v23, %v2516_v21  ;;  %v2424_v56 = vsel %vm7920_vm13, %v6976_v33, 0  ;;  %v1676_v52 = vsel %vm1659_vm12, %v6976_v33, 0  ;;  %v2317_v53 = vor.u32 %v2315_v31, %v2313_v10  ;;  %4229 = vmatmul.mubr.bf16.gmra.mrb[64].mxu0 %v2306_v4 }
 0x181   : > { %v2321_v0 = vrot.slane %v2319_v5, 1  ;;  %v2522_v39 = vshrl.u32 %v2424_v56, 16  ;;  %v2525_v29 = vshll.u32 %v2424_v56, 16  ;;  %vm2211_vm15 = vcmp.ne.s16.totalorder %v6780_v45, 0  ;;  %4236 = vmatprep.mubr.bf16.mxu0 %v2512_v12 }
 0x182   : > { %v2520_v14 = vsel %vm1680_vm11, %v2508_v54, %v2519_v46  ;;  %v1779_v59 = vor.u32 %v1777_v27, %v1776_v2  ;;  %v1782_v37 = vshrl.u32 %v1676_v52, 16  ;;  %v1785_v41 = vshll.u32 %v1676_v52, 16 }
 0x183   : > { %v7108_v60 = vsel %vm1518_vm8, %v2317_v53, %v2321_v0  ;;  %v2524_v44 = vrot.slane %v2522_v39, 7  ;;  %v2226_v38 = vsel %vm2209_vm5, %v6976_v33, 0  ;;  %v2323_v23 = vshrl.u32 %v2225_v9, 16 }
 0x184   : > { %v7114_v25 = vsel %vm1680_vm11, %v1768_v32, %v1779_v59  ;;  %v1784_v17 = vrot.slane %v1782_v37, 7  ;;  %v2327_v54 = vshll.u32 %v2226_v38, 16  ;;  %v2425_v10 = vsel %vm1659_vm12, %v7037_v47, 0 }
 0x185   : > { %vm1662_vm2 = vcmp.ne.s16.totalorder %v6776_v50, 0  ;;  %vm7927_vm13 = vcmp.ne.s16.totalorder %v6783_v30, 0  ;;  %v2527_v7 = vor.u32 %v2525_v29, %v2524_v44  ;;  %v2325_v63 = vor.u32 %v2323_v23, %v2321_v0 }
 0x186   : > { %v2530_v24 = vshrl.u32 %v2425_v10, 16  ;;  %v2533_v27 = vshll.u32 %v2425_v10, 16  ;;  %v1787_v9 = vor.u32 %v1785_v41, %v1784_v17  ;;  %v2329_v4 = vrot.slane %v2327_v54, 1  ;;  %4084 = vmatmul.mubr.bf16.gmra.mrb[40].mxu1 %v1772_v19 }
 0x187   : > { %v1677_v32 = vsel %vm1660_vm1, %v7037_v47, 0  ;;  %v2227_v31 = vsel %vm2210_vm10, %v7037_v47, 0  ;;  %v2528_v5 = vsel %vm1680_vm11, %v2516_v21, %v2527_v7  ;;  %v2331_v0 = vshrl.u32 %v2226_v38, 16  ;;  %4091 = vmatprep.mubr.bf16.mxu1 %v6986_v1 }
 0x188   : > { %v2532_v46 = vrot.slane %v2530_v24, 7  ;;  %v1790_v56 = vshrl.u32 %v1677_v32, 16  ;;  %v1793_v52 = vshll.u32 %v1677_v32, 16  ;;  %v7129_v12 = vsel %vm1680_vm11, %v1776_v2, %v1787_v9  ;;  %v7142_v24 = vpop.f32.mrb[0].mxu1  ;;  %4237 = vmatmul.mubr.bf16.gmra.mrb[68].mxu0 %v2314_v40 }
 0x189   : > { %v7132_v53 = vsel %vm1518_vm8, %v2325_v63, %v2329_v4  ;;  %v2335_v39 = vshll.u32 %v2227_v31, 16  ;;  %v2426_v37 = vsel %vm1660_vm1, %v7026_v18, 0  ;;  %v1678_v21 = vsel %vm1661_vm7, %v7026_v18, 0  ;;  %v7148_v32 = vpop.f32.mrb[1].mxu1  ;;  %4244 = vmatprep.mubr.bf16.mxu0 %v2520_v14 }
 0x18a   : > { %v2535_v29 = vor.u32 %v2533_v27, %v2532_v46  ;;  %v1792_v59 = vrot.slane %v1790_v56, 7  ;;  %v2333_v41 = vor.u32 %v2331_v0, %v2329_v4  ;;  %v2538_v2 = vshrl.u32 %v2426_v37, 16  ;;  %v7154_v40 = vpop.f32.mrb[2].mxu1 }
 0x18b   : > { %v2337_v23 = vrot.slane %v2335_v39, 1  ;;  %v2541_v54 = vshll.u32 %v2426_v37, 16  ;;  %v1798_v7 = vshrl.u32 %v1678_v21, 16  ;;  %v1801_v63 = vshll.u32 %v1678_v21, 16  ;;  %v7156_v21 = vpop.f32.mrb[3].mxu1 }
 0x18c   : > { %v2536_v38 = vsel %vm1680_vm11, %v2524_v44, %v2535_v29  ;;  %v1795_v10 = vor.u32 %v1793_v52, %v1792_v59  ;;  %v2540_v9 = vrot.slane %v2538_v2, 7  ;;  %v2228_v19 = vsel %vm2211_vm15, %v7026_v18, 0 }
 0x18d   : > { %v2338_v27 = vsel %vm1518_vm8, %v2333_v41, %v2337_v23  ;;  %v2339_v4 = vshrl.u32 %v2227_v31, 16  ;;  %v1800_v44 = vrot.slane %v1798_v7, 7  ;;  %v2343_v56 = vshll.u32 %v2228_v19, 16 }
 0x18e   : > { %v1796_v1 = vsel %vm1680_vm11, %v1784_v17, %v1795_v10  ;;  %v2427_v52 = vsel %vm1661_vm7, %v7085_v51, 0  ;;  %v2543_v0 = vor.u32 %v2541_v54, %v2540_v9  ;;  %v1679_v14 = vsel %vm1662_vm2, %v7085_v51, 0  ;;  %4092 = vmatmul.mubr.bf16.gmra.mrb[44].mxu1 %v7114_v25 }
 0x18f   : > { %v2341_v39 = vor.u32 %v2339_v4, %v2337_v23  ;;  %v2546_v29 = vshrl.u32 %v2427_v52, 16  ;;  %v2549_v37 = vshll.u32 %v2427_v52, 16  ;;  %v1803_v31 = vor.u32 %v1801_v63, %v1800_v44  ;;  %4099 = vmatprep.mubr.bf16.mxu1 %v6976_v33 }
 0x190   : > { %v2345_v41 = vrot.slane %v2343_v56, 1  ;;  %v7164_v17 = vsel %vm7927_vm13, %v7085_v51, 0  ;;  %v2544_v2 = vsel %vm1680_vm11, %v2532_v46, %v2543_v0  ;;  %v1806_v54 = vshrl.u32 %v1679_v14, 16  ;;  %4245 = vmatmul.mubr.bf16.gmra.mrb[72].mxu0 %v7108_v60 }
 0x191   : > { %v2548_v10 = vrot.slane %v2546_v29, 7  ;;  %v1809_v23 = vshll.u32 %v1679_v14, 16  ;;  %v1804_v7 = vsel %vm1680_vm11, %v1792_v59, %v1803_v31  ;;  %v2347_v63 = vshrl.u32 %v2228_v19, 16  ;;  %4252 = vmatprep.mubr.bf16.mxu0 %v2528_v5 }
 0x192   : > { %v2346_v4 = vsel %vm1518_vm8, %v2341_v39, %v2345_v41  ;;  %v2351_v56 = vshll.u32 %v7164_v17, 16  ;;  %v1808_v45 = vrot.slane %v1806_v54, 7  ;;  %v2428_v59 = vsel %vm1662_vm2, %v7066_v22, 0  ;;  %v7186_v22 = vld [vmem:[#allocation3 + $0x18] sm:$0xff] }
 0x193   : > { %v2551_v52 = vor.u32 %v2549_v37, %v2548_v10  ;;  %v2349_v30 = vor.u32 %v2347_v63, %v2345_v41  ;;  %v2554_v39 = vshrl.u32 %v2428_v59, 16  ;;  %v2557_v25 = vshll.u32 %v2428_v59, 16 }
 0x194   : > { %v2353_v26 = vrot.slane %v2351_v56, 1  ;;  %v1811_v0 = vor.u32 %v1809_v23, %v1808_v45  ;;  %v2625_v45 = vld [vmem:[#allocation3 + $0x10] sm:$0xff]  ;;  %vm7928_vm13 = vcmp.ne.s16.totalorder %v6743_v61, 0  ;;  %v2355_v41 = vshrl.u32 %v7164_v17, 16 }
 0x195   : > { %v2552_v46 = vsel %vm1680_vm11, %v2540_v9, %v2551_v52  ;;  %v2556_v37 = vrot.slane %v2554_v39, 7  ;;  %v1893_v9 = vld [vmem:[#allocation3 + $0x88] sm:$0x1]  ;;  %v7206_v54 = vadd.f32 %v7148_v32, %v7142_v24  ;;  %v2841_v23 = vsel %vm1647_vm9, %v7186_v22, 0  ;;  %v8004_v39 = vld [vmem:[#allocation11_spill] sm:$0xff] }
 0x196   : > { %v2354_v19 = vsel %vm1518_vm8, %v2349_v30, %v2353_v26  ;;  %v1812_v29 = vsel %vm1680_vm11, %v1800_v44, %v1811_v0  ;;  %4100 = vmatmul.mubr.bf16.gmra.mrb[48].mxu1 %v7129_v12  ;;  %v2642_v30 = vsel %vm2197_vm14, %v2625_v45, 0  ;;  %v2230_v31 = vsel %vm7928_vm13, %v1893_v9, 0 }
 0x197   : > { %v2559_v33 = vor.u32 %v2557_v25, %v2556_v37  ;;  %4107 = vmatprep.mubr.bf16.mxu1 %v7037_v47  ;;  %v2662_v5 = vshll.u32 %v2642_v30, 16  ;;  %v2643_v47 = vsel %vm2198_vm3, %v7186_v22, 0  ;;  %v2357_v63 = vor.u32 %v2355_v41, %v2353_v26 }
 0x198   : > { %4253 = vmatmul.mubr.bf16.gmra.mrb[76].mxu0 %v7132_v53  ;;  %v2660_v53 = vshrl.u32 %v2642_v30, 16  ;;  %v2671_v17 = vshrl.u32 %v2643_v47, 16  ;;  %v2862_v24 = vshrl.u32 %v2841_v23, 16  ;;  %vm8005_vm9 = vcmp.ne.s16.totalorder %v8004_v39, 0 }
 0x199   : > { %v2560_v60 = vsel %vm1680_vm11, %v2548_v10, %v2559_v33  ;;  %4260 = vmatprep.mubr.bf16.mxu0 %v2536_v38  ;;  %v2664_v12 = vrot.slane %v2662_v5, 1  ;;  %v2667_v38 = vshll.u32 %v2643_v47, 16  ;;  %v7202_v10 = vld [vmem:[#allocation3 + $0x28] sm:$0xff]  ;;  %vm8006_vm13 = vcmp.ne.s16.totalorder %v6501_v49, 0  ;;  %v7231_v5 = vld [vmem:[#allocation3 + $0x70] sm:$0xff]  ;;  %v5899_v47 = vld [vmem:[#allocation5 + $0x200] sm:$0xff]  }
 0x19a   : > { %v7228_v37 = vadd.f32 %v7156_v21, %v7154_v40  ;;  %v5892_v21 = vld [vmem:[#allocation5 + $0x210] sm:$0xff]  }
 0x19b   : > { %v2669_v44 = vrot.slane %v2667_v38, 1  ;;  %v2864_v38 = vrot.slane %v2862_v24, 7 }
 0x19d   : > { %v2673_v16 = vor.u32 %v2671_v17, %v2669_v44 }
 0x19e   : > { %4108 = vmatmul.mubr.bf16.gmra.mrb[52].mxu1 %v1796_v1 }
 0x19f   : > { %4115 = vmatprep.mubr.bf16.mxu1 %v7026_v18  ;;  %v7192_v18 = vld [vmem:[#allocation3 + $0x20] sm:$0xff] }
 0x1a0   : > { %4261 = vmatmul.mubr.bf16.gmra.mrb[80].mxu0 %v2338_v27  ;;  %v2665_v27 = vor.u32 %v2664_v12, %v2660_v53  ;;  %v2644_v1 = vsel %vm2199_vm4, %v7192_v18, 0  ;;  %v3071_v13 = vsel %vm2198_vm3, %v7192_v18, 0  ;;  %vm8014_vm3 = vcmp.ne.s16.totalorder %v6497_v48, 0 }
 0x1a1   : > { %4268 = vmatprep.mubr.bf16.mxu0 %v2544_v2  ;;  %v2675_v14 = vshll.u32 %v2644_v1, 16  ;;  %v2359_v2 = vshll.u32 %v2230_v31, 16  ;;  %v2679_v59 = vshrl.u32 %v2644_v1, 16 }
 0x1a3   : > { %v2677_v56 = vrot.slane %v2675_v14, 1  ;;  %v2361_v0 = vrot.slane %v2359_v2, 1 }
 0x1a5   : > { %v2362_v12 = vsel %vm1518_vm8, %v2357_v63, %v2361_v0  ;;  %v2681_v40 = vor.u32 %v2679_v59, %v2677_v56  ;;  %v5893_v59 = vld [vmem:[#allocation5 + $0x218] sm:$0xff]  }
 0x1a6   : > { %4116 = vmatmul.mubr.bf16.gmra.mrb[56].mxu1 %v1804_v7  ;;  %v2823_v7 = vld [vmem:[#allocation3 + $0x10] sm:$0x80] }
 0x1a7   : > { %4123 = vmatprep.mubr.bf16.mxu1 %v7085_v51  ;;  %v2670_v51 = vsel %vm1518_vm8, %v2665_v27, %v2669_v44  ;;  %v2840_v25 = vsel %vm8005_vm9, %v2823_v7, 0  ;;  %v7235_v27 = vld [vmem:[#allocation3 + $0x38] sm:$0xff]  ;;  %v2865_v44 = vshll.u32 %v2841_v23, 16  ;;  %v8009_v7 = vld [vmem:[#allocation13_spill] sm:$0xff] }
 0x1a8   : > { %4269 = vmatmul.mubr.bf16.gmra.mrb[84].mxu0 %v2346_v4  ;;  %v7211_v4 = vld [vmem:[#allocation3 + $0x30] sm:$0xff]  ;;  %v2858_v53 = vshrl.u32 %v2840_v25, 16  ;;  %vm8010_vm9 = vcmp.ne.s16.totalorder %v8009_v7, 0  ;;  %v7268_v25 = vld [vmem:[#allocation3 + $0x88] sm:$0xff] }
 0x1a9   : > { %4276 = vmatprep.mubr.bf16.mxu0 %v2552_v46  ;;  %v2645_v46 = vsel %vm2200_vm6, %v7202_v10, 0  ;;  %v7224_v26 = vsel %vm8006_vm13, %v7211_v4, 0  ;;  %vm8008_vm13 = vcmp.ne.s16.totalorder %v6523_v58, 0  ;;  %v7255_v63 = vsel %vm8010_vm9, %v7202_v10, 0 }
 0x1aa   : > { %v2683_v33 = vshll.u32 %v2645_v46, 16  ;;  %v2691_v9 = vshll.u32 %v7224_v26, 16  ;;  %v2687_v31 = vshrl.u32 %v2645_v46, 16  ;;  %v7250_v2 = vsel %vm8008_vm13, %v7235_v27, 0 }
 0x1ab   : > { %v2860_v23 = vrot.slane %v2858_v53, 7  ;;  %v2867_v17 = vor.u32 %v2865_v44, %v2864_v38  ;;  %v2878_v39 = vshrl.u32 %v7255_v63, 16  ;;  %v2855_v43 = vsel %vm1661_vm7, %v7268_v25, 0 }
 0x1ac   : > { %v2685_v1 = vrot.slane %v2683_v33, 1  ;;  %v2699_v33 = vshll.u32 %v7250_v2, 16  ;;  %v7314_v34 = vsel %vm2200_vm6, %v7211_v4, 0  ;;  %vm8019_vm7 = vcmp.ne.s16.totalorder %v6706_v8, 0 }
 0x1ad   : > { %v3111_v52 = vshll.u32 %v7314_v34, 16  ;;  %vm8025_vm13 = vcmp.ne.s16.totalorder %v6729_v6, 0  ;;  %vm8026_vm9 = vcmp.ne.s16.totalorder %v6699_v55, 0 }
 0x1ae   : > { %4124 = vmatmul.mubr.bf16.gmra.mrb[60].mxu1 %v1812_v29  ;;  %v5891_v29 = vld [vmem:[#allocation5 + $0x208] sm:$0xff]   ;;  %v2686_v0 = vsel %vm1518_vm8, %v2681_v40, %v2685_v1  ;;  %v2881_v40 = vshll.u32 %v7255_v63, 16 }
 0x1af   : > { %4325 = vmatprep.mubr.bf16.mxu1 %v2670_v51 }
 0x1b0   : > { %4277 = vmatmul.mubr.bf16.gmra.mrb[88].mxu0 %v2354_v19  ;;  %v2842_v19 = vsel %vm1648_vm0, %v7192_v18, 0  ;;  %vm8007_vm0 = vcmp.ne.s16.totalorder %v6720_v28, 0  ;;  %v7259_v28 = vld [vmem:[#allocation3 + $0x80] sm:$0xff] }
 0x1b1   : > { %4284 = vmatprep.mubr.bf16.mxu0 %v2560_v60  ;;  %v2678_v60 = vsel %vm1518_vm8, %v2673_v16, %v2677_v56  ;;  %v2870_v30 = vshrl.u32 %v2842_v19, 16  ;;  %v7243_v51 = vsel %vm8007_vm0, %v7231_v5, 0  ;;  %v2873_v14 = vshll.u32 %v2842_v19, 16 }
 0x1b2   : > { %v7257_v56 = vrot.slane %v2691_v9, 1  ;;  %v2950_v24 = vshrl.u32 %v7243_v51, 16  ;;  %v2689_v19 = vor.u32 %v2687_v31, %v2685_v1  ;;  %v2695_v16 = vshrl.u32 %v7224_v26, 16  ;;  %v5894_v1 = vld [vmem:[#allocation5 + $0x220] sm:$0xff]  }
 0x1b3   : > { %v7245_v41 = vrot.slane %v2870_v30, 7  ;;  %v2854_v30 = vsel %vm1660_vm1, %v7259_v28, 0  ;;  %vm8022_vm1 = vcmp.ne.s16.totalorder %v6714_v57, 0 }
 0x1b4   : > { %v2966_v53 = vshrl.u32 %v2854_v30, 16  ;;  %v2969_v9 = vshll.u32 %v2854_v30, 16  ;;  %v7280_v44 = vrot.slane %v2950_v24, 7  ;;  %v7302_v30 = vld [vmem:[#allocation3] sm:$0xff] }
 0x1b5   : > { %v2875_v36 = vor.u32 %v2873_v14, %v7245_v41  ;;  %v7286_v14 = vrot.slane %v2878_v39, 7  ;;  %v5895_v39 = vld [vmem:[#allocation5 + $0x228] sm:$0xff]   ;;  %v2856_v11 = vsel %vm1662_vm2, %v7302_v30, 0  ;;  %vm8013_vm2 = vcmp.ne.s16.totalorder %v6533_v62, 0 }
 0x1b6   : > { %4326 = vmatmul.mubr.bf16.vlgmr.msra.gmra.mrb[64].mxu1 %v2625_v45  ;;  %v7237_v45 = vld [vmem:[#allocation3 + $0x78] sm:$0xff]  ;;  %v2968_v7 = vrot.slane %v2966_v53, 7 }
 0x1b7   : > { %5699 = vmatpush3.bf16.msra.mxu1 %v5899_v47  ;;  %4333 = vmatprep.mubr.bf16.mxu1 %v2678_v60  ;;  %v2853_v46 = vsel %vm1659_vm12, %v7237_v45, 0  ;;  %v2868_v47 = vsel %vm1680_vm11, %v2860_v23, %v2867_v17  ;;  %v2977_v23 = vshll.u32 %v2855_v43, 16  ;;  %v2876_v17 = vsel %vm1680_vm11, %v2864_v38, %v2875_v36 }
 0x1b8   : > { %4285 = vmatmul.mubr.bf16.gmra.mrb[92].mxu0 %v2362_v12  ;;  %5700 = vmatprep.subr.bf16.mxu1 %v5891_v29  ;;  %v2958_v32 = vshrl.u32 %v2853_v46, 16  ;;  %v2694_v12 = vsel %vm1518_vm8, %v2689_v19, %v7257_v56  ;;  %v3095_v38 = vshll.u32 %v3071_v13, 16  ;;  %v3072_v36 = vsel %vm2199_vm4, %v7202_v10, 0 }
 0x1b9   : > { %4486 = vmatprep.mubr.bf16.mxu0 %v7186_v22 }
 0x1ba   : > { %v2960_v60 = vrot.slane %v2958_v32, 7  ;;  %v3097_v53 = vrot.slane %v3095_v38, 1  ;;  %v7335_v38 = vrot.slane %v3111_v52, 1 }
 0x1bb   : > { %5701 = vmatpush3.bf16.msra.mxu1 %v5891_v29  ;;  %v2961_v29 = vshll.u32 %v2853_v46, 16  ;;  %v3070_v46 = vsel %vm2197_vm14, %v7186_v22, 0 }
 0x1bc   : > { %5702 = vmatprep.subr.bf16.mxu1 %v5892_v21  ;;  %v3088_v32 = vshrl.u32 %v3070_v46, 16  ;;  %v3090_v19 = vshll.u32 %v3070_v46, 16  ;;  %v5896_v46 = vld [vmem:[#allocation5 + $0x230] sm:$0xff]  }
 0x1bd   : > { %v2963_v31 = vor.u32 %v2961_v29, %v2960_v60  ;;  %v3099_v29 = vshrl.u32 %v3071_v13, 16 }
 0x1be   : > { %4334 = vmatmul.mubr.bf16.gmra.mrb[68].mxu1 %v7186_v22 }
 0x1bf   : > { %4341 = vmatprep.mubr.bf16.mxu1 %v2686_v0  ;;  %5703 = vmatpush3.bf16.msra.mxu1 %v5892_v21  ;;  %v2974_v21 = vshrl.u32 %v2855_v43, 16  ;;  %v7291_v63 = vsel %vm1680_vm11, %v7280_v44, %v2963_v31  ;;  %v2971_v0 = vor.u32 %v2969_v9, %v2968_v7  ;;  %v2982_v9 = vshrl.u32 %v2856_v11, 16 }
 0x1c0   : > { %4487 = vmatmul.mubr.bf16.vlgmr.msra.gmra.mrb[96].mxu0 %v2868_v47  ;;  %5704 = vmatprep.subr.bf16.mxu1 %v5893_v59  ;;  %v3103_v47 = vshll.u32 %v3072_v36, 16  ;;  %v2985_v31 = vshll.u32 %v2856_v11, 16  ;;  %v3101_v13 = vor.u32 %v3099_v29, %v3097_v53  ;;  %v2883_v29 = vor.u32 %v2881_v40, %v7286_v14 }
 0x1c1   : > { %4494 = vmatprep.mubr.bf16.mxu0 %v7192_v18  ;;  %v2976_v24 = vrot.slane %v2974_v21, 7  ;;  %v7308_v15 = vsel %vm1680_vm11, %v2960_v60, %v2971_v0  ;;  %v3107_v21 = vshrl.u32 %v3072_v36, 16  ;;  %v2984_v0 = vrot.slane %v2982_v9, 7 }
 0x1c2   : > { %v3105_v43 = vrot.slane %v3103_v47, 1 }
 0x1c3   : > { %5705 = vmatpush3.bf16.msra.mxu1 %v5893_v59  ;;  %v2979_v22 = vor.u32 %v2977_v23, %v2976_v24  ;;  %v3092_v59 = vrot.slane %v3090_v19, 1  ;;  %v8011_v23 = vld [vmem:[#allocation14_spill] sm:$0xff] }
 0x1c4   : > { %5706 = vmatprep.subr.bf16.mxu1 %v5894_v1  ;;  %vm8012_vm14 = vcmp.ne.s16.totalorder %v8011_v23, 0  ;;  %v3109_v19 = vor.u32 %v3107_v21, %v3105_v43 }
 0x1c5   : > { %v7317_v50 = vsel %vm1680_vm11, %v2968_v7, %v2979_v22  ;;  %v3093_v60 = vor.u32 %v3092_v59, %v3088_v32  ;;  %v7330_v7 = vld [vmem:[#allocation3 + $0x40] sm:$0xff]  ;;  %v2987_v32 = vor.u32 %v2985_v31, %v2984_v0  ;;  %v2703_v59 = vshrl.u32 %v7250_v2, 16  ;;  %v7359_v31 = vld [vmem:[#allocation3 + $0x48] sm:$0xff] }
 0x1c6   : > { %4342 = vmatmul.mubr.bf16.gmra.mrb[72].mxu1 %v7192_v18  ;;  %v2844_v18 = vsel %vm8012_vm14, %v7211_v4, 0  ;;  %v2648_v36 = vsel %vm8013_vm2, %v7330_v7, 0  ;;  %v7348_v22 = vsel %vm1518_vm8, %v3109_v19, %v7335_v38  ;;  %v8017_v0 = vld [vmem:[#allocation16_spill] sm:$0xff]  ;;  %vm8027_vm14 = vcmp.ne.s16.totalorder %v6754_v42, 0 }
 0x1c7   : > { %4349 = vmatprep.mubr.bf16.mxu1 %v2694_v12  ;;  %5707 = vmatpush3.bf16.msra.mxu1 %v5894_v1  ;;  %v2697_v12 = vor.u32 %v2695_v16, %v7257_v56  ;;  %v7328_v1 = vsel %vm1518_vm8, %v3093_v60, %v3097_v53  ;;  %v2886_v26 = vshrl.u32 %v2844_v18, 16  ;;  %v2701_v56 = vrot.slane %v2699_v33, 1  ;;  %v5897_v16 = vld [vmem:[#allocation5 + $0x238] sm:$0xff]  }
 0x1c8   : > { %4495 = vmatmul.mubr.bf16.gmra.mrb[100].mxu0 %v2876_v17  ;;  %5708 = vmatprep.subr.bf16.mxu1 %v5895_v39  ;;  %v7333_v17 = vsel %vm1518_vm8, %v3101_v13, %v3105_v43  ;;  %v7344_v11 = vsel %vm1680_vm11, %v2976_v24, %v2987_v32  ;;  %v2707_v47 = vshll.u32 %v2648_v36, 16  ;;  %v2884_v33 = vsel %vm1680_vm11, %v7245_v41, %v2883_v29  ;;  %v8015_v41 = vld [vmem:[#allocation19_spill] sm:$0xff]  ;;  %v7372_v32 = vld [vmem:[#allocation3 + $0x50] sm:$0xff] }
 0x1c9   : > { %4502 = vmatprep.mubr.bf16.mxu0 %v7202_v10  ;;  %v2702_v40 = vsel %vm1518_vm8, %v2697_v12, %v2701_v56  ;;  %v2889_v53 = vshll.u32 %v2844_v18, 16  ;;  %v2845_v24 = vsel %vm8014_vm3, %v7235_v27, 0  ;;  %vm8016_vm4 = vcmp.ne.s16.totalorder %v8015_v41, 0 }
 0x1ca   : > { %v2709_v9 = vrot.slane %v2707_v47, 1  ;;  %v2894_v60 = vshrl.u32 %v2845_v24, 16  ;;  %v2649_v43 = vsel %vm8016_vm4, %v7359_v31, 0  ;;  %v2711_v48 = vshrl.u32 %v2648_v36, 16  ;;  %v8020_v47 = vld [vmem:[#allocation17_spill] sm:$0xff] }
 0x1cb   : > { %5709 = vmatpush3.bf16.msra.mxu1 %v5895_v39  ;;  %v2888_v39 = vrot.slane %v2886_v26, 7  ;;  %v2715_v13 = vshll.u32 %v2649_v43, 16  ;;  %vm8018_vm6 = vcmp.ne.s16.totalorder %v8017_v0, 0  ;;  %v2650_v19 = vsel %vm8019_vm7, %v7372_v32, 0 }
 0x1cc   : > { %5710 = vmatprep.subr.bf16.mxu1 %v5896_v46  ;;  %v2896_v18 = vrot.slane %v2894_v60, 7  ;;  %v2846_v52 = vsel %vm8018_vm6, %v7330_v7, 0  ;;  %v2713_v12 = vor.u32 %v2711_v48, %v2709_v9  ;;  %v2719_v26 = vshrl.u32 %v2649_v43, 16 }
 0x1cd   : > { %v2891_v2 = vor.u32 %v2889_v53, %v2888_v39  ;;  %v2902_v29 = vshrl.u32 %v2846_v52, 16  ;;  %vm8021_vm12 = vcmp.ne.s16.totalorder %v8020_v47, 0  ;;  %v2727_v43 = vshrl.u32 %v2650_v19, 16 }
 0x1ce   : > { %4350 = vmatmul.mubr.bf16.gmra.mrb[76].mxu1 %v7202_v10  ;;  %v2705_v10 = vor.u32 %v2703_v59, %v2701_v56  ;;  %v2723_v56 = vshll.u32 %v2650_v19, 16  ;;  %v2905_v59 = vshll.u32 %v2846_v52, 16  ;;  %vm8028_vm2 = vcmp.ne.s16.totalorder %v6709_v20, 0 }
 0x1cf   : > { %4357 = vmatprep.mubr.bf16.mxu1 %v2702_v40  ;;  %5711 = vmatpush3.bf16.msra.mxu1 %v5896_v46  ;;  %v2892_v23 = vsel %vm1680_vm11, %v7286_v14, %v2891_v2  ;;  %v2897_v46 = vshll.u32 %v2845_v24, 16  ;;  %v2717_v14 = vrot.slane %v2715_v13, 1  ;;  %v2904_v40 = vrot.slane %v2902_v29, 7  ;;  %v8023_v13 = vld [vmem:[#allocation18_spill] sm:$0xff] }
 0x1d0   : > { %4503 = vmatmul.mubr.bf16.gmra.mrb[104].mxu0 %v2884_v33  ;;  %5712 = vmatprep.subr.bf16.mxu1 %v5897_v16  ;;  %v2710_v21 = vsel %vm1518_vm8, %v2705_v10, %v2709_v9  ;;  %v2847_v33 = vsel %vm8021_vm12, %v7359_v31, 0  ;;  %v2725_v24 = vrot.slane %v2723_v56, 1  ;;  %v7384_v10 = vld [vmem:[#allocation3 + $0x58] sm:$0xff]  ;;  %vm8024_vm0 = vcmp.ne.s16.totalorder %v8023_v13, 0 }
 0x1d1   : > { %4510 = vmatprep.mubr.bf16.mxu0 %v7211_v4  ;;  %v2718_v36 = vsel %vm1518_vm8, %v2713_v12, %v2717_v14  ;;  %v2721_v53 = vor.u32 %v2719_v26, %v2717_v14  ;;  %v2907_v9 = vor.u32 %v2905_v59, %v2904_v40  ;;  %v2910_v2 = vshrl.u32 %v2847_v33, 16  ;;  %v7396_v12 = vld [vmem:[#allocation3 + $0x60] sm:$0xff] }
 0x1d2   : > { %v2651_v60 = vsel %vm8022_vm1, %v7384_v10, 0  ;;  %v2848_v0 = vsel %vm8024_vm0, %v7372_v32, 0  ;;  %v2729_v52 = vor.u32 %v2727_v43, %v2725_v24  ;;  %v2652_v19 = vsel %vm8025_vm13, %v7396_v12, 0 }
 0x1d3   : > { %5713 = vmatpush3.bf16.msra.mxu1 %v5897_v16  ;;  %v2912_v48 = vrot.slane %v2910_v2, 7  ;;  %v2918_v29 = vshrl.u32 %v2848_v0, 16  ;;  %v2739_v26 = vshll.u32 %v2652_v19, 16  ;;  %v2921_v59 = vshll.u32 %v2848_v0, 16 }
 0x1d4   : > { %v2849_v47 = vsel %vm8026_vm9, %v7384_v10, 0  ;;  %vm8029_vm3 = vcmp.ne.s16.totalorder %v6717_v3, 0  ;;  %vm8034_vm6 = vcmp.ne.s16.totalorder %v6743_v61, 0  ;;  %vm8036_vm7 = vcmp.ne.s16.totalorder %v6523_v58, 0 }
 0x1d5   : > { %v2926_v2 = vshrl.u32 %v2849_v47, 16  ;;  %vm8037_vm12 = vcmp.ne.s16.totalorder %v6533_v62, 0  ;;  %vm8038_vm1 = vcmp.ne.s16.totalorder %v8015_v41, 0  ;;  %vm8039_vm0 = vcmp.ne.s16.totalorder %v6706_v8, 0 }
 0x1d6   : > { %4358 = vmatmul.mubr.bf16.gmra.mrb[80].mxu1 %v7211_v4  ;;  %v2899_v4 = vor.u32 %v2897_v46, %v2896_v18  ;;  %v2731_v46 = vshll.u32 %v2651_v60, 16  ;;  %v3076_v58 = vsel %vm8037_vm12, %v7359_v31, 0  ;;  %v3078_v41 = vsel %vm8039_vm0, %v7384_v10, 0 }
 0x1d7   : > { %4365 = vmatprep.mubr.bf16.mxu1 %v2710_v21  ;;  %v2908_v21 = vsel %vm1680_vm11, %v2896_v18, %v2907_v9  ;;  %v2928_v43 = vrot.slane %v2926_v2, 7  ;;  %vm8040_vm13 = vcmp.ne.s16.totalorder %v6714_v57, 0  ;;  %vm8041_vm9 = vcmp.ne.s16.totalorder %v6729_v6, 0 }
 0x1d8   : > { %4511 = vmatmul.mubr.bf16.gmra.mrb[108].mxu0 %v2892_v23  ;;  %v2900_v16 = vsel %vm1680_vm11, %v2888_v39, %v2899_v4  ;;  %v2726_v39 = vsel %vm1518_vm8, %v2721_v53, %v2725_v24  ;;  %v2913_v23 = vshll.u32 %v2847_v33, 16  ;;  %v2733_v18 = vrot.slane %v2731_v46, 1  ;;  %v7408_v24 = vld [vmem:[#allocation3 + $0x68] sm:$0xff] }
 0x1d9   : > { %4518 = vmatprep.mubr.bf16.mxu0 %v7235_v27  ;;  %v2741_v53 = vrot.slane %v2739_v26, 1  ;;  %v2850_v46 = vsel %vm8028_vm2, %v7396_v12, 0  ;;  %v2851_v26 = vsel %vm8029_vm3, %v7408_v24, 0  ;;  %v3080_v57 = vsel %vm8041_vm9, %v7408_v24, 0 }
 0x1da   : > { %v2915_v4 = vor.u32 %v2913_v23, %v2912_v48  ;;  %v2734_v14 = vsel %vm1518_vm8, %v2729_v52, %v2733_v18  ;;  %v2654_v52 = vsel %vm2209_vm5, %v7231_v5, 0  ;;  %v3082_v42 = vsel %vm2209_vm5, %v7237_v45, 0  ;;  %vm8043_vm5 = vmmov %vm8034_vm6 }
 0x1db   : > { %v2759_v2 = vshrl.u32 %v2654_v52, 16 }
 0x1dc   : > { %v2916_v56 = vsel %vm1680_vm11, %v2904_v40, %v2915_v4  ;;  %v2934_v4 = vshrl.u32 %v2850_v46, 16 }
 0x1de   : > { %4366 = vmatmul.mubr.bf16.gmra.mrb[84].mxu1 %v7235_v27 }
 0x1df   : > { %4373 = vmatprep.mubr.bf16.mxu1 %v2718_v36  ;;  %v2735_v36 = vshrl.u32 %v2651_v60, 16  ;;  %v2653_v60 = vsel %vm8027_vm14, %v7408_v24, 0 }
 0x1e0   : > { %4519 = vmatmul.mubr.bf16.gmra.mrb[112].mxu0 %v2900_v16  ;;  %v2920_v16 = vrot.slane %v2918_v29, 7  ;;  %v2747_v23 = vshll.u32 %v2653_v60, 16  ;;  %v2751_v29 = vshrl.u32 %v2653_v60, 16 }
 0x1e1   : > { %4526 = vmatprep.mubr.bf16.mxu0 %v7330_v7  ;;  %v2737_v33 = vor.u32 %v2735_v36, %v2733_v18  ;;  %v2755_v18 = vshll.u32 %v2654_v52, 16  ;;  %v2937_v36 = vshll.u32 %v2850_v46, 16  ;;  %v2656_v46 = vsel %vm2211_vm15, %v7259_v28, 0 }
 0x1e2   : > { %v2923_v9 = vor.u32 %v2921_v59, %v2920_v16 }
 0x1e3   : > { %v2742_v40 = vsel %vm1518_vm8, %v2737_v33, %v2741_v53  ;;  %v2757_v59 = vrot.slane %v2755_v18, 1  ;;  %v2942_v33 = vshrl.u32 %v2851_v26, 16 }
 0x1e4   : > { %v2924_v55 = vsel %vm1680_vm11, %v2912_v48, %v2923_v9  ;;  %v2655_v9 = vsel %vm2210_vm10, %v7237_v45, 0 }
 0x1e5   : > { %v2944_v3 = vrot.slane %v2942_v33, 7  ;;  %v2767_v52 = vshrl.u32 %v2655_v9, 16 }
 0x1e6   : > { %4374 = vmatmul.mubr.bf16.gmra.mrb[88].mxu1 %v7330_v7 }
 0x1e7   : > { %4381 = vmatprep.mubr.bf16.mxu1 %v2726_v39  ;;  %v2743_v39 = vshrl.u32 %v2652_v19, 16  ;;  %v2749_v19 = vrot.slane %v2747_v23, 1 }
 0x1e8   : > { %4527 = vmatmul.mubr.bf16.gmra.mrb[116].mxu0 %v2908_v21  ;;  %v2929_v21 = vshll.u32 %v2849_v47, 16 }
 0x1e9   : > { %4534 = vmatprep.mubr.bf16.mxu0 %v7359_v31  ;;  %v2745_v13 = vor.u32 %v2743_v39, %v2741_v53  ;;  %v2763_v39 = vshll.u32 %v2655_v9, 16 }
 0x1ea   : > { %v2931_v0 = vor.u32 %v2929_v21, %v2928_v43 }
 0x1eb   : > { %v2750_v48 = vsel %vm1518_vm8, %v2745_v13, %v2749_v19  ;;  %v2765_v13 = vrot.slane %v2763_v39, 1  ;;  %v2775_v39 = vshrl.u32 %v2656_v46, 16 }
 0x1ec   : > { %v2932_v20 = vsel %vm1680_vm11, %v2920_v16, %v2931_v0 }
 0x1ed   : > { %v2769_v18 = vor.u32 %v2767_v52, %v2765_v13 }
 0x1ee   : > { %4382 = vmatmul.mubr.bf16.gmra.mrb[92].mxu1 %v7359_v31 }
 0x1ef   : > { %4389 = vmatprep.mubr.bf16.mxu1 %v2734_v14  ;;  %v2936_v14 = vrot.slane %v2934_v4, 7  ;;  %v2771_v4 = vshll.u32 %v2656_v46, 16 }
 0x1f0   : > { %4535 = vmatmul.mubr.bf16.gmra.mrb[120].mxu0 %v2916_v56  ;;  %v2753_v56 = vor.u32 %v2751_v29, %v2749_v19  ;;  %v2953_v19 = vshll.u32 %v7243_v51, 16 }
 0x1f1   : > { %4542 = vmatprep.mubr.bf16.mxu0 %v7372_v32  ;;  %v2939_v47 = vor.u32 %v2937_v36, %v2936_v14 }
 0x1f2   : > { %v2758_v16 = vsel %vm1518_vm8, %v2753_v56, %v2757_v59 }
 0x1f3   : > { %v2940_v60 = vsel %vm1680_vm11, %v2928_v43, %v2939_v47 }
 0x1f6   : > { %4390 = vmatmul.mubr.bf16.gmra.mrb[96].mxu1 %v7372_v32 }
 0x1f7   : > { %4397 = vmatprep.mubr.bf16.mxu1 %v2742_v40  ;;  %v2945_v40 = vshll.u32 %v2851_v26, 16 }
 0x1f8   : > { %4543 = vmatmul.mubr.bf16.gmra.mrb[124].mxu0 %v2924_v55  ;;  %v2761_v55 = vor.u32 %v2759_v2, %v2757_v59  ;;  %v2955_v59 = vor.u32 %v2953_v19, %v7280_v44 }
 0x1f9   : > { %4550 = vmatprep.mubr.bf16.mxu0 %v7384_v10  ;;  %v2947_v21 = vor.u32 %v2945_v40, %v2944_v3 }
 0x1fa   : > { %v2766_v0 = vsel %vm1518_vm8, %v2761_v55, %v2765_v13  ;;  %v2956_v44 = vsel %vm1680_vm11, %v2944_v3, %v2955_v59 }
 0x1fb   : > { %v2948_v43 = vsel %vm1680_vm11, %v2936_v14, %v2947_v21  ;;  %v8032_v14 = vld [vmem:[#allocation22_spill] sm:$0xff]  ;;  %vm8035_vm11 = vcmp.ne.s16.totalorder %v6501_v49, 0 }
 0x1fc   : > { %vm8033_vm4 = vcmp.ne.s16.totalorder %v8032_v14, 0 }
 0x1fd   : > { %v2657_v51 = vsel %vm8033_vm4, %v7268_v25, 0 }
 0x1fe   : > { %4398 = vmatmul.mubr.bf16.gmra.mrb[100].mxu1 %v7384_v10  ;;  %v2779_v13 = vshll.u32 %v2657_v51, 16 }
 0x1ff   : > { %4405 = vmatprep.mubr.bf16.mxu1 %v2750_v48 }
 0x200   : > { %4551 = vmatmul.mubr.bf16.gmra.mrb[128].mxu0 %v2932_v20  ;;  %v2773_v20 = vrot.slane %v2771_v4, 1  ;;  %v2781_v3 = vrot.slane %v2779_v13, 1 }
 0x201   : > { %4558 = vmatprep.mubr.bf16.mxu0 %v7396_v12 }
 0x202   : > { %v2774_v40 = vsel %vm1518_vm8, %v2769_v18, %v2773_v20  ;;  %v2777_v19 = vor.u32 %v2775_v39, %v2773_v20 }
 0x206   : > { %4406 = vmatmul.mubr.bf16.gmra.mrb[104].mxu1 %v7396_v12 }
 0x207   : > { %4413 = vmatprep.mubr.bf16.mxu1 %v2758_v16 }
 0x208   : > { %4559 = vmatmul.mubr.bf16.gmra.mrb[132].mxu0 %v2940_v60 }
 0x209   : > { %4566 = vmatprep.mubr.bf16.mxu0 %v7408_v24 }
 0x20e   : > { %4414 = vmatmul.mubr.bf16.gmra.mrb[108].mxu1 %v7408_v24 }
 0x20f   : > { %4421 = vmatprep.mubr.bf16.mxu1 %v2766_v0  ;;  %v2641_v0 = vld [vmem:[#allocation3 + $0x90] sm:$0x1] }
 0x210   : > { %4567 = vmatmul.mubr.bf16.gmra.mrb[136].mxu0 %v2948_v43 }
 0x211   : > { %4574 = vmatprep.mubr.bf16.mxu0 %v7231_v5  ;;  %v5200_v48 = vpop.f32.mrb[4].mxu1 }
 0x212   : > { %v5201_v29 = vpop.f32.mrb[5].mxu1 }
 0x213   : > { %v5202_v36 = vadd.f32 %v5201_v29, %v5200_v48  ;;  %v5306_v26 = vpop.f32.mrb[32].mxu0  ;;  %v5203_v56 = vpop.f32.mrb[6].mxu1 }
 0x214   : > { %v5307_v47 = vpop.f32.mrb[33].mxu0  ;;  %v5204_v33 = vpop.f32.mrb[7].mxu1 }
 0x215   : > { %v5308_v9 = vadd.f32 %v5307_v47, %v5306_v26  ;;  %v5205_v16 = vadd.f32 %v5204_v33, %v5203_v56  ;;  %v5309_v2 = vpop.f32.mrb[34].mxu0 }
 0x216   : > { %v5310_v60 = vpop.f32.mrb[35].mxu0  ;;  %4422 = vmatmul.mubr.bf16.gmra.mrb[112].mxu1 %v7231_v5 }
 0x217   : > { %v7452_v55 = vadd.f32 %v5308_v9, %v7206_v54  ;;  %v5311_v21 = vadd.f32 %v5310_v60, %v5309_v2  ;;  %4429 = vmatprep.mubr.bf16.mxu1 %v2774_v40  ;;  %v2658_v54 = vsel %vm8034_vm6, %v2641_v0, 0  ;;  %v2783_v9 = vshrl.u32 %v2657_v51, 16 }
 0x218   : > { %4575 = vmatmul.mubr.bf16.gmra.mrb[140].mxu0 %v2956_v44  ;;  %v2787_v2 = vshll.u32 %v2658_v54, 16 }
 0x219   : > { %v7456_v52 = vadd.f32 %v5311_v21, %v7228_v37  ;;  %4582 = vmatprep.mubr.bf16.mxu0 %v7237_v45  ;;  %v5206_v4 = vpop.f32.mrb[8].mxu1  ;;  %v2782_v37 = vsel %vm1518_vm8, %v2777_v19, %v2781_v3  ;;  %v2785_v44 = vor.u32 %v2783_v9, %v2781_v3 }
 0x21a   : > { %v5207_v43 = vpop.f32.mrb[9].mxu1  ;;  %v2789_v13 = vrot.slane %v2787_v2, 1 }
 0x21b   : > { %v5208_v48 = vadd.f32 %v5207_v43, %v5206_v4  ;;  %v5312_v46 = vpop.f32.mrb[36].mxu0  ;;  %v5209_v29 = vpop.f32.mrb[10].mxu1 }
 0x21c   : > { %v5313_v18 = vpop.f32.mrb[37].mxu0  ;;  %v5210_v26 = vpop.f32.mrb[11].mxu1 }
 0x21d   : > { %v5314_v56 = vadd.f32 %v5313_v18, %v5312_v46  ;;  %v5211_v59 = vadd.f32 %v5210_v26, %v5209_v29  ;;  %v5315_v47 = vpop.f32.mrb[38].mxu0 }
 0x21e   : > { %v5316_v33 = vpop.f32.mrb[39].mxu0  ;;  %4430 = vmatmul.mubr.bf16.gmra.mrb[116].mxu1 %v7237_v45 }
 0x21f   : > { %v7463_v20 = vadd.f32 %v5314_v56, %v5202_v36  ;;  %v5317_v60 = vadd.f32 %v5316_v33, %v5315_v47  ;;  %4437 = vmatprep.mubr.bf16.mxu1 %v2782_v37 }
 0x220   : > { %4583 = vmatmul.mubr.bf16.gmra.mrb[144].mxu0 %v7291_v63  ;;  %v2790_v63 = vsel %vm1518_vm8, %v2785_v44, %v2789_v13 }
 0x221   : > { %v7466_v40 = vadd.f32 %v5317_v60, %v5205_v16  ;;  %4590 = vmatprep.mubr.bf16.mxu0 %v7259_v28  ;;  %v5212_v39 = vpop.f32.mrb[12].mxu1 }
 0x222   : > { %v5213_v21 = vpop.f32.mrb[13].mxu1 }
 0x223   : > { %v5214_v0 = vadd.f32 %v5213_v21, %v5212_v39  ;;  %v5318_v4 = vpop.f32.mrb[40].mxu0  ;;  %v5215_v43 = vpop.f32.mrb[14].mxu1 }
 0x224   : > { %v5319_v19 = vpop.f32.mrb[41].mxu0  ;;  %v5216_v51 = vpop.f32.mrb[15].mxu1 }
 0x225   : > { %v5320_v46 = vadd.f32 %v5319_v19, %v5318_v4  ;;  %v5217_v36 = vadd.f32 %v5216_v51, %v5215_v43  ;;  %v5321_v29 = vpop.f32.mrb[42].mxu0 }
 0x226   : > { %v5322_v54 = vpop.f32.mrb[43].mxu0  ;;  %4438 = vmatmul.mubr.bf16.gmra.mrb[120].mxu1 %v7259_v28 }
 0x227   : > { %v7471_v16 = vadd.f32 %v5320_v46, %v5208_v48  ;;  %v5323_v18 = vadd.f32 %v5322_v54, %v5321_v29  ;;  %4445 = vmatprep.mubr.bf16.mxu1 %v2790_v63 }
 0x228   : > { %4591 = vmatmul.mubr.bf16.gmra.mrb[148].mxu0 %v7308_v15 }
 0x229   : > { %v7474_v26 = vadd.f32 %v5323_v18, %v5211_v59  ;;  %4598 = vmatprep.mubr.bf16.mxu0 %v7268_v25  ;;  %v5218_v3 = vpop.f32.mrb[16].mxu1  ;;  %v3074_v59 = vsel %vm8035_vm11, %v7235_v27, 0 }
 0x22a   : > { %v5219_v56 = vpop.f32.mrb[17].mxu1  ;;  %v3119_v19 = vshll.u32 %v3074_v59, 16 }
 0x22b   : > { %v5220_v47 = vadd.f32 %v5219_v56, %v5218_v3  ;;  %v5324_v33 = vpop.f32.mrb[44].mxu0  ;;  %v5221_v37 = vpop.f32.mrb[18].mxu1  ;;  %v3123_v3 = vshrl.u32 %v3074_v59, 16 }
 0x22c   : > { %v5325_v9 = vpop.f32.mrb[45].mxu0  ;;  %v5222_v2 = vpop.f32.mrb[19].mxu1  ;;  %v3121_v18 = vrot.slane %v3119_v19, 1 }
 0x22d   : > { %v5326_v60 = vadd.f32 %v5325_v9, %v5324_v33  ;;  %v5223_v39 = vadd.f32 %v5222_v2, %v5221_v37  ;;  %v5327_v21 = vpop.f32.mrb[46].mxu0 }
 0x22e   : > { %v5328_v48 = vpop.f32.mrb[47].mxu0  ;;  %4446 = vmatmul.mubr.bf16.gmra.mrb[124].mxu1 %v7268_v25  ;;  %v3125_v2 = vor.u32 %v3123_v3, %v3121_v18  ;;  %v3151_v3 = vshll.u32 %v3078_v41, 16 }
 0x22f   : > { %v7478_v44 = vadd.f32 %v5326_v60, %v5214_v0  ;;  %v5329_v15 = vadd.f32 %v5328_v48, %v5327_v21  ;;  %5714 = vmatprep.mubr.bf16.mxu1 %v7328_v1  ;;  %v3075_v1 = vsel %vm8036_vm7, %v7330_v7, 0  ;;  %v3135_v21 = vshll.u32 %v3076_v58, 16 }
 0x230   : > { %4599 = vmatmul.mubr.bf16.gmra.mrb[152].mxu0 %v7317_v50  ;;  %v3115_v50 = vshrl.u32 %v7314_v34, 16  ;;  %v3127_v56 = vshll.u32 %v3075_v1, 16 }
 0x231   : > { %v7485_v13 = vadd.f32 %v5329_v15, %v5217_v36  ;;  %v5224_v4 = vpop.f32.mrb[20].mxu1  ;;  %4606 = vmatprep.mubr.bf16.mxu0 %v7302_v30 }
 0x232   : > { %v5225_v43 = vpop.f32.mrb[21].mxu1  ;;  %v3117_v9 = vor.u32 %v3115_v50, %v7335_v38  ;;  %v3129_v60 = vrot.slane %v3127_v56, 1 }
 0x233   : > { %v5226_v51 = vadd.f32 %v5225_v43, %v5224_v4  ;;  %v5330_v46 = vpop.f32.mrb[48].mxu0  ;;  %v5227_v0 = vpop.f32.mrb[22].mxu1  ;;  %v3131_v43 = vshrl.u32 %v3075_v1, 16 }
 0x234   : > { %v5331_v29 = vpop.f32.mrb[49].mxu0  ;;  %v5228_v54 = vpop.f32.mrb[23].mxu1  ;;  %v3122_v4 = vsel %vm1518_vm8, %v3117_v9, %v3121_v18  ;;  %v3130_v19 = vsel %vm1518_vm8, %v3125_v2, %v3129_v60 }
 0x235   : > { %v5332_v49 = vadd.f32 %v5331_v29, %v5330_v46  ;;  %v5229_v27 = vadd.f32 %v5228_v54, %v5227_v0  ;;  %v5333_v63 = vpop.f32.mrb[50].mxu0  ;;  %v3137_v46 = vrot.slane %v3135_v21, 1  ;;  %v3139_v0 = vshrl.u32 %v3076_v58, 16 }
 0x236   : > { %v5334_v36 = vpop.f32.mrb[51].mxu0  ;;  %5715 = vmatmul.mubr.bf16.vlgmr.msra.gmra.mrb[128].mxu1 %v7333_v17  ;;  %v3133_v50 = vor.u32 %v3131_v43, %v3129_v60 }
 0x237   : > { %v7493_v33 = vadd.f32 %v5332_v49, %v5220_v47  ;;  %v5335_v37 = vadd.f32 %v5334_v36, %v5333_v63  ;;  %5718 = vmatprep.mubr.bf16.mxu1 %v7348_v22  ;;  %v3077_v22 = vsel %vm8038_vm1, %v7372_v32, 0  ;;  %v3141_v36 = vor.u32 %v3139_v0, %v3137_v46 }
 0x238   : > { %4607 = vmatmul.mubr.bf16.gmra.mrb[156].mxu0 %v7344_v11  ;;  %v3143_v29 = vshll.u32 %v3077_v22, 16  ;;  %v3147_v2 = vshrl.u32 %v3077_v22, 16 }
 0x239   : > { %v7500_v7 = vadd.f32 %v5335_v37, %v5223_v39  ;;  %v5230_v34 = vpop.f32.mrb[24].mxu1 }
 0x23a   : > { %v5231_v17 = vpop.f32.mrb[25].mxu1  ;;  %v3145_v18 = vrot.slane %v3143_v29, 1 }
 0x23b   : > { %v5232_v47 = vadd.f32 %v5231_v17, %v5230_v34  ;;  %v5336_v48 = vpop.f32.mrb[52].mxu0  ;;  %v5233_v15 = vpop.f32.mrb[26].mxu1 }
 0x23c   : > { %v5337_v62 = vpop.f32.mrb[53].mxu0  ;;  %v5234_v31 = vpop.f32.mrb[27].mxu1  ;;  %v3146_v21 = vsel %vm1518_vm8, %v3141_v36, %v3145_v18 }
 0x23d   : > { %v5338_v59 = vadd.f32 %v5337_v62, %v5336_v48  ;;  %v5235_v11 = vadd.f32 %v5234_v31, %v5233_v15  ;;  %v5339_v39 = vpop.f32.mrb[54].mxu0  ;;  %v3153_v48 = vrot.slane %v3151_v3, 1  ;;  %v3155_v15 = vshrl.u32 %v3078_v41, 16 }
 0x23e   : > { %v5340_v38 = vpop.f32.mrb[55].mxu0  ;;  %5719 = vmatmul.mubr.bf16.gmra.mrb[132].mxu1 %v3122_v4  ;;  %v3149_v4 = vor.u32 %v3147_v2, %v3145_v18  ;;  %v3171_v3 = vshrl.u32 %v3080_v57, 16  ;;  %v3183_v2 = vshll.u32 %v3082_v42, 16 }
 0x23f   : > { %v7508_v54 = vadd.f32 %v5338_v59, %v5226_v51  ;;  %v5341_v49 = vadd.f32 %v5340_v38, %v5339_v39  ;;  %5722 = vmatprep.mubr.bf16.mxu1 %v3130_v19  ;;  %v3079_v51 = vsel %vm8040_vm13, %v7396_v12, 0  ;;  %v3157_v43 = vor.u32 %v3155_v15, %v3153_v48 }
 0x240   : > { %v3159_v62 = vshll.u32 %v3079_v51, 16  ;;  %v3167_v19 = vshll.u32 %v3080_v57, 16 }
 0x241   : > { %v7513_v32 = vadd.f32 %v5341_v49, %v5229_v27  ;;  %v5236_v63 = vpop.f32.mrb[28].mxu1  ;;  %v3138_v27 = vsel %vm1518_vm8, %v3133_v50, %v3137_v46  ;;  %v3163_v50 = vshrl.u32 %v3079_v51, 16 }
 0x242   : > { %v5237_v1 = vpop.f32.mrb[29].mxu1  ;;  %v3161_v38 = vrot.slane %v3159_v62, 1  ;;  %v3169_v18 = vrot.slane %v3167_v19, 1 }
 0x243   : > { %v5238_v56 = vadd.f32 %v5237_v1, %v5236_v63  ;;  %v5342_v37 = vpop.f32.mrb[56].mxu0  ;;  %v5239_v58 = vpop.f32.mrb[30].mxu1 }
 0x244   : > { %v5343_v34 = vpop.f32.mrb[57].mxu0  ;;  %v5240_v9 = vpop.f32.mrb[31].mxu1  ;;  %v3162_v36 = vsel %vm1518_vm8, %v3157_v43, %v3161_v38  ;;  %v3187_v43 = vshrl.u32 %v3082_v42, 16 }
 0x245   : > { %v5344_v17 = vadd.f32 %v5343_v34, %v5342_v37  ;;  %v5241_v8 = vadd.f32 %v5240_v9, %v5239_v58  ;;  %v5345_v10 = vpop.f32.mrb[58].mxu0 }
 0x246   : > { %v5346_v60 = vpop.f32.mrb[59].mxu0  ;;  %5723 = vmatmul.mubr.bf16.gmra.mrb[136].mxu1 %v3138_v27 }
 0x247   : > { %v7520_v31 = vadd.f32 %v5344_v17, %v5232_v47  ;;  %v5347_v59 = vadd.f32 %v5346_v60, %v5345_v10  ;;  %5726 = vmatprep.mubr.bf16.mxu1 %v3146_v21  ;;  %v3081_v47 = vsel %vm8027_vm14, %v7231_v5, 0  ;;  %v3165_v17 = vor.u32 %v3163_v50, %v3161_v38 }
 0x248   : > { %v3175_v37 = vshll.u32 %v3081_v47, 16  ;;  %v3173_v10 = vor.u32 %v3171_v3, %v3169_v18  ;;  %v3179_v57 = vshrl.u32 %v3081_v47, 16 }
 0x249   : > { %v7525_v12 = vadd.f32 %v5347_v59, %v5235_v11  ;;  %v5242_v39 = vpop.f32.mrb[32].mxu1  ;;  %v3154_v11 = vsel %vm1518_vm8, %v3149_v4, %v3153_v48 }
 0x24a   : > { %v5243_v22 = vpop.f32.mrb[33].mxu1  ;;  %v3177_v27 = vrot.slane %v3175_v37, 1 }
 0x24b   : > { %v5244_v46 = vadd.f32 %v5243_v22, %v5242_v39  ;;  %v5348_v0 = vpop.f32.mrb[60].mxu0  ;;  %v5245_v29 = vpop.f32.mrb[34].mxu1  ;;  %v3185_v22 = vrot.slane %v3183_v2, 1 }
 0x24c   : > { %v5349_v49 = vpop.f32.mrb[61].mxu0  ;;  %v5246_v41 = vpop.f32.mrb[35].mxu1  ;;  %v3178_v4 = vsel %vm1518_vm8, %v3173_v10, %v3177_v27 }
 0x24d   : > { %v5350_v63 = vadd.f32 %v5349_v49, %v5348_v0  ;;  %v5247_v6 = vadd.f32 %v5246_v41, %v5245_v29  ;;  %v5351_v24 = vpop.f32.mrb[62].mxu0  ;;  %v3181_v49 = vor.u32 %v3179_v57, %v3177_v27  ;;  %v3189_v41 = vor.u32 %v3187_v43, %v3185_v22 }
 0x24e   : > { %v5352_v1 = vpop.f32.mrb[63].mxu0  ;;  %5727 = vmatmul.mubr.bf16.gmra.mrb[140].mxu1 %v3154_v11 }
 0x24f   : > { %v7532_v58 = vadd.f32 %v5350_v63, %v5238_v56  ;;  %v5353_v34 = vadd.f32 %v5352_v1, %v5351_v24  ;;  %5730 = vmatprep.mubr.bf16.mxu1 %v3162_v36  ;;  %v3083_v56 = vsel %vm2210_vm10, %v7259_v28, 0  ;;  %v3084_v28 = vsel %vm2211_vm15, %v7268_v25, 0  ;;  %vm8042_vm10 = vmmov %vm8033_vm4 }
 0x250   : > { %v3191_v38 = vshll.u32 %v3083_v56, 16  ;;  %v3199_v24 = vshll.u32 %v3084_v28, 16  ;;  %v3195_v37 = vshrl.u32 %v3083_v56, 16 }
 0x251   : > { %v7537_v5 = vadd.f32 %v5353_v34, %v5241_v8  ;;  %v5248_v9 = vpop.f32.mrb[36].mxu1  ;;  %v3170_v8 = vsel %vm1518_vm8, %v3165_v17, %v3169_v18  ;;  %v3069_v34 = vld [vmem:[#allocation3 + $0x98] sm:$0x1] }
 0x252   : > { %v5249_v51 = vpop.f32.mrb[37].mxu1  ;;  %v3193_v63 = vrot.slane %v3191_v38, 1  ;;  %v3201_v17 = vrot.slane %v3199_v24, 1 }
 0x253   : > { %v5250_v60 = vadd.f32 %v5249_v51, %v5248_v9  ;;  %v5354_v21 = vpop.f32.mrb[64].mxu0  ;;  %v5251_v48 = vpop.f32.mrb[38].mxu1  ;;  %v3203_v51 = vshrl.u32 %v3084_v28, 16 }
 0x254   : > { %v5355_v15 = vpop.f32.mrb[65].mxu0  ;;  %v5252_v62 = vpop.f32.mrb[39].mxu1  ;;  %v3194_v9 = vsel %vm1518_vm8, %v3189_v41, %v3193_v63 }
 0x255   : > { %v5356_v59 = vadd.f32 %v5355_v15, %v5354_v21  ;;  %v5253_v35 = vadd.f32 %v5252_v62, %v5251_v48  ;;  %v5357_v45 = vpop.f32.mrb[66].mxu0  ;;  %v3197_v48 = vor.u32 %v3195_v37, %v3193_v63  ;;  %v3205_v15 = vor.u32 %v3203_v51, %v3201_v17 }
 0x256   : > { %v5358_v39 = vpop.f32.mrb[67].mxu0  ;;  %5731 = vmatmul.mubr.bf16.gmra.mrb[144].mxu1 %v3170_v8 }
 0x257   : > { %v7544_v19 = vadd.f32 %v5356_v59, %v5244_v46  ;;  %v5359_v0 = vadd.f32 %v5358_v39, %v5357_v45  ;;  %5734 = vmatprep.mubr.bf16.mxu1 %v3178_v4  ;;  %v3085_v46 = vsel %vm8042_vm10, %v7302_v30, 0  ;;  %v3086_v30 = vsel %vm8043_vm5, %v3069_v34, 0 }
 0x258   : > { %v3207_v10 = vshll.u32 %v3085_v46, 16  ;;  %v3211_v57 = vshrl.u32 %v3085_v46, 16  ;;  %v3215_v39 = vshll.u32 %v3086_v30, 16  ;;  %v3202_v61 = vsel %vm1518_vm8, %v3197_v48, %v3201_v17 }
 0x259   : > { %v7549_v53 = vadd.f32 %v5359_v0, %v5247_v6  ;;  %v5254_v29 = vpop.f32.mrb[40].mxu1  ;;  %v3186_v6 = vsel %vm1518_vm8, %v3181_v49, %v3185_v22 }
 0x25a   : > { %v5255_v47 = vpop.f32.mrb[41].mxu1  ;;  %v3209_v62 = vrot.slane %v3207_v10, 1 }
 0x25b   : > { %v5256_v11 = vadd.f32 %v5255_v47, %v5254_v29  ;;  %v5360_v50 = vpop.f32.mrb[68].mxu0  ;;  %v5257_v1 = vpop.f32.mrb[42].mxu1  ;;  %v3217_v47 = vrot.slane %v3215_v39, 1 }
 0x25c   : > { %v5361_v36 = vpop.f32.mrb[69].mxu0  ;;  %v5258_v18 = vpop.f32.mrb[43].mxu1  ;;  %v3213_v49 = vor.u32 %v3211_v57, %v3209_v62 }
 0x25d   : > { %v5362_v3 = vadd.f32 %v5361_v36, %v5360_v50  ;;  %v5259_v23 = vadd.f32 %v5258_v18, %v5257_v1  ;;  %v5363_v25 = vpop.f32.mrb[70].mxu0 }
 0x25e   : > { %v5364_v42 = vpop.f32.mrb[71].mxu0  ;;  %5735 = vmatmul.mubr.bf16.gmra.mrb[148].mxu1 %v3186_v6  ;;  %v3218_v36 = vsel %vm1518_vm8, %v3213_v49, %v3217_v47 }
 0x25f   : > { %v7556_v27 = vadd.f32 %v5362_v3, %v5250_v60  ;;  %v5365_v14 = vadd.f32 %v5364_v42, %v5363_v25  ;;  %5738 = vmatprep.mubr.bf16.mxu1 %v3194_v9 }
 0x261   : > { %v7560_v2 = vadd.f32 %v5365_v14, %v5253_v35  ;;  %v5260_v21 = vpop.f32.mrb[44].mxu1  ;;  %v3210_v35 = vsel %vm1518_vm8, %v3205_v15, %v3209_v62 }
 0x262   : > { %v5261_v56 = vpop.f32.mrb[45].mxu1 }
 0x263   : > { %v5262_v59 = vadd.f32 %v5261_v56, %v5260_v21  ;;  %v5366_v45 = vpop.f32.mrb[72].mxu0  ;;  %v5263_v8 = vpop.f32.mrb[46].mxu1 }
 0x264   : > { %v5367_v4 = vpop.f32.mrb[73].mxu0  ;;  %v5264_v60 = vpop.f32.mrb[47].mxu1 }
 0x265   : > { %v5368_v22 = vadd.f32 %v5367_v4, %v5366_v45  ;;  %v5265_v43 = vadd.f32 %v5264_v60, %v5263_v8  ;;  %v5369_v38 = vpop.f32.mrb[74].mxu0 }
 0x266   : > { %v5370_v0 = vpop.f32.mrb[75].mxu0  ;;  %5739 = vmatmul.mubr.bf16.gmra.mrb[152].mxu1 %v3202_v61 }
 0x267   : > { %v7564_v28 = vadd.f32 %v5368_v22, %v5256_v11  ;;  %v5371_v29 = vadd.f32 %v5370_v0, %v5369_v38  ;;  %5742 = vmatprep.mubr.bf16.mxu1 %v3210_v35 }
 0x269   : > { %v7566_v41 = vadd.f32 %v5371_v29, %v5259_v23  ;;  %v5266_v63 = vpop.f32.mrb[48].mxu1 }
 0x26a   : > { %v5267_v24 = vpop.f32.mrb[49].mxu1 }
 0x26b   : > { %v5268_v50 = vadd.f32 %v5267_v24, %v5266_v63  ;;  %v5372_v1 = vpop.f32.mrb[76].mxu0  ;;  %v5269_v46 = vpop.f32.mrb[50].mxu1 }
 0x26c   : > { %v5373_v18 = vpop.f32.mrb[77].mxu0  ;;  %v5270_v3 = vpop.f32.mrb[51].mxu1 }
 0x26d   : > { %v5374_v25 = vadd.f32 %v5373_v18, %v5372_v1  ;;  %v5271_v6 = vadd.f32 %v5270_v3, %v5269_v46  ;;  %v5375_v37 = vpop.f32.mrb[78].mxu0 }
 0x26e   : > { %v5376_v11 = vpop.f32.mrb[79].mxu0  ;;  %5743 = vmatmul.mubr.bf16.gmra.mrb[156].mxu1 %v3218_v36 }
 0x26f   : > { %v7569_v34 = vadd.f32 %v5374_v25, %v5262_v59  ;;  %v5377_v42 = vadd.f32 %v5376_v11, %v5375_v37 }
 0x271   : > { %v7571_v9 = vadd.f32 %v5377_v42, %v5265_v43  ;;  %v5272_v23 = vpop.f32.mrb[52].mxu1 }
 0x272   : > { %v5273_v17 = vpop.f32.mrb[53].mxu1 }
 0x273   : > { %v5274_v51 = vadd.f32 %v5273_v17, %v5272_v23  ;;  %v5378_v10 = vpop.f32.mrb[80].mxu0  ;;  %v5275_v14 = vpop.f32.mrb[54].mxu1 }
 0x274   : > { %v5379_v30 = vpop.f32.mrb[81].mxu0  ;;  %v5276_v21 = vpop.f32.mrb[55].mxu1 }
 0x275   : > { %v5380_v48 = vadd.f32 %v5379_v30, %v5378_v10  ;;  %v5277_v56 = vadd.f32 %v5276_v21, %v5275_v14  ;;  %v5381_v15 = vpop.f32.mrb[82].mxu0 }
 0x276   : > { %v5382_v62 = vpop.f32.mrb[83].mxu0 }
 0x277   : > { %v7573_v45 = vadd.f32 %v5380_v48, %v5268_v50  ;;  %v5383_v8 = vadd.f32 %v5382_v62, %v5381_v15 }
 0x279   : > { %v7575_v57 = vadd.f32 %v5383_v8, %v5271_v6  ;;  %v5278_v59 = vpop.f32.mrb[56].mxu1 }
 0x27a   : > { %v5279_v39 = vpop.f32.mrb[57].mxu1 }
 0x27b   : > { %v5280_v4 = vadd.f32 %v5279_v39, %v5278_v59  ;;  %v5384_v60 = vpop.f32.mrb[84].mxu0  ;;  %v5281_v22 = vpop.f32.mrb[58].mxu1 }
 0x27c   : > { %v5385_v43 = vpop.f32.mrb[85].mxu0  ;;  %v5282_v38 = vpop.f32.mrb[59].mxu1 }
 0x27d   : > { %v5386_v61 = vadd.f32 %v5385_v43, %v5384_v60  ;;  %v5283_v0 = vadd.f32 %v5282_v38, %v5281_v22  ;;  %v5387_v35 = vpop.f32.mrb[86].mxu0 }
 0x27e   : > { %v5388_v29 = vpop.f32.mrb[87].mxu0 }
 0x27f   : > { %v7577_v49 = vadd.f32 %v5386_v61, %v5274_v51  ;;  %v5389_v47 = vadd.f32 %v5388_v29, %v5387_v35 }
 0x281   : > { %v7579_v63 = vadd.f32 %v5389_v47, %v5277_v56  ;;  %v5284_v24 = vpop.f32.mrb[60].mxu1 }
 0x282   : > { %v5285_v50 = vpop.f32.mrb[61].mxu1 }
 0x283   : > { %v5286_v1 = vadd.f32 %v5285_v50, %v5284_v24  ;;  %v5390_v46 = vpop.f32.mrb[88].mxu0  ;;  %v5287_v36 = vpop.f32.mrb[62].mxu1 }
 0x284   : > { %v5391_v18 = vpop.f32.mrb[89].mxu0  ;;  %v5288_v3 = vpop.f32.mrb[63].mxu1 }
 0x285   : > { %v5392_v25 = vadd.f32 %v5391_v18, %v5390_v46  ;;  %v5289_v6 = vadd.f32 %v5288_v3, %v5287_v36  ;;  %v5393_v37 = vpop.f32.mrb[90].mxu0 }
 0x286   : > { %v5394_v11 = vpop.f32.mrb[91].mxu0 }
 0x287   : > { %v7581_v42 = vadd.f32 %v5392_v25, %v5280_v4  ;;  %v5395_v23 = vadd.f32 %v5394_v11, %v5393_v37 }
 0x289   : > { %v7583_v17 = vadd.f32 %v5395_v23, %v5283_v0  ;;  %v5418_v51 = vpop.f32.mrb[64].mxu1 }
 0x28a   : > { %v5419_v10 = vpop.f32.mrb[65].mxu1 }
 0x28b   : > { %v5396_v14 = vpop.f32.mrb[92].mxu0  ;;  %v5420_v30 = vadd.f32 %v5419_v10, %v5418_v51  ;;  %v5421_v21 = vpop.f32.mrb[66].mxu1 }
 0x28c   : > { %v5397_v48 = vpop.f32.mrb[93].mxu0  ;;  %v5422_v56 = vpop.f32.mrb[67].mxu1 }
 0x28d   : > { %v4328_v15 = vadd.f32 %v5420_v30, %v7452_v55  ;;  %v5398_v62 = vadd.f32 %v5397_v48, %v5396_v14  ;;  %v5399_v8 = vpop.f32.mrb[94].mxu0  ;;  %v5423_v59 = vadd.f32 %v5422_v56, %v5421_v21 }
 0x28e   : > { %v5400_v39 = vpop.f32.mrb[95].mxu0 }
 0x28f   : > { %v7586_v60 = vadd.f32 %v5398_v62, %v5286_v1  ;;  %v4331_v4 = vadd.f32 %v5423_v59, %v7456_v52  ;;  %v5401_v22 = vadd.f32 %v5400_v39, %v5399_v8 }
 0x291   : > { %v7589_v43 = vadd.f32 %v5401_v22, %v5289_v6  ;;  %v5424_v38 = vpop.f32.mrb[68].mxu1 }
 0x292   : > { %v5425_v61 = vpop.f32.mrb[69].mxu1 }
 0x293   : > { %v5426_v0 = vadd.f32 %v5425_v61, %v5424_v38  ;;  %v5530_v35 = vpop.f32.mrb[96].mxu0  ;;  %v5427_v29 = vpop.f32.mrb[70].mxu1 }
 0x294   : > { %v5531_v47 = vpop.f32.mrb[97].mxu0  ;;  %v5428_v24 = vpop.f32.mrb[71].mxu1 }
 0x295   : > { %v4336_v55 = vadd.f32 %v5426_v0, %v7463_v20  ;;  %v5532_v50 = vadd.f32 %v5531_v47, %v5530_v35  ;;  %v5429_v46 = vadd.f32 %v5428_v24, %v5427_v29  ;;  %v5533_v36 = vpop.f32.mrb[98].mxu0 }
 0x296   : > { %v5534_v18 = vpop.f32.mrb[99].mxu0 }
 0x297   : > { %v4339_v1 = vadd.f32 %v5429_v46, %v7466_v40  ;;  %v5535_v3 = vadd.f32 %v5534_v18, %v5533_v36  ;;  %v7593_v52 = vadd.f32 %v5532_v50, %v4328_v15 }
 0x299   : > { %v5430_v25 = vpop.f32.mrb[72].mxu1  ;;  %v7595_v6 = vadd.f32 %v5535_v3, %v4331_v4 }
 0x29a   : > { %v5431_v37 = vpop.f32.mrb[73].mxu1 }
 0x29b   : > { %v5432_v11 = vadd.f32 %v5431_v37, %v5430_v25  ;;  %v5536_v23 = vpop.f32.mrb[100].mxu0  ;;  %v5433_v51 = vpop.f32.mrb[74].mxu1 }
 0x29c   : > { %v5537_v10 = vpop.f32.mrb[101].mxu0  ;;  %v5434_v14 = vpop.f32.mrb[75].mxu1 }
 0x29d   : > { %v4344_v20 = vadd.f32 %v5432_v11, %v7471_v16  ;;  %v5538_v30 = vadd.f32 %v5537_v10, %v5536_v23  ;;  %v5435_v21 = vadd.f32 %v5434_v14, %v5433_v51  ;;  %v5539_v48 = vpop.f32.mrb[102].mxu0 }
 0x29e   : > { %v5540_v56 = vpop.f32.mrb[103].mxu0 }
 0x29f   : > { %v4347_v40 = vadd.f32 %v5435_v21, %v7474_v26  ;;  %v5541_v62 = vadd.f32 %v5540_v56, %v5539_v48  ;;  %v7599_v15 = vadd.f32 %v5538_v30, %v4336_v55 }
 0x2a1   : > { %v5436_v8 = vpop.f32.mrb[76].mxu1  ;;  %v7601_v59 = vadd.f32 %v5541_v62, %v4339_v1 }
 0x2a2   : > { %v5437_v39 = vpop.f32.mrb[77].mxu1 }
 0x2a3   : > { %v5438_v4 = vadd.f32 %v5437_v39, %v5436_v8  ;;  %v5542_v22 = vpop.f32.mrb[104].mxu0  ;;  %v5439_v38 = vpop.f32.mrb[78].mxu1 }
 0x2a4   : > { %v5543_v61 = vpop.f32.mrb[105].mxu0  ;;  %v5440_v0 = vpop.f32.mrb[79].mxu1 }
 0x2a5   : > { %v4352_v16 = vadd.f32 %v5438_v4, %v7478_v44  ;;  %v5544_v35 = vadd.f32 %v5543_v61, %v5542_v22  ;;  %v5441_v29 = vadd.f32 %v5440_v0, %v5439_v38  ;;  %v5545_v47 = vpop.f32.mrb[106].mxu0 }
 0x2a6   : > { %v5546_v24 = vpop.f32.mrb[107].mxu0 }
 0x2a7   : > { %v4355_v26 = vadd.f32 %v5441_v29, %v7485_v13  ;;  %v5547_v50 = vadd.f32 %v5546_v24, %v5545_v47  ;;  %v7605_v55 = vadd.f32 %v5544_v35, %v4344_v20 }
 0x2a9   : > { %v5442_v46 = vpop.f32.mrb[80].mxu1  ;;  %v7607_v36 = vadd.f32 %v5547_v50, %v4347_v40 }
 0x2aa   : > { %v5443_v18 = vpop.f32.mrb[81].mxu1 }
 0x2ab   : > { %v5444_v1 = vadd.f32 %v5443_v18, %v5442_v46  ;;  %v5548_v3 = vpop.f32.mrb[108].mxu0  ;;  %v5445_v25 = vpop.f32.mrb[82].mxu1 }
 0x2ac   : > { %v5549_v37 = vpop.f32.mrb[109].mxu0  ;;  %v5446_v11 = vpop.f32.mrb[83].mxu1 }
 0x2ad   : > { %v4360_v44 = vadd.f32 %v5444_v1, %v7493_v33  ;;  %v5550_v23 = vadd.f32 %v5549_v37, %v5548_v3  ;;  %v5447_v51 = vadd.f32 %v5446_v11, %v5445_v25  ;;  %v5551_v10 = vpop.f32.mrb[110].mxu0 }
 0x2ae   : > { %v5552_v14 = vpop.f32.mrb[111].mxu0 }
 0x2af   : > { %v4363_v13 = vadd.f32 %v5447_v51, %v7500_v7  ;;  %v5553_v30 = vadd.f32 %v5552_v14, %v5551_v10  ;;  %v7611_v20 = vadd.f32 %v5550_v23, %v4352_v16 }
 0x2b1   : > { %v5448_v21 = vpop.f32.mrb[84].mxu1  ;;  %v7613_v48 = vadd.f32 %v5553_v30, %v4355_v26 }
 0x2b2   : > { %v5449_v56 = vpop.f32.mrb[85].mxu1 }
 0x2b3   : > { %v5450_v40 = vadd.f32 %v5449_v56, %v5448_v21  ;;  %v5554_v62 = vpop.f32.mrb[112].mxu0  ;;  %v5451_v8 = vpop.f32.mrb[86].mxu1 }
 0x2b4   : > { %v5555_v39 = vpop.f32.mrb[113].mxu0  ;;  %v5452_v4 = vpop.f32.mrb[87].mxu1 }
 0x2b5   : > { %v4368_v33 = vadd.f32 %v5450_v40, %v7508_v54  ;;  %v5556_v22 = vadd.f32 %v5555_v39, %v5554_v62  ;;  %v5453_v38 = vadd.f32 %v5452_v4, %v5451_v8  ;;  %v5557_v61 = vpop.f32.mrb[114].mxu0 }
 0x2b6   : > { %v5558_v0 = vpop.f32.mrb[115].mxu0 }
 0x2b7   : > { %v4371_v7 = vadd.f32 %v5453_v38, %v7513_v32  ;;  %v5559_v35 = vadd.f32 %v5558_v0, %v5557_v61  ;;  %v7617_v16 = vadd.f32 %v5556_v22, %v4360_v44 }
 0x2b9   : > { %v5454_v29 = vpop.f32.mrb[88].mxu1  ;;  %v7619_v47 = vadd.f32 %v5559_v35, %v4363_v13 }
 0x2ba   : > { %v5455_v24 = vpop.f32.mrb[89].mxu1 }
 0x2bb   : > { %v5456_v26 = vadd.f32 %v5455_v24, %v5454_v29  ;;  %v5560_v50 = vpop.f32.mrb[116].mxu0  ;;  %v5457_v46 = vpop.f32.mrb[90].mxu1 }
 0x2bc   : > { %v5561_v18 = vpop.f32.mrb[117].mxu0  ;;  %v5458_v1 = vpop.f32.mrb[91].mxu1 }
 0x2bd   : > { %v4376_v54 = vadd.f32 %v5456_v26, %v7520_v31  ;;  %v5562_v3 = vadd.f32 %v5561_v18, %v5560_v50  ;;  %v5459_v25 = vadd.f32 %v5458_v1, %v5457_v46  ;;  %v5563_v37 = vpop.f32.mrb[118].mxu0 }
 0x2be   : > { %v5564_v11 = vpop.f32.mrb[119].mxu0 }
 0x2bf   : > { %v4379_v32 = vadd.f32 %v5459_v25, %v7525_v12  ;;  %v5565_v23 = vadd.f32 %v5564_v11, %v5563_v37  ;;  %v7623_v44 = vadd.f32 %v5562_v3, %v4368_v33 }
 0x2c1   : > { %v5460_v51 = vpop.f32.mrb[92].mxu1  ;;  %v7625_v10 = vadd.f32 %v5565_v23, %v4371_v7 }
 0x2c2   : > { %v5461_v14 = vpop.f32.mrb[93].mxu1 }
 0x2c3   : > { %v5462_v13 = vadd.f32 %v5461_v14, %v5460_v51  ;;  %v5566_v30 = vpop.f32.mrb[120].mxu0  ;;  %v5463_v21 = vpop.f32.mrb[94].mxu1 }
 0x2c4   : > { %v5567_v56 = vpop.f32.mrb[121].mxu0  ;;  %v5464_v40 = vpop.f32.mrb[95].mxu1 }
 0x2c5   : > { %v4384_v31 = vadd.f32 %v5462_v13, %v7532_v58  ;;  %v5568_v62 = vadd.f32 %v5567_v56, %v5566_v30  ;;  %v5465_v8 = vadd.f32 %v5464_v40, %v5463_v21  ;;  %v5569_v39 = vpop.f32.mrb[122].mxu0 }
 0x2c6   : > { %v5570_v4 = vpop.f32.mrb[123].mxu0 }
 0x2c7   : > { %v4387_v12 = vadd.f32 %v5465_v8, %v7537_v5  ;;  %v5571_v22 = vadd.f32 %v5570_v4, %v5569_v39  ;;  %v7629_v33 = vadd.f32 %v5568_v62, %v4376_v54 }
 0x2c9   : > { %v5466_v38 = vpop.f32.mrb[96].mxu1  ;;  %v7631_v61 = vadd.f32 %v5571_v22, %v4379_v32 }
 0x2ca   : > { %v5467_v0 = vpop.f32.mrb[97].mxu1 }
 0x2cb   : > { %v5468_v7 = vadd.f32 %v5467_v0, %v5466_v38  ;;  %v5572_v35 = vpop.f32.mrb[124].mxu0  ;;  %v5469_v29 = vpop.f32.mrb[98].mxu1 }
 0x2cc   : > { %v5573_v24 = vpop.f32.mrb[125].mxu0  ;;  %v5470_v26 = vpop.f32.mrb[99].mxu1 }
 0x2cd   : > { %v4392_v58 = vadd.f32 %v5468_v7, %v7544_v19  ;;  %v5574_v50 = vadd.f32 %v5573_v24, %v5572_v35  ;;  %v5471_v46 = vadd.f32 %v5470_v26, %v5469_v29  ;;  %v5575_v18 = vpop.f32.mrb[126].mxu0 }
 0x2ce   : > { %v5576_v1 = vpop.f32.mrb[127].mxu0 }
 0x2cf   : > { %v4395_v5 = vadd.f32 %v5471_v46, %v7549_v53  ;;  %v5577_v3 = vadd.f32 %v5576_v1, %v5575_v18  ;;  %v7635_v54 = vadd.f32 %v5574_v50, %v4384_v31 }
 0x2d1   : > { %v5472_v25 = vpop.f32.mrb[100].mxu1  ;;  %v7637_v37 = vadd.f32 %v5577_v3, %v4387_v12 }
 0x2d2   : > { %v5473_v11 = vpop.f32.mrb[101].mxu1 }
 0x2d3   : > { %v5474_v32 = vadd.f32 %v5473_v11, %v5472_v25  ;;  %v5578_v23 = vpop.f32.mrb[128].mxu0  ;;  %v5475_v51 = vpop.f32.mrb[102].mxu1 }
 0x2d4   : > { %v5579_v14 = vpop.f32.mrb[129].mxu0  ;;  %v5476_v13 = vpop.f32.mrb[103].mxu1 }
 0x2d5   : > { %v4400_v19 = vadd.f32 %v5474_v32, %v7556_v27  ;;  %v5580_v30 = vadd.f32 %v5579_v14, %v5578_v23  ;;  %v5477_v21 = vadd.f32 %v5476_v13, %v5475_v51  ;;  %v5581_v56 = vpop.f32.mrb[130].mxu0 }
 0x2d6   : > { %v5582_v40 = vpop.f32.mrb[131].mxu0 }
 0x2d7   : > { %v4403_v53 = vadd.f32 %v5477_v21, %v7560_v2  ;;  %v5583_v62 = vadd.f32 %v5582_v40, %v5581_v56  ;;  %v7641_v31 = vadd.f32 %v5580_v30, %v4392_v58 }
 0x2d9   : > { %v5478_v8 = vpop.f32.mrb[104].mxu1  ;;  %v7643_v39 = vadd.f32 %v5583_v62, %v4395_v5 }
 0x2da   : > { %v5479_v4 = vpop.f32.mrb[105].mxu1 }
 0x2db   : > { %v5480_v12 = vadd.f32 %v5479_v4, %v5478_v8  ;;  %v5584_v22 = vpop.f32.mrb[132].mxu0  ;;  %v5481_v38 = vpop.f32.mrb[106].mxu1 }
 0x2dc   : > { %v5585_v0 = vpop.f32.mrb[133].mxu0  ;;  %v5482_v7 = vpop.f32.mrb[107].mxu1 }
 0x2dd   : > { %v4408_v27 = vadd.f32 %v5480_v12, %v7564_v28  ;;  %v5586_v35 = vadd.f32 %v5585_v0, %v5584_v22  ;;  %v5483_v29 = vadd.f32 %v5482_v7, %v5481_v38  ;;  %v5587_v24 = vpop.f32.mrb[134].mxu0 }
 0x2de   : > { %v5588_v26 = vpop.f32.mrb[135].mxu0 }
 0x2df   : > { %v4411_v2 = vadd.f32 %v5483_v29, %v7566_v41  ;;  %v5589_v50 = vadd.f32 %v5588_v26, %v5587_v24  ;;  %v7647_v58 = vadd.f32 %v5586_v35, %v4400_v19 }
 0x2e1   : > { %v5484_v46 = vpop.f32.mrb[108].mxu1  ;;  %v7649_v18 = vadd.f32 %v5589_v50, %v4403_v53 }
 0x2e2   : > { %v5485_v1 = vpop.f32.mrb[109].mxu1 }
 0x2e3   : > { %v5486_v5 = vadd.f32 %v5485_v1, %v5484_v46  ;;  %v5590_v3 = vpop.f32.mrb[136].mxu0  ;;  %v5487_v25 = vpop.f32.mrb[110].mxu1 }
 0x2e4   : > { %v5591_v11 = vpop.f32.mrb[137].mxu0  ;;  %v5488_v32 = vpop.f32.mrb[111].mxu1 }
 0x2e5   : > { %v4416_v28 = vadd.f32 %v5486_v5, %v7569_v34  ;;  %v5592_v23 = vadd.f32 %v5591_v11, %v5590_v3  ;;  %v5489_v51 = vadd.f32 %v5488_v32, %v5487_v25  ;;  %v5593_v14 = vpop.f32.mrb[138].mxu0 }
 0x2e6   : > { %v5594_v13 = vpop.f32.mrb[139].mxu0 }
 0x2e7   : > { %v4419_v41 = vadd.f32 %v5489_v51, %v7571_v9  ;;  %v5595_v30 = vadd.f32 %v5594_v13, %v5593_v14  ;;  %v7653_v19 = vadd.f32 %v5592_v23, %v4408_v27 }
 0x2e9   : > { %v5490_v21 = vpop.f32.mrb[112].mxu1  ;;  %v7655_v56 = vadd.f32 %v5595_v30, %v4411_v2 }
 0x2ea   : > { %v5491_v40 = vpop.f32.mrb[113].mxu1 }
 0x2eb   : > { %v5492_v53 = vadd.f32 %v5491_v40, %v5490_v21  ;;  %v5596_v62 = vpop.f32.mrb[140].mxu0  ;;  %v5493_v8 = vpop.f32.mrb[114].mxu1 }
 0x2ec   : > { %v5597_v4 = vpop.f32.mrb[141].mxu0  ;;  %v5494_v12 = vpop.f32.mrb[115].mxu1 }
 0x2ed   : > { %v4424_v34 = vadd.f32 %v5492_v53, %v7573_v45  ;;  %v5598_v22 = vadd.f32 %v5597_v4, %v5596_v62  ;;  %v5495_v38 = vadd.f32 %v5494_v12, %v5493_v8  ;;  %v5599_v0 = vpop.f32.mrb[142].mxu0 }
 0x2ee   : > { %v5600_v7 = vpop.f32.mrb[143].mxu0 }
 0x2ef   : > { %v4427_v9 = vadd.f32 %v5495_v38, %v7575_v57  ;;  %v5601_v35 = vadd.f32 %v5600_v7, %v5599_v0  ;;  %v7659_v27 = vadd.f32 %v5598_v22, %v4416_v28 }
 0x2f1   : > { %v5496_v29 = vpop.f32.mrb[116].mxu1  ;;  %v7661_v24 = vadd.f32 %v5601_v35, %v4419_v41 }
 0x2f2   : > { %v5497_v26 = vpop.f32.mrb[117].mxu1 }
 0x2f3   : > { %v5498_v2 = vadd.f32 %v5497_v26, %v5496_v29  ;;  %v5602_v50 = vpop.f32.mrb[144].mxu0  ;;  %v5499_v46 = vpop.f32.mrb[118].mxu1 }
 0x2f4   : > { %v5603_v1 = vpop.f32.mrb[145].mxu0  ;;  %v5500_v5 = vpop.f32.mrb[119].mxu1 }
 0x2f5   : > { %v4432_v45 = vadd.f32 %v5498_v2, %v7577_v49  ;;  %v5604_v3 = vadd.f32 %v5603_v1, %v5602_v50  ;;  %v5501_v25 = vadd.f32 %v5500_v5, %v5499_v46  ;;  %v5605_v11 = vpop.f32.mrb[146].mxu0 }
 0x2f6   : > { %v5606_v32 = vpop.f32.mrb[147].mxu0 }
 0x2f7   : > { %v4435_v57 = vadd.f32 %v5501_v25, %v7579_v63  ;;  %v5607_v23 = vadd.f32 %v5606_v32, %v5605_v11  ;;  %v7665_v28 = vadd.f32 %v5604_v3, %v4424_v34  ;;  %v7683_v11 = vld [vmem:[%s7885_s5] ss:$0 sm:$0xff] }
 0x2f9   : > { %v5502_v51 = vpop.f32.mrb[120].mxu1  ;;  %v7667_v14 = vadd.f32 %v5607_v23, %v4427_v9  ;;  %v7691_v23 = vld [vmem:[%s7886_s6] ss:$0 sm:$0xff] }
 0x2fa   : > { %v5503_v13 = vpop.f32.mrb[121].mxu1 }
 0x2fb   : > { %v5504_v41 = vadd.f32 %v5503_v13, %v5502_v51  ;;  %v5608_v30 = vpop.f32.mrb[148].mxu0  ;;  %v5505_v21 = vpop.f32.mrb[122].mxu1 }
 0x2fc   : > { %v5609_v40 = vpop.f32.mrb[149].mxu0  ;;  %v5506_v53 = vpop.f32.mrb[123].mxu1 }
 0x2fd   : > { %v4440_v49 = vadd.f32 %v5504_v41, %v7581_v42  ;;  %v5610_v62 = vadd.f32 %v5609_v40, %v5608_v30  ;;  %v5507_v8 = vadd.f32 %v5506_v53, %v5505_v21  ;;  %v5611_v4 = vpop.f32.mrb[150].mxu0 }
 0x2fe   : > { %v5612_v12 = vpop.f32.mrb[151].mxu0 }
 0x2ff   : > { %v4443_v63 = vadd.f32 %v5507_v8, %v7583_v17  ;;  %v5613_v22 = vadd.f32 %v5612_v12, %v5611_v4  ;;  %v7671_v34 = vadd.f32 %v5610_v62, %v4432_v45 }
 0x301   : > { %v5508_v38 = vpop.f32.mrb[124].mxu1  ;;  %v7673_v0 = vadd.f32 %v5613_v22, %v4435_v57 }
 0x302   : > { %v5509_v7 = vpop.f32.mrb[125].mxu1 }
 0x303   : > { %v5510_v9 = vadd.f32 %v5509_v7, %v5508_v38  ;;  %v5614_v35 = vpop.f32.mrb[152].mxu0  ;;  %v5511_v29 = vpop.f32.mrb[126].mxu1 }
 0x304   : > { %v5615_v26 = vpop.f32.mrb[153].mxu0  ;;  %v5512_v2 = vpop.f32.mrb[127].mxu1 }
 0x305   : > { %v4448_v42 = vadd.f32 %v5510_v9, %v7586_v60  ;;  %v5616_v50 = vadd.f32 %v5615_v26, %v5614_v35  ;;  %v5513_v46 = vadd.f32 %v5512_v2, %v5511_v29  ;;  %v5617_v1 = vpop.f32.mrb[154].mxu0 }
 0x306   : > { %v5618_v17 = vpop.f32.mrb[155].mxu0 }
 0x307   : > { %v4451_v5 = vadd.f32 %v5513_v46, %v7589_v43  ;;  %v5619_v45 = vadd.f32 %v5618_v17, %v5617_v1  ;;  %v7677_v3 = vadd.f32 %v5616_v50, %v4440_v49 }
 0x309   : > { %v5716_v25 = vpop.f32.mrb[128].mxu1  ;;  %v7685_v32 = vadd.f32 %v5619_v45, %v4443_v63 }
 0x30a   : > { %v4658_v60 = vadd.f32 %v5716_v25, %v7599_v15  ;;  %v4649_v57 = vpop.f32.mrb[129].mxu1 }
 0x30b   : > { %v5620_v43 = vpop.f32.mrb[156].mxu0  ;;  %v4650_v51 = vadd.f32 %v4649_v57, %v7593_v52  ;;  %v5717_v13 = vpop.f32.mrb[130].mxu1 }
 0x30c   : > { %v4785_v41 = vmul.f32 %v7683_v11, %v4658_v60  ;;  %v5621_v30 = vpop.f32.mrb[157].mxu0  ;;  %v4661_v21 = vadd.f32 %v5717_v13, %v7601_v59  ;;  %v4652_v40 = vpop.f32.mrb[131].mxu1 }
 0x30d   : > { %v4783_v15 = vmul.f32 %v7683_v11, %v4650_v51  ;;  %v5622_v53 = vadd.f32 %v5621_v30, %v5620_v43  ;;  %v5623_v49 = vpop.f32.mrb[158].mxu0  ;;  %v4653_v62 = vadd.f32 %v4652_v40, %v7595_v6 }
 0x30e   : > { %v4824_v8 = vadd.f32 %v7691_v23, %v4785_v41  ;;  %v4786_v4 = vmul.f32 %v7683_v11, %v4661_v21  ;;  %v5624_v52 = vpop.f32.mrb[159].mxu0 }
 0x30f   : > { %v4822_v12 = vadd.f32 %v7691_v23, %v4783_v15  ;;  %v4784_v63 = vmul.f32 %v7683_v11, %v4653_v62  ;;  %v5625_v22 = vadd.f32 %v5624_v52, %v5623_v49  ;;  %v7704_v38 = vadd.f32 %v5622_v53, %v4448_v42 }
 0x310   : > { %v4856_v59 = vmax.f32 %v4824_v8, 0.0  ;;  %v4825_v7 = vadd.f32 %v7691_v23, %v4786_v4 }
 0x311   : > { %v4854_v9 = vmax.f32 %v4822_v12, 0.0  ;;  %v4823_v35 = vadd.f32 %v7691_v23, %v4784_v63  ;;  %v5720_v29 = vpop.f32.mrb[132].mxu1  ;;  %v7708_v6 = vadd.f32 %v5625_v22, %v4451_v5 }
 0x312   : > { %4888 = vst [vmem:[%s7710_s18 + $0x10] sm:$0xff] %v4856_v59  ;;  %v4857_v26 = vmax.f32 %v4825_v7, 0.0  ;;  %v4674_v2 = vadd.f32 %v5720_v29, %v7611_v20  ;;  %v4665_v42 = vpop.f32.mrb[133].mxu1 }
 0x313   : > { %4886 = vst [vmem:[%s7710_s18] sm:$0xff] %v4854_v9  ;;  %v4855_v50 = vmax.f32 %v4823_v35, 0.0  ;;  %v4666_v46 = vadd.f32 %v4665_v42, %v7605_v55  ;;  %v5721_v1 = vpop.f32.mrb[134].mxu1 }
 0x314   : > { %4889 = vst [vmem:[%s7710_s18 + $0x18] sm:$0xff] %v4857_v26  ;;  %v4789_v17 = vmul.f32 %v7683_v11, %v4674_v2  ;;  %v4677_v5 = vadd.f32 %v5721_v1, %v7613_v48  ;;  %v4668_v45 = vpop.f32.mrb[135].mxu1 }
 0x315   : > { %4887 = vst [vmem:[%s7710_s18 + $0x8] sm:$0xff] %v4855_v50  ;;  %v4787_v25 = vmul.f32 %v7683_v11, %v4666_v46  ;;  %v4669_v60 = vadd.f32 %v4668_v45, %v7607_v36 }
 0x316   : > { %v4828_v20 = vadd.f32 %v7691_v23, %v4789_v17  ;;  %v4790_v57 = vmul.f32 %v7683_v11, %v4677_v5 }
 0x317   : > { %v4826_v55 = vadd.f32 %v7691_v23, %v4787_v25  ;;  %v4788_v43 = vmul.f32 %v7683_v11, %v4669_v60 }
 0x318   : > { %v4860_v51 = vmax.f32 %v4828_v20, 0.0  ;;  %v4829_v13 = vadd.f32 %v7691_v23, %v4790_v57 }
 0x319   : > { %v4858_v48 = vmax.f32 %v4826_v55, 0.0  ;;  %v4827_v41 = vadd.f32 %v7691_v23, %v4788_v43  ;;  %v5724_v30 = vpop.f32.mrb[136].mxu1 }
 0x31a   : > { %4892 = vst [vmem:[%s7710_s18 + $0x30] sm:$0xff] %v4860_v51  ;;  %v4861_v21 = vmax.f32 %v4829_v13, 0.0  ;;  %v4690_v36 = vadd.f32 %v5724_v30, %v7623_v44  ;;  %v4681_v40 = vpop.f32.mrb[137].mxu1 }
 0x31b   : > { %4890 = vst [vmem:[%s7710_s18 + $0x20] sm:$0xff] %v4858_v48  ;;  %v4859_v15 = vmax.f32 %v4827_v41, 0.0  ;;  %v4682_v53 = vadd.f32 %v4681_v40, %v7617_v16  ;;  %v5725_v49 = vpop.f32.mrb[138].mxu1 }
 0x31c   : > { %4893 = vst [vmem:[%s7710_s18 + $0x38] sm:$0xff] %v4861_v21  ;;  %v4793_v62 = vmul.f32 %v7683_v11, %v4690_v36  ;;  %v4693_v8 = vadd.f32 %v5725_v49, %v7625_v10  ;;  %v4684_v4 = vpop.f32.mrb[139].mxu1 }
 0x31d   : > { %4891 = vst [vmem:[%s7710_s18 + $0x28] sm:$0xff] %v4859_v15  ;;  %v4791_v52 = vmul.f32 %v7683_v11, %v4682_v53  ;;  %v4685_v12 = vadd.f32 %v4684_v4, %v7619_v47 }
 0x31e   : > { %v4832_v44 = vadd.f32 %v7691_v23, %v4793_v62  ;;  %v4794_v63 = vmul.f32 %v7683_v11, %v4693_v8 }
 0x31f   : > { %v4830_v16 = vadd.f32 %v7691_v23, %v4791_v52  ;;  %v4792_v22 = vmul.f32 %v7683_v11, %v4685_v12 }
 0x320   : > { %v4864_v59 = vmax.f32 %v4832_v44, 0.0  ;;  %v4833_v7 = vadd.f32 %v7691_v23, %v4794_v63 }
 0x321   : > { %v4862_v10 = vmax.f32 %v4830_v16, 0.0  ;;  %v4831_v9 = vadd.f32 %v7691_v23, %v4792_v22  ;;  %v5728_v35 = vpop.f32.mrb[140].mxu1 }
 0x322   : > { %4896 = vst [vmem:[%s7710_s18 + $0x50] sm:$0xff] %v4864_v59  ;;  %v4865_v29 = vmax.f32 %v4833_v7, 0.0  ;;  %v4706_v47 = vadd.f32 %v5728_v35, %v7635_v54  ;;  %v4697_v26 = vpop.f32.mrb[141].mxu1 }
 0x323   : > { %4894 = vst [vmem:[%s7710_s18 + $0x40] sm:$0xff] %v4862_v10  ;;  %v4863_v2 = vmax.f32 %v4831_v9, 0.0  ;;  %v4698_v42 = vadd.f32 %v4697_v26, %v7629_v33  ;;  %v5729_v50 = vpop.f32.mrb[142].mxu1 }
 0x324   : > { %4897 = vst [vmem:[%s7710_s18 + $0x58] sm:$0xff] %v4865_v29  ;;  %v4797_v46 = vmul.f32 %v7683_v11, %v4706_v47  ;;  %v4709_v1 = vadd.f32 %v5729_v50, %v7637_v37  ;;  %v4700_v17 = vpop.f32.mrb[143].mxu1 }
 0x325   : > { %4895 = vst [vmem:[%s7710_s18 + $0x48] sm:$0xff] %v4863_v2  ;;  %v4795_v5 = vmul.f32 %v7683_v11, %v4698_v42  ;;  %v4701_v45 = vadd.f32 %v4700_v17, %v7631_v61 }
 0x326   : > { %v4836_v54 = vadd.f32 %v7691_v23, %v4797_v46  ;;  %v4798_v25 = vmul.f32 %v7683_v11, %v4709_v1 }
 0x327   : > { %v4834_v33 = vadd.f32 %v7691_v23, %v4795_v5  ;;  %v4796_v60 = vmul.f32 %v7683_v11, %v4701_v45 }
 0x328   : > { %v4868_v20 = vmax.f32 %v4836_v54, 0.0  ;;  %v4837_v57 = vadd.f32 %v7691_v23, %v4798_v25 }
 0x329   : > { %v4866_v37 = vmax.f32 %v4834_v33, 0.0  ;;  %v4835_v55 = vadd.f32 %v7691_v23, %v4796_v60  ;;  %v5732_v43 = vpop.f32.mrb[144].mxu1 }
 0x32a   : > { %4900 = vst [vmem:[%s7710_s18 + $0x70] sm:$0xff] %v4868_v20  ;;  %v4869_v51 = vmax.f32 %v4837_v57, 0.0  ;;  %v4722_v61 = vadd.f32 %v5732_v43, %v7647_v58  ;;  %v4713_v13 = vpop.f32.mrb[145].mxu1 }
 0x32b   : > { %4898 = vst [vmem:[%s7710_s18 + $0x60] sm:$0xff] %v4866_v37  ;;  %v4867_v48 = vmax.f32 %v4835_v55, 0.0  ;;  %v4714_v41 = vadd.f32 %v4713_v13, %v7641_v31  ;;  %v5733_v30 = vpop.f32.mrb[146].mxu1 }
 0x32c   : > { %4901 = vst [vmem:[%s7710_s18 + $0x78] sm:$0xff] %v4869_v51  ;;  %v4801_v21 = vmul.f32 %v7683_v11, %v4722_v61  ;;  %v4725_v36 = vadd.f32 %v5733_v30, %v7649_v18  ;;  %v4716_v40 = vpop.f32.mrb[147].mxu1 }
 0x32d   : > { %4899 = vst [vmem:[%s7710_s18 + $0x68] sm:$0xff] %v4867_v48  ;;  %v4799_v15 = vmul.f32 %v7683_v11, %v4714_v41  ;;  %v4717_v53 = vadd.f32 %v4716_v40, %v7643_v39 }
 0x32e   : > { %v4840_v58 = vadd.f32 %v7691_v23, %v4801_v21  ;;  %v4802_v49 = vmul.f32 %v7683_v11, %v4725_v36 }
 0x32f   : > { %v4838_v31 = vadd.f32 %v7691_v23, %v4799_v15  ;;  %v4800_v62 = vmul.f32 %v7683_v11, %v4717_v53 }
 0x330   : > { %v4872_v8 = vmax.f32 %v4840_v58, 0.0  ;;  %v4841_v4 = vadd.f32 %v7691_v23, %v4802_v49 }
 0x331   : > { %v4870_v18 = vmax.f32 %v4838_v31, 0.0  ;;  %v4839_v52 = vadd.f32 %v7691_v23, %v4800_v62  ;;  %v5736_v12 = vpop.f32.mrb[148].mxu1 }
 0x332   : > { %4904 = vst [vmem:[%s7710_s18 + $0x90] sm:$0xff] %v4872_v8  ;;  %v4873_v44 = vmax.f32 %v4841_v4, 0.0  ;;  %v4738_v39 = vadd.f32 %v5736_v12, %v7659_v27  ;;  %v4729_v63 = vpop.f32.mrb[149].mxu1 }
 0x333   : > { %4902 = vst [vmem:[%s7710_s18 + $0x80] sm:$0xff] %v4870_v18  ;;  %v4871_v16 = vmax.f32 %v4839_v52, 0.0  ;;  %v4730_v22 = vadd.f32 %v4729_v63, %v7653_v19  ;;  %v5737_v59 = vpop.f32.mrb[150].mxu1 }
 0x334   : > { %4905 = vst [vmem:[%s7710_s18 + $0x98] sm:$0xff] %v4873_v44  ;;  %v4805_v7 = vmul.f32 %v7683_v11, %v4738_v39  ;;  %v4741_v10 = vadd.f32 %v5737_v59, %v7661_v24  ;;  %v4732_v9 = vpop.f32.mrb[151].mxu1 }
 0x335   : > { %4903 = vst [vmem:[%s7710_s18 + $0x88] sm:$0xff] %v4871_v16  ;;  %v4803_v35 = vmul.f32 %v7683_v11, %v4730_v22  ;;  %v4733_v29 = vadd.f32 %v4732_v9, %v7655_v56 }
 0x336   : > { %v4844_v27 = vadd.f32 %v7691_v23, %v4805_v7  ;;  %v4806_v47 = vmul.f32 %v7683_v11, %v4741_v10 }
 0x337   : > { %v4842_v19 = vadd.f32 %v7691_v23, %v4803_v35  ;;  %v4804_v26 = vmul.f32 %v7683_v11, %v4733_v29 }
 0x338   : > { %v4876_v2 = vmax.f32 %v4844_v27, 0.0  ;;  %v4845_v42 = vadd.f32 %v7691_v23, %v4806_v47 }
 0x339   : > { %v4874_v24 = vmax.f32 %v4842_v19, 0.0  ;;  %v4843_v50 = vadd.f32 %v7691_v23, %v4804_v26  ;;  %v5740_v46 = vpop.f32.mrb[152].mxu1 }
 0x33a   : > { %4908 = vst [vmem:[%s7710_s18 + $0xb0] sm:$0xff] %v4876_v2  ;;  %v4877_v1 = vmax.f32 %v4845_v42, 0.0  ;;  %v4754_v56 = vadd.f32 %v5740_v46, %v7671_v34  ;;  %v4745_v17 = vpop.f32.mrb[153].mxu1 }
 0x33b   : > { %4906 = vst [vmem:[%s7710_s18 + $0xa0] sm:$0xff] %v4874_v24  ;;  %v4875_v5 = vmax.f32 %v4843_v50, 0.0  ;;  %v4746_v45 = vadd.f32 %v4745_v17, %v7665_v28  ;;  %v5741_v54 = vpop.f32.mrb[154].mxu1 }
 0x33c   : > { %4909 = vst [vmem:[%s7710_s18 + $0xb8] sm:$0xff] %v4877_v1  ;;  %v4809_v25 = vmul.f32 %v7683_v11, %v4754_v56  ;;  %v4757_v33 = vadd.f32 %v5741_v54, %v7673_v0  ;;  %v4748_v60 = vpop.f32.mrb[155].mxu1 }
 0x33d   : > { %4907 = vst [vmem:[%s7710_s18 + $0xa8] sm:$0xff] %v4875_v5  ;;  %v4807_v20 = vmul.f32 %v7683_v11, %v4746_v45  ;;  %v4749_v57 = vadd.f32 %v4748_v60, %v7667_v14 }
 0x33e   : > { %v4848_v34 = vadd.f32 %v7691_v23, %v4809_v25  ;;  %v4810_v37 = vmul.f32 %v7683_v11, %v4757_v33 }
 0x33f   : > { %v4846_v28 = vadd.f32 %v7691_v23, %v4807_v20  ;;  %v4808_v55 = vmul.f32 %v7683_v11, %v4749_v57 }
 0x340   : > { %v4880_v43 = vmax.f32 %v4848_v34, 0.0  ;;  %v4849_v51 = vadd.f32 %v7691_v23, %v4810_v37 }
 0x341   : > { %v4878_v0 = vmax.f32 %v4846_v28, 0.0  ;;  %v4847_v61 = vadd.f32 %v7691_v23, %v4808_v55  ;;  %v5744_v13 = vpop.f32.mrb[156].mxu1 }
 0x342   : > { %4912 = vst [vmem:[%s7710_s18 + $0xd0] sm:$0xff] %v4880_v43  ;;  %v4881_v48 = vmax.f32 %v4849_v51, 0.0  ;;  %v4770_v14 = vadd.f32 %v5744_v13, %v7704_v38  ;;  %v4761_v41 = vpop.f32.mrb[157].mxu1 }
 0x343   : > { %4910 = vst [vmem:[%s7710_s18 + $0xc0] sm:$0xff] %v4878_v0  ;;  %v4879_v30 = vmax.f32 %v4847_v61, 0.0  ;;  %v4762_v21 = vadd.f32 %v4761_v41, %v7677_v3  ;;  %v5745_v36 = vpop.f32.mrb[158].mxu1 }
 0x344   : > { %4913 = vst [vmem:[%s7710_s18 + $0xd8] sm:$0xff] %v4881_v48  ;;  %v4813_v40 = vmul.f32 %v7683_v11, %v4770_v14  ;;  %v4773_v15 = vadd.f32 %v5745_v36, %v7708_v6  ;;  %v4764_v53 = vpop.f32.mrb[159].mxu1 }
 0x345   : > { %4911 = vst [vmem:[%s7710_s18 + $0xc8] sm:$0xff] %v4879_v30  ;;  %v4811_v58 = vmul.f32 %v7683_v11, %v4762_v21  ;;  %v4765_v38 = vadd.f32 %v4764_v53, %v7685_v32 }
 0x346   : > { %v4852_v49 = vadd.f32 %v7691_v23, %v4813_v40  ;;  %v4814_v31 = vmul.f32 %v7683_v11, %v4773_v15 }
 0x347   : > { %v4850_v3 = vadd.f32 %v7691_v23, %v4811_v58  ;;  %v4812_v62 = vmul.f32 %v7683_v11, %v4765_v38 }
 0x348   : > { %v4884_v6 = vmax.f32 %v4852_v49, 0.0  ;;  %v4853_v8 = vadd.f32 %v7691_v23, %v4814_v31 }
 0x349   : > { %v4882_v4 = vmax.f32 %v4850_v3, 0.0  ;;  %v4851_v32 = vadd.f32 %v7691_v23, %v4812_v62 }
 0x34a   : > { %4916 = vst [vmem:[%s7710_s18 + $0xf0] sm:$0xff] %v4884_v6  ;;  %v4885_v18 = vmax.f32 %v4853_v8, 0.0 }
 0x34b   : > { %4914 = vst [vmem:[%s7710_s18 + $0xe0] sm:$0xff] %v4882_v4  ;;  %v4883_v11 = vmax.f32 %v4851_v32, 0.0 }
 0x34c   : > { %4917 = vst [vmem:[%s7710_s18 + $0xf8] sm:$0xff] %v4885_v18 }
 0x34d   : > { %4915 = vst [vmem:[%s7710_s18 + $0xe8] sm:$0xff] %v4883_v11 }
 0x34e   : > { %5942 = shalt.err (!%p5939_p7)
}
 0x34f   : > { %s5943_s9 = scalar_lea.hbm %s7830_s23, 4096  ;;  %s5947_s16 = scalar_lea.hbm %s7887_s7, 8192 }
 0x350   : > { %p5944_p8 = scmp.ne.s32.totalorder %s7830_s23, %s5943_s9  ;;  %p5948_p1 = scmp.lt.u32.totalorder %s7830_s23, %s7887_s7 }
 0x351   : > { %p5949_p0 = scmp.lt.u32.totalorder %s5947_s16, %s5943_s9  ;;  %p5951_p6 = scmp.lt.u32.totalorder %s5943_s9, %s7830_s23 }
 0x352   : > { %p5945_p11 = pnand %p5944_p8, %p8044_p9 }
 0x353   : > { %p5950_p5 = por %p5949_p0, %p5948_p1 }
 0x354   : > { %p5946_p13 = pneg %p5945_p11 }
 0x355   : > { %p5952_p10 = por %p5951_p6, %p5950_p5 }
 0x357   : > { %p5953_p12 = pnand %p5952_p10, %p5946_p13 }
 0x359   : > { %5956 = shalt.err (!%p5953_p12)
}
 0x35a   : > { %s6003_s21 = smov 128   ;;  %s6004_s22 = smov 8  }
 0x35b   : > { %5750 = dma.vmem_to_hbm [thread:$0]  (%p8044_p9), %s7832_s20, 4096, %s7830_s23, %s7839_s28, %s6003_s21, %s6003_s21, %s6004_s22  }
 0x35c PF: > { %p5762_p2 = scmp.ge.s32.totalorder %s5995_s27, 2  ;;  %s4947_s29 = sand.u32 1, %s5983_s24  }
 0x35d   : > { %p8045_p3 = scmp.ne.s32.totalorder %s7930_s12, 0  ;;  %s4948_s8 = scalar_lea.sflag [#allocation7], %s4947_s29 }
 0x35f   : > { %p5757_p4 = pnand %p5762_p2, %p8045_p3 }
 0x361   : > { %5978 = dma.done.wait (!%p5757_p4), %s4948_s8, 4096  }
 0x362   : > { %5980 = vsyncadd (!%p5757_p4), %s4948_s8, 4294963200  ;;  %p18_p7 = scmp.ge.s32.totalorder %s6070_s30, 4   ;;  %s8046_s24 = smov %s5987_s25 }
 0x363   : > { %s8047_s25 = smov %s5991_s26  ;;  %s8048_s26 = smov %s6081_s10 }
 0x364   : > { %s8049_s27 = smov %s6070_s30  ;;  %20 = sbr.rel (!%p18_p7) target bundleno = 4 (0x4), region = 88 }
 0x36b   :  { %4953 = vsyncpa [#allocation6], 1 }
 0x36c   :  { %4955 = vsyncpa [#allocation6 + $0x1], 1 }
 0x36d   :  { %4956 = vsyncpa [#allocation7], 1 }
 0x36e   :  { %4958 = vsyncpa [#allocation7 + $0x1], 1 }

// kernel: tpu_custom_call.1
= control target key start
LH: loop header
LB: loop body
LE: loop exit
PB: predicated region body
PF: predicated region fallthrough
CT: control target
= control target key end

     0   :  { %9 = vsyncpa [#allocation4], 0  ;;  %s1667_s0 = inlined_call_operand.vmem [shape: bf16[512,36], index: 0, kind: input, shape index: {}]   ;;  %s1668_s1 = inlined_call_operand.vmem [shape: bf16[128,128], index: 1, kind: input, shape index: {}]   ;;  %s1669_s2 = inlined_call_operand.vmem [shape: f32[1,128], index: 2, kind: input, shape index: {}]   ;;  %s1670_s3 = inlined_call_operand.vmem [shape: f32[1,128], index: 3, kind: input, shape index: {}]   ;;  %s1671_s4 = inlined_call_operand.hbm [shape: bf16[512,128], index: 4, kind: output, shape index: {}]  }
   0x1   :  { %11 = vsyncpa [#allocation4 + $0x1], 0  ;;  %s1394_s15 = smov 0   ;;  %s1396_s16 = smov 0  }
   0x2   :  { %s1398_s17 = smov 0   ;;  %s1400_s18 = smov 0  }
   0x3 LB: > { %s1415_s19 = sadd.s32 4294967295, %s1363_s18   ;;  %s949_s20 = sadd.s32 4294967294, %s1363_s18   ;;  %s1363_s18 = sphi %s1400_s18, %s1677_s18   ;;  %s1359_s17 = sphi %s1398_s17, %s1676_s17   ;;  %s1355_s16 = sphi %s1396_s16, %s1675_s16   ;;  %s1351_s15 = sphi %s1394_s15, %s1674_s15  }
   0x4   : > { %s1419_s21 = sadd.s32 1, %s1363_s18   ;;  %s113_s22 = sadd.s32 1, %s1359_s17 }
   0x5   : > { %s110_s23 = ssub.s32 %s1363_s18, %s1419_s21  ;;  %p123_p0 = scmp.ne.s32.totalorder %s1359_s17, %s1355_s16 }
   0x6   : > { %p111_p1 = scmp.eq.s32.totalorder %s110_s23, 0  ;;  %p124_p2 = scmp.eq.s32.totalorder %s1415_s19, 1 }
   0x7   : > { %p129_p3 = scmp.ne.s32.totalorder %s1355_s16, %s1351_s15  ;;  %p130_p4 = scmp.eq.s32.totalorder %s949_s20, 1 }
   0x8   : > { %s1430_s24 = scalar_select %p111_p1, %s1359_s17, %s113_s22  }
   0x9   : > { %p1432_p5 = por %p124_p2, %p123_p0  ;;  %p1436_p6 = por %p130_p4, %p129_p3 }
   0xa   : > { %p952_p7 = scmp.ge.s32.totalorder %s1363_s18, 1  ;;  %p166_p8 = scmp.lt.s32.totalorder %s1363_s18, 3 }
   0xc   : > { %p167_p9 = pnand %p952_p7, %p166_p8 }
   0xd   : > { %v1277_v0 = vld [vmem:[%s1668_s1] sm:$0xff] (!%p167_p9)   ;;  %s954_s29 = sshll.u32 (!%p167_p9), %s1415_s19, 5  ;;  %v1278_v1 = vld [vmem:[%s1668_s1 + $0x8] sm:$0xff] (!%p167_p9)   ;;  %vm200_vm0 = vcmask (!%p167_p9), 1047840   ;;  %v1279_v2 = vld [vmem:[%s1668_s1 + $0x10] sm:$0xff] (!%p167_p9)   ;;  %v1365_v3 = vmov (!%p167_p9), 0  }
   0xe   : > { %170 = sbr.rel (%p167_p9) target bundleno = 309 (0x135), region = 36  ;;  %p193_p10 = scmp.lt.s32.totalorder (!%p167_p9), %s954_s29, 63  ;;  %1171 = vmatprep.subr.bf16.mxu0 (!%p167_p9), %v1277_v0  ;;  %1219 = vmatprep.subr.bf16.mxu1 (!%p167_p9), %v1277_v0  ;;  %201 = vst.msk [vmem:[#allocation2] sm:$0xff] (!%p167_p9), %vm200_vm0, %v1365_v3  ;;  %202 = vst.msk [vmem:[#allocation2 + $0x8] sm:$0xff] (!%p167_p9), %vm200_vm0, %v1365_v3  ;;  %v1280_v4 = vld [vmem:[%s1668_s1 + $0x18] sm:$0xff] (!%p167_p9)   ;;  %vm345_vm1 = vcmask (!%p167_p9), 293888  }
   0xf   : > { %1172 = vmatpush3.bf16.msra.mxu0 (!%p167_p9), %v1277_v0  ;;  %1227 = vmatpush3.bf16.msra.mxu1 (!%p167_p9), %v1277_v0  ;;  %203 = vst.msk [vmem:[#allocation2 + $0x10] sm:$0xff] (!%p167_p9), %vm200_vm0, %v1365_v3  ;;  %204 = vst.msk [vmem:[#allocation2 + $0x18] sm:$0xff] (!%p167_p9), %vm200_vm0, %v1365_v3  ;;  %v1281_v7 = vld [vmem:[%s1668_s1 + $0x20] sm:$0xff] (!%p167_p9)   ;;  %v1282_v12 = vld [vmem:[%s1668_s1 + $0x28] sm:$0xff] (!%p167_p9)   ;;  %s189_s9 = sand.u32 (!%p167_p9), 1, %s1355_s16   ;;  %s1051_s12 = sshll.u32 (!%p167_p9), %s1415_s19, 11 }
  0x10   : > { %1173 = vmatprep.subr.bf16.mxu0 (!%p167_p9), %v1278_v1  ;;  %1220 = vmatprep.subr.bf16.mxu1 (!%p167_p9), %v1278_v1  ;;  %205 = vst.msk [vmem:[#allocation2 + $0x20] sm:$0xff] (!%p167_p9), %vm200_vm0, %v1365_v3  ;;  %206 = vst.msk [vmem:[#allocation2 + $0x28] sm:$0xff] (!%p167_p9), %vm200_vm0, %v1365_v3  ;;  %v1283_v20 = vld [vmem:[%s1668_s1 + $0x30] sm:$0xff] (!%p167_p9)   ;;  %v1284_v23 = vld [vmem:[%s1668_s1 + $0x38] sm:$0xff] (!%p167_p9)   ;;  %s953_s10 = sshll.u32 (!%p167_p9), %s189_s9, 7  ;;  %s1616_s19 = scalar_lea.hbm (!%p167_p9), %s1671_s4, %s1051_s12 }
  0x11   : > { %207 = vst.msk [vmem:[#allocation2 + $0x30] sm:$0xff] (!%p167_p9), %vm200_vm0, %v1365_v3  ;;  %208 = vst.msk [vmem:[#allocation2 + $0x38] sm:$0xff] (!%p167_p9), %vm200_vm0, %v1365_v3  ;;  %v1523_v41 = vld [vmem:[%s1669_s2] ss:$0 sm:$0xff] (!%p167_p9)  ;;  %s1626_s22 = scalar_lea.sflag (!%p167_p9), [#allocation4], %s189_s9  ;;  %s1366_s27 = smov (!%p167_p9), [#allocation3]  }
  0x12   : > { %209 = vst.msk [vmem:[#allocation2 + $0x40] sm:$0xff] (!%p167_p9), %vm200_vm0, %v1365_v3  ;;  %210 = vst.msk [vmem:[#allocation2 + $0x48] sm:$0xff] (!%p167_p9), %vm200_vm0, %v1365_v3  ;;  %v1528_v43 = vld [vmem:[%s1670_s3] ss:$0 sm:$0xff] (!%p167_p9)  ;;  %s1305_s28 = sshll.u32 (!%p167_p9), %s1366_s27, 4  ;;  %s1306_s28 = int_to_ptr.vmem [resolvable:$false] %s1305_s28 }
  0x13   : > { %211 = vst.msk [vmem:[#allocation2 + $0x50] sm:$0xff] (!%p167_p9), %vm200_vm0, %v1365_v3  ;;  %212 = vst.msk [vmem:[#allocation2 + $0x58] sm:$0xff] (!%p167_p9), %vm200_vm0, %v1365_v3  ;;  %1174 = vmatpush3.bf16.msra.mxu0 (!%p167_p9), %v1278_v1  ;;  %1228 = vmatpush3.bf16.msra.mxu1 (!%p167_p9), %v1278_v1 }
  0x14   : > { %213 = vst.msk [vmem:[#allocation2 + $0x60] sm:$0xff] (!%p167_p9), %vm200_vm0, %v1365_v3  ;;  %214 = vst.msk [vmem:[#allocation2 + $0x68] sm:$0xff] (!%p167_p9), %vm200_vm0, %v1365_v3  ;;  %1175 = vmatprep.subr.bf16.mxu0 (!%p167_p9), %v1279_v2  ;;  %1221 = vmatprep.subr.bf16.mxu1 (!%p167_p9), %v1279_v2 }
  0x15   : > { %s1679_s29 = smov (!%p193_p10, %s954_s29), 63  ;;  %215 = vst.msk [vmem:[#allocation2 + $0x70] sm:$0xff] %vm200_vm0, %v1365_v3  ;;  %216 = vst.msk [vmem:[#allocation2 + $0x78] sm:$0xff] %vm200_vm0, %v1365_v3 }
  0x16   : > { %s955_s8 = sshll.u32 %s1679_s29, 2  ;;  %s1307_s29 = scalar_lea.vmem %s1306_s28, 4096 }
  0x17   : > { %s1471_s11 = scalar_lea.vmem %s1667_s0, %s955_s8  ;;  %1176 = vmatpush3.bf16.msra.mxu0 %v1279_v2  ;;  %1229 = vmatpush3.bf16.msra.mxu1 %v1279_v2 }
  0x18   : > { %v1285_v5 = vld [vmem:[%s1471_s11] sm:$0xff]   ;;  %v1287_v8 = vld [vmem:[%s1471_s11 + $0x8] sm:$0xff]   ;;  %1177 = vmatprep.subr.bf16.mxu0 %v1280_v4  ;;  %1222 = vmatprep.subr.bf16.mxu1 %v1280_v4  ;;  %v1289_v10 = vld [vmem:[%s1471_s11 + $0x10] sm:$0xff]  }
  0x19   : > { %v1286_v6 = vld [vmem:[%s1471_s11 + $0x40] sm:$0xff]   ;;  %346 = vst.msk [vmem:[#allocation2] sm:$0xff] %vm345_vm1, %v1285_v5  ;;  %v1288_v9 = vld [vmem:[%s1471_s11 + $0x48] sm:$0xff]   ;;  %347 = vst.msk [vmem:[#allocation2 + $0x8] sm:$0xff] %vm345_vm1, %v1287_v8 }
  0x1a   : > { %354 = vst.msk [vmem:[#allocation2 + $0x40] sm:$0xff] %vm345_vm1, %v1286_v6  ;;  %355 = vst.msk [vmem:[#allocation2 + $0x48] sm:$0xff] %vm345_vm1, %v1288_v9  ;;  %v1290_v11 = vld [vmem:[%s1471_s11 + $0x50] sm:$0xff]   ;;  %v1291_v13 = vld [vmem:[%s1471_s11 + $0x18] sm:$0xff]  }
  0x1b   : > { %348 = vst.msk [vmem:[#allocation2 + $0x10] sm:$0xff] %vm345_vm1, %v1289_v10  ;;  %1178 = vmatpush3.bf16.msra.mxu0 %v1280_v4  ;;  %1230 = vmatpush3.bf16.msra.mxu1 %v1280_v4  ;;  %356 = vst.msk [vmem:[#allocation2 + $0x50] sm:$0xff] %vm345_vm1, %v1290_v11  ;;  %v1292_v14 = vld [vmem:[%s1471_s11 + $0x58] sm:$0xff]   ;;  %v1293_v15 = vld [vmem:[%s1471_s11 + $0x20] sm:$0xff]  }
  0x1c   : > { %1179 = vmatprep.subr.bf16.mxu0 %v1281_v7  ;;  %1223 = vmatprep.subr.bf16.mxu1 %v1281_v7  ;;  %349 = vst.msk [vmem:[#allocation2 + $0x18] sm:$0xff] %vm345_vm1, %v1291_v13  ;;  %357 = vst.msk [vmem:[#allocation2 + $0x58] sm:$0xff] %vm345_vm1, %v1292_v14  ;;  %v1294_v18 = vld [vmem:[%s1471_s11 + $0x60] sm:$0xff]   ;;  %v1295_v19 = vld [vmem:[%s1471_s11 + $0x28] sm:$0xff]  }
  0x1d   : > { %350 = vst.msk [vmem:[#allocation2 + $0x20] sm:$0xff] %vm345_vm1, %v1293_v15  ;;  %358 = vst.msk [vmem:[#allocation2 + $0x60] sm:$0xff] %vm345_vm1, %v1294_v18  ;;  %v1296_v21 = vld [vmem:[%s1471_s11 + $0x68] sm:$0xff]   ;;  %v1297_v22 = vld [vmem:[%s1471_s11 + $0x30] sm:$0xff]  }
  0x1e   : > { %351 = vst.msk [vmem:[#allocation2 + $0x28] sm:$0xff] %vm345_vm1, %v1295_v19  ;;  %359 = vst.msk [vmem:[#allocation2 + $0x68] sm:$0xff] %vm345_vm1, %v1296_v21  ;;  %v1298_v24 = vld [vmem:[%s1471_s11 + $0x70] sm:$0xff]   ;;  %v1299_v25 = vld [vmem:[%s1471_s11 + $0x38] sm:$0xff]  }
  0x1f   : > { %1180 = vmatpush3.bf16.msra.mxu0 %v1281_v7  ;;  %1231 = vmatpush3.bf16.msra.mxu1 %v1281_v7  ;;  %352 = vst.msk [vmem:[#allocation2 + $0x30] sm:$0xff] %vm345_vm1, %v1297_v22  ;;  %360 = vst.msk [vmem:[#allocation2 + $0x70] sm:$0xff] %vm345_vm1, %v1298_v24  ;;  %v1300_v26 = vld [vmem:[%s1471_s11 + $0x78] sm:$0xff]   ;;  %s1553_s11 = scalar_lea.vmem [#allocation3], %s953_s10 }
  0x20   : > { %v362_v16 = vld [vmem:[#allocation2] sm:$0xff]  ;;  %1181 = vmatprep.subr.bf16.mxu0 %v1282_v12  ;;  %1224 = vmatprep.subr.bf16.mxu1 %v1282_v12  ;;  %353 = vst.msk [vmem:[#allocation2 + $0x38] sm:$0xff] %vm345_vm1, %v1299_v25  ;;  %361 = vst.msk [vmem:[#allocation2 + $0x78] sm:$0xff] %vm345_vm1, %v1300_v26  ;;  %v363_v27 = vld [vmem:[#allocation2 + $0x8] sm:$0xff]  ;;  %s887_s13 = sshll.u32 %s1553_s11, 4  ;;  %s1618_s13 = int_to_ptr.vmem [resolvable:$true] %s887_s13 }
  0x21   : > { %1187 = vmatprep.mubr.bf16.mxu0 %v362_v16  ;;  %v370_v17 = vld [vmem:[#allocation2 + $0x40] sm:$0xff]  ;;  %v371_v28 = vld [vmem:[#allocation2 + $0x48] sm:$0xff]  ;;  %s1301_s23 = scalar_lea.vmem %s1618_s13, 2048  ;;  %p1308_p0 = scmp.lt.s32.totalorder %s1618_s13, %s1306_s28 }
  0x22   : > { %1203 = vmatprep.mubr.bf16.mxu1 %v370_v17  ;;  %v364_v29 = vld [vmem:[#allocation2 + $0x10] sm:$0xff]  ;;  %p1302_p11 = scmp.ne.s32.totalorder %s1618_s13, %s1301_s23  ;;  %p1309_p1 = scmp.lt.s32.totalorder %s1307_s29, %s1301_s23 }
  0x23   : > { %1182 = vmatpush3.bf16.msra.mxu0 %v1282_v12  ;;  %1232 = vmatpush3.bf16.msra.mxu1 %v1282_v12  ;;  %v372_v30 = vld [vmem:[#allocation2 + $0x50] sm:$0xff]  ;;  %v365_v31 = vld [vmem:[#allocation2 + $0x18] sm:$0xff] }
  0x24   : > { %1183 = vmatprep.subr.bf16.mxu0 %v1283_v20  ;;  %1225 = vmatprep.subr.bf16.mxu1 %v1283_v20  ;;  %v373_v32 = vld [vmem:[#allocation2 + $0x58] sm:$0xff]  ;;  %v366_v33 = vld [vmem:[#allocation2 + $0x20] sm:$0xff]  ;;  %p1303_p12 = pnand %p1302_p11, %p1432_p5  ;;  %p1310_p2 = por %p1309_p1, %p1308_p0 }
  0x25   : > { %v374_v34 = vld [vmem:[#allocation2 + $0x60] sm:$0xff]  ;;  %v367_v35 = vld [vmem:[#allocation2 + $0x28] sm:$0xff] }
  0x26   : > { %v375_v36 = vld [vmem:[#allocation2 + $0x68] sm:$0xff]  ;;  %v368_v37 = vld [vmem:[#allocation2 + $0x30] sm:$0xff]  ;;  %p1304_p13 = pneg %p1303_p12 }
  0x27   : > { %1184 = vmatpush3.bf16.msra.mxu0 %v1283_v20  ;;  %1233 = vmatpush3.bf16.msra.mxu1 %v1283_v20  ;;  %v376_v38 = vld [vmem:[#allocation2 + $0x70] sm:$0xff]  ;;  %v369_v39 = vld [vmem:[#allocation2 + $0x38] sm:$0xff] }
  0x28   : > { %1185 = vmatprep.subr.bf16.mxu0 %v1284_v23  ;;  %1226 = vmatprep.subr.bf16.mxu1 %v1284_v23  ;;  %v377_v40 = vld [vmem:[#allocation2 + $0x78] sm:$0xff]  ;;  %p1311_p3 = pnand %p1310_p2, %p1304_p13 }
  0x2b   : > { %1186 = vmatpush3.bf16.msra.mxu0 %v1284_v23  ;;  %1234 = vmatpush3.bf16.msra.mxu1 %v1284_v23 }
  0x2e   : > { %1188 = vmatmul.mubr.bf16.vlgmr.msra.gmra.mrb[0].mxu0 %v363_v27  ;;  %1204 = vmatmul.mubr.bf16.vlgmr.msra.gmra.mrb[0].mxu1 %v371_v28 }
  0x2f   : > { %1191 = vmatprep.mubr.bf16.mxu0 %v364_v29  ;;  %1207 = vmatprep.mubr.bf16.mxu1 %v372_v30 }
  0x36   : > { %1192 = vmatmul.mubr.bf16.gmra.mrb[4].mxu0 %v365_v31  ;;  %1208 = vmatmul.mubr.bf16.gmra.mrb[4].mxu1 %v373_v32 }
  0x37   : > { %1195 = vmatprep.mubr.bf16.mxu0 %v366_v33  ;;  %1211 = vmatprep.mubr.bf16.mxu1 %v374_v34 }
  0x3e   : > { %1196 = vmatmul.mubr.bf16.gmra.mrb[8].mxu0 %v367_v35  ;;  %1212 = vmatmul.mubr.bf16.gmra.mrb[8].mxu1 %v375_v36 }
  0x3f   : > { %1199 = vmatprep.mubr.bf16.mxu0 %v368_v37  ;;  %1215 = vmatprep.mubr.bf16.mxu1 %v376_v38 }
  0x46   : > { %1200 = vmatmul.mubr.bf16.gmra.mrb[12].mxu0 %v369_v39  ;;  %1216 = vmatmul.mubr.bf16.gmra.mrb[12].mxu1 %v377_v40 }
 0x101   : > { %v1189_v42 = vpop.f32.mrb[0].mxu0  ;;  %v1205_v44 = vpop.f32.mrb[0].mxu1 }
 0x102   : > { %v612_v45 = vmul.f32 %v1189_v42, %v1523_v41  ;;  %v628_v46 = vmul.f32 %v1205_v44, %v1523_v41  ;;  %v476_v47 = vpop.f32.mrb[1].mxu0  ;;  %v540_v48 = vpop.f32.mrb[1].mxu1 }
 0x103   : > { %v610_v49 = vmul.f32 %v1523_v41, %v476_v47  ;;  %v626_v50 = vmul.f32 %v1523_v41, %v540_v48  ;;  %v1190_v51 = vpop.f32.mrb[2].mxu0  ;;  %v1206_v52 = vpop.f32.mrb[2].mxu1 }
 0x104   : > { %v651_v53 = vadd.f32 %v1528_v43, %v612_v45  ;;  %v667_v54 = vadd.f32 %v1528_v43, %v628_v46  ;;  %v613_v55 = vmul.f32 %v1190_v51, %v1523_v41  ;;  %v629_v56 = vmul.f32 %v1206_v52, %v1523_v41  ;;  %v479_v57 = vpop.f32.mrb[3].mxu0  ;;  %v543_v58 = vpop.f32.mrb[3].mxu1 }
 0x105   : > { %v649_v59 = vadd.f32 %v1528_v43, %v610_v49  ;;  %v665_v60 = vadd.f32 %v1528_v43, %v626_v50  ;;  %v611_v61 = vmul.f32 %v1523_v41, %v479_v57  ;;  %v627_v62 = vmul.f32 %v1523_v41, %v543_v58 }
 0x106   : > { %v652_v63 = vadd.f32 %v1528_v43, %v613_v55  ;;  %v668_v0 = vadd.f32 %v1528_v43, %v629_v56  ;;  %v683_v3 = vmax.f32 %v651_v53, 0.0  ;;  %v699_v4 = vmax.f32 %v667_v54, 0.0 }
 0x107   : > { %v650_v1 = vadd.f32 %v1528_v43, %v611_v61  ;;  %v666_v2 = vadd.f32 %v1528_v43, %v627_v62  ;;  %v681_v7 = vmax.f32 %v649_v59, 0.0  ;;  %v697_v8 = vmax.f32 %v665_v60, 0.0 }
 0x108   : > { %v684_v5 = vmax.f32 %v652_v63, 0.0  ;;  %v700_v6 = vmax.f32 %v668_v0, 0.0 }
 0x109   : > { %v682_v9 = vmax.f32 %v650_v1, 0.0  ;;  %v698_v10 = vmax.f32 %v666_v2, 0.0  ;;  %v1193_v11 = vpop.f32.mrb[4].mxu0  ;;  %v1209_v12 = vpop.f32.mrb[4].mxu1 }
 0x10a   : > { %v1060_v13 = vpack.c.bf16 %v684_v5, %v683_v3  ;;  %v1100_v14 = vpack.c.bf16 %v700_v6, %v699_v4  ;;  %v616_v15 = vmul.f32 %v1193_v11, %v1523_v41  ;;  %v632_v16 = vmul.f32 %v1209_v12, %v1523_v41  ;;  %v492_v17 = vpop.f32.mrb[5].mxu0  ;;  %v556_v18 = vpop.f32.mrb[5].mxu1 }
 0x10b   : > { %v1055_v19 = vpack.c.bf16 %v682_v9, %v681_v7  ;;  %v1095_v20 = vpack.c.bf16 %v698_v10, %v697_v8  ;;  %v614_v21 = vmul.f32 %v1523_v41, %v492_v17  ;;  %v630_v22 = vmul.f32 %v1523_v41, %v556_v18  ;;  %v1194_v23 = vpop.f32.mrb[6].mxu0  ;;  %v1210_v24 = vpop.f32.mrb[6].mxu1 }
 0x10c   : > { %1132 = vst [vmem:[%s1553_s11 + $0x8] sm:$0xff] %v1060_v13   ;;  %1140 = vst [vmem:[%s1553_s11 + $0x48] sm:$0xff] %v1100_v14   ;;  %v655_v25 = vadd.f32 %v1528_v43, %v616_v15  ;;  %v671_v26 = vadd.f32 %v1528_v43, %v632_v16  ;;  %v617_v27 = vmul.f32 %v1194_v23, %v1523_v41  ;;  %v495_v29 = vpop.f32.mrb[7].mxu0  ;;  %v559_v30 = vpop.f32.mrb[7].mxu1 }
 0x10d   : > { %v633_v28 = vmul.f32 %v1210_v24, %v1523_v41  ;;  %1056 = vst [vmem:[%s1553_s11] sm:$0xff] %v1055_v19   ;;  %1139 = vst [vmem:[%s1553_s11 + $0x40] sm:$0xff] %v1095_v20   ;;  %v653_v31 = vadd.f32 %v1528_v43, %v614_v21  ;;  %v669_v32 = vadd.f32 %v1528_v43, %v630_v22 }
 0x10e   : > { %v615_v33 = vmul.f32 %v1523_v41, %v495_v29  ;;  %v631_v34 = vmul.f32 %v1523_v41, %v559_v30  ;;  %v656_v35 = vadd.f32 %v1528_v43, %v617_v27  ;;  %v687_v39 = vmax.f32 %v655_v25, 0.0 }
 0x10f   : > { %v672_v36 = vadd.f32 %v1528_v43, %v633_v28  ;;  %v703_v40 = vmax.f32 %v671_v26, 0.0  ;;  %v685_v45 = vmax.f32 %v653_v31, 0.0  ;;  %v701_v46 = vmax.f32 %v669_v32, 0.0 }
 0x110   : > { %v654_v37 = vadd.f32 %v1528_v43, %v615_v33  ;;  %v670_v38 = vadd.f32 %v1528_v43, %v631_v34  ;;  %v688_v42 = vmax.f32 %v656_v35, 0.0 }
 0x111   : > { %v704_v44 = vmax.f32 %v672_v36, 0.0  ;;  %v1197_v49 = vpop.f32.mrb[8].mxu0  ;;  %v1213_v50 = vpop.f32.mrb[8].mxu1 }
 0x112   : > { %v686_v47 = vmax.f32 %v654_v37, 0.0  ;;  %v702_v48 = vmax.f32 %v670_v38, 0.0  ;;  %v1070_v51 = vpack.c.bf16 %v688_v42, %v687_v39  ;;  %v620_v53 = vmul.f32 %v1197_v49, %v1523_v41  ;;  %v508_v55 = vpop.f32.mrb[9].mxu0  ;;  %v572_v56 = vpop.f32.mrb[9].mxu1 }
 0x113   : > { %v1110_v52 = vpack.c.bf16 %v704_v44, %v703_v40  ;;  %v636_v54 = vmul.f32 %v1213_v50, %v1523_v41  ;;  %v618_v59 = vmul.f32 %v1523_v41, %v508_v55  ;;  %v634_v60 = vmul.f32 %v1523_v41, %v572_v56  ;;  %v1198_v61 = vpop.f32.mrb[10].mxu0  ;;  %v1214_v62 = vpop.f32.mrb[10].mxu1 }
 0x114   : > { %v1065_v57 = vpack.c.bf16 %v686_v47, %v685_v45  ;;  %v1105_v58 = vpack.c.bf16 %v702_v48, %v701_v46  ;;  %1134 = vst [vmem:[%s1553_s11 + $0x18] sm:$0xff] %v1070_v51   ;;  %v659_v63 = vadd.f32 %v1528_v43, %v620_v53  ;;  %v621_v1 = vmul.f32 %v1198_v61, %v1523_v41  ;;  %v511_v3 = vpop.f32.mrb[11].mxu0  ;;  %v575_v4 = vpop.f32.mrb[11].mxu1 }
 0x115   : > { %1142 = vst [vmem:[%s1553_s11 + $0x58] sm:$0xff] %v1110_v52   ;;  %v675_v0 = vadd.f32 %v1528_v43, %v636_v54  ;;  %v637_v2 = vmul.f32 %v1214_v62, %v1523_v41  ;;  %v657_v5 = vadd.f32 %v1528_v43, %v618_v59  ;;  %v673_v6 = vadd.f32 %v1528_v43, %v634_v60 }
 0x116   : > { %1133 = vst [vmem:[%s1553_s11 + $0x10] sm:$0xff] %v1065_v57   ;;  %1141 = vst [vmem:[%s1553_s11 + $0x50] sm:$0xff] %v1105_v58   ;;  %v619_v7 = vmul.f32 %v1523_v41, %v511_v3  ;;  %v635_v8 = vmul.f32 %v1523_v41, %v575_v4  ;;  %v660_v9 = vadd.f32 %v1528_v43, %v621_v1  ;;  %v691_v13 = vmax.f32 %v659_v63, 0.0 }
 0x117   : > { %v676_v10 = vadd.f32 %v1528_v43, %v637_v2  ;;  %v707_v14 = vmax.f32 %v675_v0, 0.0  ;;  %v689_v17 = vmax.f32 %v657_v5, 0.0  ;;  %v705_v18 = vmax.f32 %v673_v6, 0.0 }
 0x118   : > { %v658_v11 = vadd.f32 %v1528_v43, %v619_v7  ;;  %v674_v12 = vadd.f32 %v1528_v43, %v635_v8  ;;  %v692_v15 = vmax.f32 %v660_v9, 0.0 }
 0x119   : > { %v708_v16 = vmax.f32 %v676_v10, 0.0  ;;  %v1201_v21 = vpop.f32.mrb[12].mxu0  ;;  %v1217_v22 = vpop.f32.mrb[12].mxu1 }
 0x11a   : > { %v690_v19 = vmax.f32 %v658_v11, 0.0  ;;  %v706_v20 = vmax.f32 %v674_v12, 0.0  ;;  %v1080_v23 = vpack.c.bf16 %v692_v15, %v691_v13  ;;  %v624_v25 = vmul.f32 %v1201_v21, %v1523_v41  ;;  %v524_v27 = vpop.f32.mrb[13].mxu0  ;;  %v588_v28 = vpop.f32.mrb[13].mxu1 }
 0x11b   : > { %v1120_v24 = vpack.c.bf16 %v708_v16, %v707_v14  ;;  %v640_v26 = vmul.f32 %v1217_v22, %v1523_v41  ;;  %v622_v31 = vmul.f32 %v1523_v41, %v524_v27  ;;  %v638_v32 = vmul.f32 %v1523_v41, %v588_v28  ;;  %v1202_v33 = vpop.f32.mrb[14].mxu0  ;;  %v1218_v34 = vpop.f32.mrb[14].mxu1 }
 0x11c   : > { %v1075_v29 = vpack.c.bf16 %v690_v19, %v689_v17  ;;  %v1115_v30 = vpack.c.bf16 %v706_v20, %v705_v18  ;;  %1136 = vst [vmem:[%s1553_s11 + $0x28] sm:$0xff] %v1080_v23   ;;  %v663_v35 = vadd.f32 %v1528_v43, %v624_v25  ;;  %v625_v37 = vmul.f32 %v1202_v33, %v1523_v41  ;;  %v527_v39 = vpop.f32.mrb[15].mxu0  ;;  %v591_v40 = vpop.f32.mrb[15].mxu1 }
 0x11d   : > { %1144 = vst [vmem:[%s1553_s11 + $0x68] sm:$0xff] %v1120_v24   ;;  %v679_v36 = vadd.f32 %v1528_v43, %v640_v26  ;;  %v641_v38 = vmul.f32 %v1218_v34, %v1523_v41  ;;  %v661_v42 = vadd.f32 %v1528_v43, %v622_v31  ;;  %v677_v44 = vadd.f32 %v1528_v43, %v638_v32 }
 0x11e   : > { %1135 = vst [vmem:[%s1553_s11 + $0x20] sm:$0xff] %v1075_v29   ;;  %1143 = vst [vmem:[%s1553_s11 + $0x60] sm:$0xff] %v1115_v30   ;;  %v623_v45 = vmul.f32 %v1523_v41, %v527_v39  ;;  %v639_v46 = vmul.f32 %v1523_v41, %v591_v40  ;;  %v664_v47 = vadd.f32 %v1528_v43, %v625_v37  ;;  %v695_v51 = vmax.f32 %v663_v35, 0.0 }
 0x11f   : > { %v680_v48 = vadd.f32 %v1528_v43, %v641_v38  ;;  %v711_v52 = vmax.f32 %v679_v36, 0.0  ;;  %v693_v41 = vmax.f32 %v661_v42, 0.0  ;;  %v709_v55 = vmax.f32 %v677_v44, 0.0 }
 0x120   : > { %v662_v49 = vadd.f32 %v1528_v43, %v623_v45  ;;  %v678_v50 = vadd.f32 %v1528_v43, %v639_v46  ;;  %v696_v53 = vmax.f32 %v664_v47, 0.0 }
 0x121   : > { %v712_v54 = vmax.f32 %v680_v48, 0.0 }
 0x122   : > { %v694_v56 = vmax.f32 %v662_v49, 0.0  ;;  %v710_v57 = vmax.f32 %v678_v50, 0.0  ;;  %v1090_v58 = vpack.c.bf16 %v696_v53, %v695_v51 }
 0x123   : > { %v1130_v59 = vpack.c.bf16 %v712_v54, %v711_v52 }
 0x124   : > { %v1085_v43 = vpack.c.bf16 %v694_v56, %v693_v41  ;;  %v1125_v60 = vpack.c.bf16 %v710_v57, %v709_v55  ;;  %1138 = vst [vmem:[%s1553_s11 + $0x38] sm:$0xff] %v1090_v58  }
 0x125   : > { %1146 = vst [vmem:[%s1553_s11 + $0x78] sm:$0xff] %v1130_v59  }
 0x126   : > { %1137 = vst [vmem:[%s1553_s11 + $0x30] sm:$0xff] %v1085_v43   ;;  %1145 = vst [vmem:[%s1553_s11 + $0x70] sm:$0xff] %v1125_v60  }
 0x127   : > { %1314 = shalt.err (!%p1311_p3)
}
 0x128   : > { %s1315_s30 = scalar_lea.hbm %s1616_s19, 2048  ;;  %s1319_s7 = scalar_lea.hbm %s1671_s4, 4096 }
 0x129   : > { %p1316_p4 = scmp.ne.s32.totalorder %s1616_s19, %s1315_s30  ;;  %p1320_p9 = scmp.lt.u32.totalorder %s1616_s19, %s1671_s4 }
 0x12a   : > { %p1321_p10 = scmp.lt.u32.totalorder %s1319_s7, %s1315_s30  ;;  %p1323_p12 = scmp.lt.u32.totalorder %s1315_s30, %s1616_s19 }
 0x12b   : > { %p1317_p7 = pnand %p1316_p4, %p1432_p5 }
 0x12c   : > { %p1322_p11 = por %p1321_p10, %p1320_p9 }
 0x12d   : > { %p1318_p8 = pneg %p1317_p7 }
 0x12e   : > { %p1324_p13 = por %p1323_p12, %p1322_p11 }
 0x130   : > { %p1325_p0 = pnand %p1324_p13, %p1318_p8 }
 0x132   : > { %1328 = shalt.err (!%p1325_p0)
}
 0x133   : > { %s1367_s10 = smov 64   ;;  %s1368_s11 = smov 4  }
 0x134   : > { %1235 = dma.vmem_to_hbm [thread:$0]  (%p1432_p5), %s1618_s13, 2048, %s1616_s19, %s1626_s22, %s1367_s10, %s1367_s10, %s1368_s11  }
 0x135 PF: > { %p1241_p1 = scmp.ge.s32.totalorder %s1363_s18, 2  ;;  %s902_s12 = sand.u32 1, %s1351_s15  }
 0x136   : > { %s903_s14 = scalar_lea.sflag [#allocation4], %s902_s12 }
 0x137   : > { %p1238_p2 = pnand %p1241_p1, %p1436_p6 }
 0x139   : > { %1346 = dma.done.wait (!%p1238_p2), %s903_s14, 2048  }
 0x13a   : > { %1348 = vsyncadd (!%p1238_p2), %s903_s14, 4294965248  ;;  %p14_p3 = scmp.ge.s32.totalorder %s1419_s21, 4   ;;  %s1674_s15 = smov %s1355_s16 }
 0x13b   : > { %s1675_s16 = smov %s1359_s17  ;;  %s1676_s17 = smov %s1430_s24 }
 0x13c   : > { %s1677_s18 = smov %s1419_s21  ;;  %16 = sbr.rel (!%p14_p3) target bundleno = 3 (0x3), region = 71 }
 0x143   :  { %908 = vsyncpa [#allocation4], 1 }
 0x144   :  { %910 = vsyncpa [#allocation4 + $0x1], 1 }

</bundles_post_ra>
